<compile_context>
chip_gen: v7x
topology: tpu7x:2x2x1
jax: 0.10.0
libtpu: 0.0.40
codegen_flags: <defaults>
</compile_context>

<pallas_src>
import functools

import jax
import jax.numpy as jnp
from jax.experimental import pallas as pl
from jax.experimental.pallas import tpu as pltpu


def _round_up(x, m):
    return (x + m - 1) // m * m


def _fused_mlp_kernel(*refs, num_layers):
    """Fused weight-normalized MLP for one batch tile.

    refs = (x_ref, w1_ref, b1_ref, ..., wL_ref, bL_ref, feat_ref, out_ref)
      x_ref   : (Bt, K0p)   activation tile (padded features on lanes)
      wi_ref  : (Kip, Nip)  weight-norm-folded, transposed, padded weights
      bi_ref  : (1,  Nip)   bias row
      feat_ref: (Bt, NFp)   last hidden activations (post-ReLU)
      out_ref : (Bt, NOp)   logits
    """
    x_ref = refs[0]
    layer_refs = refs[1:1 + 2 * num_layers]
    feat_ref, out_ref = refs[1 + 2 * num_layers:]

    h = x_ref[...]
    for i in range(num_layers):
        w_ref = layer_refs[2 * i]
        b_ref = layer_refs[2 * i + 1]
        y = jnp.dot(h, w_ref[...], preferred_element_type=jnp.float32)
        y = y + b_ref[...]
        if i < num_layers - 1:
            h = jnp.maximum(y, 0.0)
            if i == num_layers - 2:           # feature = last hidden ReLU output
                feat_ref[...] = h.astype(feat_ref.dtype)
        else:
            out_ref[...] = y.astype(out_ref.dtype)


def init_discriminator_params(key, input_dim=28 ** 2, output_dim=10,
                              weight_init_stdv=0.1):
    # LinearWeightNorm init: weight ~ N(0, 1) * 0.1, bias = 0, weight_scale = 1
    dims = [input_dim, 1000, 500, 250, 250, 250, output_dim]
    params = []
    for i in range(len(dims) - 1):
        key, wk = jax.random.split(key)
        w = jax.random.normal(wk, (dims[i + 1], dims[i]), jnp.float32) * weight_init_stdv
        b = jnp.zeros((dims[i + 1],), jnp.float32)
        params.append((w, b, 1.0))
    return params


def prepare_discriminator(params, dtype=jnp.float32):
    """One-time prep (weights are static in eval):
    fold weight-norm into the weights, transpose to (in, out), pad to
    multiples of 128 so the per-forward path has zero pad/normalize work.
    (dtype=jnp.bfloat16 halves weight DMA/VMEM; needs looser test tolerance.)
    """
    padded, dims = [], []
    for (w, b, scale) in params:
        N, K = w.shape
        w = w.astype(jnp.float32)
        w_hat = w * scale / jnp.sqrt(jnp.sum(w ** 2, axis=1, keepdims=True))
        Kp, Np = _round_up(K, 128), _round_up(N, 128)
        w_p = jnp.zeros((Kp, Np), dtype).at[:K, :N].set(w_hat.T.astype(dtype))
        b_p = jnp.zeros((1, Np), jnp.float32).at[0, :N].set(b.astype(jnp.float32))
        padded.append((w_p, b_p))
        dims.append((N, K))
    return padded, dims


def discriminator_forward(prepared, x, feature=False, *, batch_tile=256):
    padded, dims = prepared
    num_layers = len(padded)
    input_dim = dims[0][1]
    output_dim = dims[-1][0]
    feat_dim = dims[-2][0]

    x = x.reshape(-1, input_dim).astype(jnp.float32)
    B = x.shape[0]

    # Batch tiling: one tile for small batches; otherwise stream batch_tile-row
    # tiles while the (VMEM-resident) weights are reused across all tiles.
    Bp = _round_up(max(B, 8), 8)
    if Bp <= batch_tile:
        Bt = Bp
    else:
        Bt = batch_tile
        Bp = _round_up(Bp, Bt)
    n_btiles = Bp // Bt

    K0p = padded[0][0].shape[0]
    NFp = padded[-2][0].shape[1]
    NOp = padded[-1][0].shape[1]

    x_p = jnp.zeros((Bp, K0p), jnp.float32).at[:B, :input_dim].set(x)

    flat_inputs = [x_p]
    in_specs = [pl.BlockSpec((Bt, K0p), lambda i: (i, 0))]
    for (w_p, b_p) in padded:
        flat_inputs += [w_p, b_p]
        in_specs += [
            pl.BlockSpec(w_p.shape, lambda i: (0, 0)),   # weights resident in VMEM
            pl.BlockSpec(b_p.shape, lambda i: (0, 0)),
        ]

    kernel = functools.partial(_fused_mlp_kernel, num_layers=num_layers)

    feat_p, out_p = pl.pallas_call(
        kernel,
        out_shape=(
            jax.ShapeDtypeStruct((Bp, NFp), jnp.float32),
            jax.ShapeDtypeStruct((Bp, NOp), jnp.float32),
        ),
        grid_spec=pltpu.PrefetchScalarGridSpec(
            num_scalar_prefetch=0,
            grid=(n_btiles,),
            in_specs=in_specs,
            out_specs=(
                pl.BlockSpec((Bt, NFp), lambda i: (i, 0)),
                pl.BlockSpec((Bt, NOp), lambda i: (i, 0)),
            ),
        ),
        compiler_params=pltpu.CompilerParams(
            dimension_semantics=("parallel",),
            vmem_limit_bytes=32 * 1024 * 1024,   # safe on v5e/v6e/v7x
        ),
    )(*flat_inputs)

    logits = out_p[:B, :output_dim]
    if feature:
        return feat_p[:B, :feat_dim], logits
    return logits


# ---------- pure-JAX reference for correctness check ----------
def _ref_wn_linear(x, w, b, scale):
    w_hat = w * scale / jnp.sqrt(jnp.sum(w ** 2, axis=1, keepdims=True))
    return x @ w_hat.T + b


def _ref_forward(params, x, feature=False):
    input_dim = params[0][0].shape[1]
    x = x.reshape(-1, input_dim)
    x_f = x
    for (w, b, s) in params[:-1]:
        x_f = jax.nn.relu(_ref_wn_linear(x, w, b, s))
        x = x_f
    w, b, s = params[-1]
    out = _ref_wn_linear(x, w, b, s)
    if feature:
        return x_f, out
    return out


if __name__ == "__main__":
    key = jax.random.PRNGKey(0)
    key, pkey, xkey = jax.random.split(key, 3)

    params = init_discriminator_params(pkey, input_dim=28 ** 2, output_dim=10)
    prepared = prepare_discriminator(params)   # pad / fold weight-norm once

    # small batch of MNIST-shaped inputs (NCHW), flattened inside forward
    x = jax.random.normal(xkey, (4, 1, 28, 28), jnp.float32)

    out = discriminator_forward(prepared, x)          # (4, 10) logits
    out = jax.block_until_ready(out)

    ref = _ref_forward(params, x)
    assert out.shape == (4, 10)
    assert jnp.allclose(out, ref, atol=1e-4, rtol=1e-4), "logit mismatch vs reference"

    feat, out2 = discriminator_forward(prepared, x, feature=True)
    feat = jax.block_until_ready(feat)
    ref_feat, ref_out2 = _ref_forward(params, x, feature=True)
    assert feat.shape == (4, 250)
    assert jnp.allclose(feat, ref_feat, atol=1e-4, rtol=1e-4), "feature mismatch"
    assert jnp.allclose(out2, ref_out2, atol=1e-4, rtol=1e-4), "logit mismatch (feature path)"

    # TODO(synk): training-mode additive Gaussian noise (randn*0.3 / *0.5) is a
    # no-op in eval mode and is intentionally omitted.
    print("KERNEL_OK")
</pallas_src>

<mosaic_0001>
module attributes {stable_mosaic.version = 11 : i64} {
  func.func @_fused_mlp_kernel(%arg0: i32, %arg1: memref<8x896xf32, #tpu.memory_space<vmem>>, %arg2: memref<896x1024xf32, #tpu.memory_space<vmem>>, %arg3: memref<1x1024xf32, #tpu.memory_space<vmem>>, %arg4: memref<1024x512xf32, #tpu.memory_space<vmem>>, %arg5: memref<1x512xf32, #tpu.memory_space<vmem>>, %arg6: memref<512x256xf32, #tpu.memory_space<vmem>>, %arg7: memref<1x256xf32, #tpu.memory_space<vmem>>, %arg8: memref<256x256xf32, #tpu.memory_space<vmem>>, %arg9: memref<1x256xf32, #tpu.memory_space<vmem>>, %arg10: memref<256x256xf32, #tpu.memory_space<vmem>>, %arg11: memref<1x256xf32, #tpu.memory_space<vmem>>, %arg12: memref<256x128xf32, #tpu.memory_space<vmem>>, %arg13: memref<1x128xf32, #tpu.memory_space<vmem>>, %arg14: memref<8x256xf32, #tpu.memory_space<vmem>>, %arg15: memref<8x128xf32, #tpu.memory_space<vmem>>) attributes {dimension_semantics = [#tpu.dimension_semantics<parallel>], iteration_bounds = array<i64: 1>, scalar_prefetch = 0 : i64, scratch_operands = 0 : i64, tpu.core_type = #tpu.core_type<tc>, window_params = [{transform_indices = @transform_0, window_bounds = array<i64: 8, 896>}, {pipeline_mode = #tpu.pipeline_mode<synchronous>, transform_indices = @transform_1, window_bounds = array<i64: 896, 1024>}, {pipeline_mode = #tpu.pipeline_mode<synchronous>, transform_indices = @transform_2, window_bounds = array<i64: 1, 1024>}, {pipeline_mode = #tpu.pipeline_mode<synchronous>, transform_indices = @transform_3, window_bounds = array<i64: 1024, 512>}, {pipeline_mode = #tpu.pipeline_mode<synchronous>, transform_indices = @transform_4, window_bounds = array<i64: 1, 512>}, {pipeline_mode = #tpu.pipeline_mode<synchronous>, transform_indices = @transform_5, window_bounds = array<i64: 512, 256>}, {pipeline_mode = #tpu.pipeline_mode<synchronous>, transform_indices = @transform_6, window_bounds = array<i64: 1, 256>}, {pipeline_mode = #tpu.pipeline_mode<synchronous>, transform_indices = @transform_7, window_bounds = array<i64: 256, 256>}, {pipeline_mode = #tpu.pipeline_mode<synchronous>, transform_indices = @transform_8, window_bounds = array<i64: 1, 256>}, {pipeline_mode = #tpu.pipeline_mode<synchronous>, transform_indices = @transform_9, window_bounds = array<i64: 256, 256>}, {pipeline_mode = #tpu.pipeline_mode<synchronous>, transform_indices = @transform_10, window_bounds = array<i64: 1, 256>}, {pipeline_mode = #tpu.pipeline_mode<synchronous>, transform_indices = @transform_11, window_bounds = array<i64: 256, 128>}, {pipeline_mode = #tpu.pipeline_mode<synchronous>, transform_indices = @transform_12, window_bounds = array<i64: 1, 128>}, {transform_indices = @transform_13, window_bounds = array<i64: 8, 256>}, {transform_indices = @transform_14, window_bounds = array<i64: 8, 128>}]} {
    %c0 = arith.constant 0 : index
    %c0_0 = arith.constant 0 : index
    %0 = vector.load %arg1[%c0, %c0_0] : memref<8x896xf32, #tpu.memory_space<vmem>>, vector<8x896xf32>
    %c0_1 = arith.constant 0 : index
    %c0_2 = arith.constant 0 : index
    %1 = vector.load %arg2[%c0_1, %c0_2] : memref<896x1024xf32, #tpu.memory_space<vmem>>, vector<896x1024xf32>
    %cst = arith.constant dense<0.000000e+00> : vector<8x1024xf32>
    %2 = tpu.matmul %0, %1, %cst {dimension_numbers = #tpu.dot_dimension_numbers<[1], [0], [0], [1], [0, 0, 1, 1], [], []>} : vector<8x896xf32>, vector<896x1024xf32>, vector<8x1024xf32> -> vector<8x1024xf32>
    %c0_3 = arith.constant 0 : index
    %c0_4 = arith.constant 0 : index
    %3 = vector.load %arg3[%c0_3, %c0_4] : memref<1x1024xf32, #tpu.memory_space<vmem>>, vector<1x1024xf32>
    %4 = vector.broadcast %3 : vector<1x1024xf32> to vector<8x1024xf32>
    %5 = arith.addf %2, %4 : vector<8x1024xf32>
    %cst_5 = arith.constant 0.000000e+00 : f32
    %6 = vector.broadcast %cst_5 : f32 to vector<8x1024xf32>
    %7 = arith.maximumf %5, %6 : vector<8x1024xf32>
    %c0_6 = arith.constant 0 : index
    %c0_7 = arith.constant 0 : index
    %8 = vector.load %arg4[%c0_6, %c0_7] : memref<1024x512xf32, #tpu.memory_space<vmem>>, vector<1024x512xf32>
    %cst_8 = arith.constant dense<0.000000e+00> : vector<8x512xf32>
    %9 = tpu.matmul %7, %8, %cst_8 {dimension_numbers = #tpu.dot_dimension_numbers<[1], [0], [0], [1], [0, 0, 1, 1], [], []>} : vector<8x1024xf32>, vector<1024x512xf32>, vector<8x512xf32> -> vector<8x512xf32>
    %c0_9 = arith.constant 0 : index
    %c0_10 = arith.constant 0 : index
    %10 = vector.load %arg5[%c0_9, %c0_10] : memref<1x512xf32, #tpu.memory_space<vmem>>, vector<1x512xf32>
    %11 = vector.broadcast %10 : vector<1x512xf32> to vector<8x512xf32>
    %12 = arith.addf %9, %11 : vector<8x512xf32>
    %cst_11 = arith.constant 0.000000e+00 : f32
    %13 = vector.broadcast %cst_11 : f32 to vector<8x512xf32>
    %14 = arith.maximumf %12, %13 : vector<8x512xf32>
    %c0_12 = arith.constant 0 : index
    %c0_13 = arith.constant 0 : index
    %15 = vector.load %arg6[%c0_12, %c0_13] : memref<512x256xf32, #tpu.memory_space<vmem>>, vector<512x256xf32>
    %cst_14 = arith.constant dense<0.000000e+00> : vector<8x256xf32>
    %16 = tpu.matmul %14, %15, %cst_14 {dimension_numbers = #tpu.dot_dimension_numbers<[1], [0], [0], [1], [0, 0, 1, 1], [], []>} : vector<8x512xf32>, vector<512x256xf32>, vector<8x256xf32> -> vector<8x256xf32>
    %c0_15 = arith.constant 0 : index
    %c0_16 = arith.constant 0 : index
    %17 = vector.load %arg7[%c0_15, %c0_16] : memref<1x256xf32, #tpu.memory_space<vmem>>, vector<1x256xf32>
    %18 = vector.broadcast %17 : vector<1x256xf32> to vector<8x256xf32>
    %19 = arith.addf %16, %18 : vector<8x256xf32>
    %cst_17 = arith.constant 0.000000e+00 : f32
    %20 = vector.broadcast %cst_17 : f32 to vector<8x256xf32>
    %21 = arith.maximumf %19, %20 : vector<8x256xf32>
    %c0_18 = arith.constant 0 : index
    %c0_19 = arith.constant 0 : index
    %22 = vector.load %arg8[%c0_18, %c0_19] : memref<256x256xf32, #tpu.memory_space<vmem>>, vector<256x256xf32>
    %cst_20 = arith.constant dense<0.000000e+00> : vector<8x256xf32>
    %23 = tpu.matmul %21, %22, %cst_20 {dimension_numbers = #tpu.dot_dimension_numbers<[1], [0], [0], [1], [0, 0, 1, 1], [], []>} : vector<8x256xf32>, vector<256x256xf32>, vector<8x256xf32> -> vector<8x256xf32>
    %c0_21 = arith.constant 0 : index
    %c0_22 = arith.constant 0 : index
    %24 = vector.load %arg9[%c0_21, %c0_22] : memref<1x256xf32, #tpu.memory_space<vmem>>, vector<1x256xf32>
    %25 = vector.broadcast %24 : vector<1x256xf32> to vector<8x256xf32>
    %26 = arith.addf %23, %25 : vector<8x256xf32>
    %cst_23 = arith.constant 0.000000e+00 : f32
    %27 = vector.broadcast %cst_23 : f32 to vector<8x256xf32>
    %28 = arith.maximumf %26, %27 : vector<8x256xf32>
    %c0_24 = arith.constant 0 : index
    %c0_25 = arith.constant 0 : index
    %29 = vector.load %arg10[%c0_24, %c0_25] : memref<256x256xf32, #tpu.memory_space<vmem>>, vector<256x256xf32>
    %cst_26 = arith.constant dense<0.000000e+00> : vector<8x256xf32>
    %30 = tpu.matmul %28, %29, %cst_26 {dimension_numbers = #tpu.dot_dimension_numbers<[1], [0], [0], [1], [0, 0, 1, 1], [], []>} : vector<8x256xf32>, vector<256x256xf32>, vector<8x256xf32> -> vector<8x256xf32>
    %c0_27 = arith.constant 0 : index
    %c0_28 = arith.constant 0 : index
    %31 = vector.load %arg11[%c0_27, %c0_28] : memref<1x256xf32, #tpu.memory_space<vmem>>, vector<1x256xf32>
    %32 = vector.broadcast %31 : vector<1x256xf32> to vector<8x256xf32>
    %33 = arith.addf %30, %32 : vector<8x256xf32>
    %cst_29 = arith.constant 0.000000e+00 : f32
    %34 = vector.broadcast %cst_29 : f32 to vector<8x256xf32>
    %35 = arith.maximumf %33, %34 : vector<8x256xf32>
    %c0_30 = arith.constant 0 : index
    %c0_31 = arith.constant 0 : index
    %36 = vector.load %arg14[%c0_30, %c0_31] : memref<8x256xf32, #tpu.memory_space<vmem>>, vector<8x256xf32>
    tpu.vector_store %arg14[%c0_30, %c0_31], %35 {strides = array<i32>} : memref<8x256xf32, #tpu.memory_space<vmem>>, vector<8x256xf32>,
    %c0_32 = arith.constant 0 : index
    %c0_33 = arith.constant 0 : index
    %37 = vector.load %arg12[%c0_32, %c0_33] : memref<256x128xf32, #tpu.memory_space<vmem>>, vector<256x128xf32>
    %cst_34 = arith.constant dense<0.000000e+00> : vector<8x128xf32>
    %38 = tpu.matmul %35, %37, %cst_34 {dimension_numbers = #tpu.dot_dimension_numbers<[1], [0], [0], [1], [0, 0, 1, 1], [], []>} : vector<8x256xf32>, vector<256x128xf32>, vector<8x128xf32> -> vector<8x128xf32>
    %c0_35 = arith.constant 0 : index
    %c0_36 = arith.constant 0 : index
    %39 = vector.load %arg13[%c0_35, %c0_36] : memref<1x128xf32, #tpu.memory_space<vmem>>, vector<1x128xf32>
    %40 = vector.broadcast %39 : vector<1x128xf32> to vector<8x128xf32>
    %41 = arith.addf %38, %40 : vector<8x128xf32>
    %c0_37 = arith.constant 0 : index
    %c0_38 = arith.constant 0 : index
    %42 = vector.load %arg15[%c0_37, %c0_38] : memref<8x128xf32, #tpu.memory_space<vmem>>, vector<8x128xf32>
    tpu.vector_store %arg15[%c0_37, %c0_38], %41 {strides = array<i32>} : memref<8x128xf32, #tpu.memory_space<vmem>>, vector<8x128xf32>,
    return
  }
  func.func @transform_0(%arg0: i32) -> (i32, i32) {
    %c0_i32 = arith.constant 0 : i32
    %c0_i32_0 = arith.constant 0 : i32
    return %arg0, %c0_i32 : i32, i32
  }
  func.func @transform_1(%arg0: i32) -> (i32, i32) {
    %c0_i32 = arith.constant 0 : i32
    %c0_i32_0 = arith.constant 0 : i32
    %c0_i32_1 = arith.constant 0 : i32
    return %c0_i32, %c0_i32_0 : i32, i32
  }
  func.func @transform_2(%arg0: i32) -> (i32, i32) {
    %c0_i32 = arith.constant 0 : i32
    %c0_i32_0 = arith.constant 0 : i32
    %c0_i32_1 = arith.constant 0 : i32
    return %c0_i32, %c0_i32_0 : i32, i32
  }
  func.func @transform_3(%arg0: i32) -> (i32, i32) {
    %c0_i32 = arith.constant 0 : i32
    %c0_i32_0 = arith.constant 0 : i32
    %c0_i32_1 = arith.constant 0 : i32
    return %c0_i32, %c0_i32_0 : i32, i32
  }
  func.func @transform_4(%arg0: i32) -> (i32, i32) {
    %c0_i32 = arith.constant 0 : i32
    %c0_i32_0 = arith.constant 0 : i32
    %c0_i32_1 = arith.constant 0 : i32
    return %c0_i32, %c0_i32_0 : i32, i32
  }
  func.func @transform_5(%arg0: i32) -> (i32, i32) {
    %c0_i32 = arith.constant 0 : i32
    %c0_i32_0 = arith.constant 0 : i32
    %c0_i32_1 = arith.constant 0 : i32
    return %c0_i32, %c0_i32_0 : i32, i32
  }
  func.func @transform_6(%arg0: i32) -> (i32, i32) {
    %c0_i32 = arith.constant 0 : i32
    %c0_i32_0 = arith.constant 0 : i32
    %c0_i32_1 = arith.constant 0 : i32
    return %c0_i32, %c0_i32_0 : i32, i32
  }
  func.func @transform_7(%arg0: i32) -> (i32, i32) {
    %c0_i32 = arith.constant 0 : i32
    %c0_i32_0 = arith.constant 0 : i32
    %c0_i32_1 = arith.constant 0 : i32
    return %c0_i32, %c0_i32_0 : i32, i32
  }
  func.func @transform_8(%arg0: i32) -> (i32, i32) {
    %c0_i32 = arith.constant 0 : i32
    %c0_i32_0 = arith.constant 0 : i32
    %c0_i32_1 = arith.constant 0 : i32
    return %c0_i32, %c0_i32_0 : i32, i32
  }
  func.func @transform_9(%arg0: i32) -> (i32, i32) {
    %c0_i32 = arith.constant 0 : i32
    %c0_i32_0 = arith.constant 0 : i32
    %c0_i32_1 = arith.constant 0 : i32
    return %c0_i32, %c0_i32_0 : i32, i32
  }
  func.func @transform_10(%arg0: i32) -> (i32, i32) {
    %c0_i32 = arith.constant 0 : i32
    %c0_i32_0 = arith.constant 0 : i32
    %c0_i32_1 = arith.constant 0 : i32
    return %c0_i32, %c0_i32_0 : i32, i32
  }
  func.func @transform_11(%arg0: i32) -> (i32, i32) {
    %c0_i32 = arith.constant 0 : i32
    %c0_i32_0 = arith.constant 0 : i32
    %c0_i32_1 = arith.constant 0 : i32
    return %c0_i32, %c0_i32_0 : i32, i32
  }
  func.func @transform_12(%arg0: i32) -> (i32, i32) {
    %c0_i32 = arith.constant 0 : i32
    %c0_i32_0 = arith.constant 0 : i32
    %c0_i32_1 = arith.constant 0 : i32
    return %c0_i32, %c0_i32_0 : i32, i32
  }
  func.func @transform_13(%arg0: i32) -> (i32, i32) {
    %c0_i32 = arith.constant 0 : i32
    %c0_i32_0 = arith.constant 0 : i32
    return %arg0, %c0_i32 : i32, i32
  }
  func.func @transform_14(%arg0: i32) -> (i32, i32) {
    %c0_i32 = arith.constant 0 : i32
    %c0_i32_0 = arith.constant 0 : i32
    return %arg0, %c0_i32 : i32, i32
  }
}

</mosaic_0001>

<bundles_post_ra>
// kernel: tpu_custom_call.1
= control target key start
LH: loop header
LB: loop body
LE: loop exit
PB: predicated region body
PF: predicated region fallthrough
CT: control target
= control target key end

     0   :  { %20 = vsyncpa [#allocation3], 0  ;;  %s6655_s0 = inlined_call_operand.hbm [shape: f32[8,896], index: 0, kind: input, shape index: {}]   ;;  %s6656_s1 = inlined_call_operand.hbm [shape: f32[896,1024], index: 1, kind: input, shape index: {}]   ;;  %s6657_s2 = inlined_call_operand.hbm [shape: f32[1,1024], index: 2, kind: input, shape index: {}]   ;;  %s6658_s3 = inlined_call_operand.hbm [shape: f32[1024,512], index: 3, kind: input, shape index: {}]   ;;  %s6659_s4 = inlined_call_operand.hbm [shape: f32[1,512], index: 4, kind: input, shape index: {}]   ;;  %s6660_s5 = inlined_call_operand.hbm [shape: f32[512,256], index: 5, kind: input, shape index: {}]   ;;  %s6661_s6 = inlined_call_operand.hbm [shape: f32[1,256], index: 6, kind: input, shape index: {}]   ;;  %s6662_s7 = inlined_call_operand.hbm [shape: f32[256,256], index: 7, kind: input, shape index: {}]   ;;  %s6663_s8 = inlined_call_operand.hbm [shape: f32[1,256], index: 8, kind: input, shape index: {}]   ;;  %s6664_s9 = inlined_call_operand.hbm [shape: f32[256,256], index: 9, kind: input, shape index: {}]   ;;  %s6665_s10 = inlined_call_operand.hbm [shape: f32[1,256], index: 10, kind: input, shape index: {}]   ;;  %s6666_s11 = inlined_call_operand.hbm [shape: f32[256,128], index: 11, kind: input, shape index: {}]   ;;  %s6667_s12 = inlined_call_operand.hbm [shape: f32[1,128], index: 12, kind: input, shape index: {}]   ;;  %s6668_s13 = inlined_call_operand.hbm [shape: f32[8,256], index: 13, kind: output, shape index: {0}]   ;;  %s6669_s14 = inlined_call_operand.hbm [shape: f32[8,128], index: 14, kind: output, shape index: {1}]  }
   0x1   :  { %21 = vsyncpa [#allocation6], 0 }
   0x2   :  { %22 = vsyncpa [#allocation9], 0 }
   0x3   :  { %23 = vsyncpa [#allocation12], 0 }
   0x4   :  { %24 = vsyncpa [#allocation15], 0 }
   0x5   :  { %25 = vsyncpa [#allocation18], 0 }
   0x6   :  { %26 = vsyncpa [#allocation21], 0 }
   0x7   :  { %27 = vsyncpa [#allocation4], 0 }
   0x8   :  { %28 = vsyncpa [#allocation25], 0  ;;  %s6299_s29 = smov [#allocation5]   ;;  %s5951_s17 = scalar_lea.hbm %s6656_s1, 114688 }
   0x9   :  { %s44_s30 = sshll.u32 %s6299_s29, 4  ;;  %p5952_p0 = scmp.ne.s32.totalorder %s6656_s1, %s5951_s17  ;;  %s45_s30 = int_to_ptr.vmem [resolvable:$true] %s44_s30 }
   0xa   :  { %p5955_p1 = scmp.lt.u32.totalorder %s5951_s17, %s6656_s1 }
   0xc   :  { %p5957_p2 = pnand %p5955_p1, %p5952_p0 }
   0xe   :  { %5960 = shalt.err (!%p5957_p2)
}
   0xf   :  { %s5961_s22 = scalar_lea.vmem %s45_s30, 114688  ;;  %p5966_p4 = scmp.lt.s32.totalorder %s45_s30, %s45_s30 }
  0x10   :  { %p5962_p3 = scmp.ne.s32.totalorder %s45_s30, %s5961_s22  ;;  %p5967_p5 = scmp.lt.s32.totalorder %s5961_s22, %s5961_s22 }
  0x12   :  { %p5968_p6 = por %p5967_p5, %p5966_p4 }
  0x14   :  { %p5969_p7 = pnand %p5968_p6, %p5962_p3 }
  0x16   :  { %5972 = shalt.err (!%p5969_p7)
}
  0x17   :  { %s6300_s23 = smov 1024   ;;  %s6301_s24 = smov 64  }
  0x18   :  { %50 = dma.hbm_to_vmem [thread:$0]  %s6656_s1, 114688, %s45_s30, [#allocation6], %s6300_s23, %s6300_s23, %s6301_s24  }
  0x19   :  { %s6302_s27 = smov [#allocation8]   ;;  %s5973_s16 = scalar_lea.hbm %s6658_s3, 65536 }
  0x1a   :  { %s66_s28 = sshll.u32 %s6302_s27, 4  ;;  %p5974_p8 = scmp.ne.s32.totalorder %s6658_s3, %s5973_s16  ;;  %s67_s28 = int_to_ptr.vmem [resolvable:$true] %s66_s28 }
  0x1b   :  { %p5977_p9 = scmp.lt.u32.totalorder %s5973_s16, %s6658_s3 }
  0x1d   :  { %p5979_p10 = pnand %p5977_p9, %p5974_p8 }
  0x1f   :  { %5982 = shalt.err (!%p5979_p10)
}
  0x20   :  { %s5983_s21 = scalar_lea.vmem %s67_s28, 65536  ;;  %p5988_p12 = scmp.lt.s32.totalorder %s67_s28, %s67_s28 }
  0x21   :  { %p5984_p11 = scmp.ne.s32.totalorder %s67_s28, %s5983_s21  ;;  %p5989_p13 = scmp.lt.s32.totalorder %s5983_s21, %s5983_s21 }
  0x23   :  { %p5990_p0 = por %p5989_p13, %p5988_p12 }
  0x25   :  { %p5991_p1 = pnand %p5990_p0, %p5984_p11 }
  0x27   :  { %5994 = shalt.err (!%p5991_p1)
}
  0x28   :  { %s6303_s1 = smov 512   ;;  %s6304_s30 = smov 32  }
  0x29   :  { %72 = dma.hbm_to_vmem [thread:$0]  %s6658_s3, 65536, %s67_s28, [#allocation9], %s6303_s1, %s6303_s1, %s6304_s30  }
  0x2a   :  { %s6305_s24 = smov [#allocation11]   ;;  %s5995_s29 = scalar_lea.hbm %s6660_s5, 16384 }
  0x2b   :  { %s88_s25 = sshll.u32 %s6305_s24, 4  ;;  %p5996_p2 = scmp.ne.s32.totalorder %s6660_s5, %s5995_s29  ;;  %s89_s25 = int_to_ptr.vmem [resolvable:$true] %s88_s25 }
  0x2c   :  { %p5999_p3 = scmp.lt.u32.totalorder %s5995_s29, %s6660_s5 }
  0x2e   :  { %p6001_p4 = pnand %p5999_p3, %p5996_p2 }
  0x30   :  { %6004 = shalt.err (!%p6001_p4)
}
  0x31   :  { %s6005_s19 = scalar_lea.vmem %s89_s25, 16384  ;;  %p6010_p6 = scmp.lt.s32.totalorder %s89_s25, %s89_s25 }
  0x32   :  { %p6006_p5 = scmp.ne.s32.totalorder %s89_s25, %s6005_s19  ;;  %p6011_p7 = scmp.lt.s32.totalorder %s6005_s19, %s6005_s19 }
  0x34   :  { %p6012_p8 = por %p6011_p7, %p6010_p6 }
  0x36   :  { %p6013_p9 = pnand %p6012_p8, %p6006_p5 }
  0x38   :  { %6016 = shalt.err (!%p6013_p9)
}
  0x39   :  { %s6306_s3 = smov 256   ;;  %s6307_s28 = smov 16  }
  0x3a   :  { %94 = dma.hbm_to_vmem [thread:$0]  %s6660_s5, 16384, %s89_s25, [#allocation12], %s6306_s3, %s6306_s3, %s6307_s28  }
  0x3b   :  { %s6308_s1 = smov [#allocation14]   ;;  %s6309_s22 = smov [#allocation17]  }
  0x3c   :  { %s110_s30 = sshll.u32 %s6308_s1, 4  ;;  %s132_s23 = sshll.u32 %s6309_s22, 4  ;;  %s111_s30 = int_to_ptr.vmem [resolvable:$true] %s110_s30  ;;  %s133_s23 = int_to_ptr.vmem [resolvable:$true] %s132_s23 }
  0x3d   :  { %s6017_s27 = scalar_lea.hbm %s6662_s7, 8192 }
  0x3e   :  { %p6018_p10 = scmp.ne.s32.totalorder %s6662_s7, %s6017_s27  ;;  %p6021_p11 = scmp.lt.u32.totalorder %s6017_s27, %s6662_s7 }
  0x40   :  { %p6023_p12 = pnand %p6021_p11, %p6018_p10 }
  0x42   :  { %6026 = shalt.err (!%p6023_p12)
}
  0x43   :  { %s6027_s5 = scalar_lea.vmem %s111_s30, 8192  ;;  %p6032_p0 = scmp.lt.s32.totalorder %s111_s30, %s111_s30 }
  0x44   :  { %p6028_p13 = scmp.ne.s32.totalorder %s111_s30, %s6027_s5  ;;  %p6033_p1 = scmp.lt.s32.totalorder %s6027_s5, %s6027_s5 }
  0x46   :  { %p6034_p2 = por %p6033_p1, %p6032_p0 }
  0x48   :  { %p6035_p3 = pnand %p6034_p2, %p6028_p13 }
  0x4a   :  { %6038 = shalt.err (!%p6035_p3)
}
  0x4b   :  { %116 = dma.hbm_to_vmem [thread:$0]  %s6662_s7, 8192, %s111_s30, [#allocation15], %s6306_s3, %s6306_s3, %s6307_s28  }
  0x4c   :  { %s6039_s21 = scalar_lea.hbm %s6664_s9, 8192 }
  0x4d   :  { %p6040_p4 = scmp.ne.s32.totalorder %s6664_s9, %s6039_s21  ;;  %p6043_p5 = scmp.lt.u32.totalorder %s6039_s21, %s6664_s9 }
  0x4f   :  { %p6045_p6 = pnand %p6043_p5, %p6040_p4 }
  0x51   :  { %6048 = shalt.err (!%p6045_p6)
}
  0x52   :  { %s6049_s27 = scalar_lea.vmem %s133_s23, 8192  ;;  %p6054_p8 = scmp.lt.s32.totalorder %s133_s23, %s133_s23 }
  0x53   :  { %p6050_p7 = scmp.ne.s32.totalorder %s133_s23, %s6049_s27  ;;  %p6055_p9 = scmp.lt.s32.totalorder %s6049_s27, %s6049_s27 }
  0x55   :  { %p6056_p10 = por %p6055_p9, %p6054_p8 }
  0x57   :  { %p6057_p11 = pnand %p6056_p10, %p6050_p7 }
  0x59   :  { %6060 = shalt.err (!%p6057_p11)
}
  0x5a   :  { %138 = dma.hbm_to_vmem [thread:$0]  %s6664_s9, 8192, %s133_s23, [#allocation18], %s6306_s3, %s6306_s3, %s6307_s28  }
  0x5b   :  { %s6310_s29 = smov [#allocation20]   ;;  %s6061_s5 = scalar_lea.hbm %s6666_s11, 4096 }
  0x5c   :  { %s154_s15 = sshll.u32 %s6310_s29, 4  ;;  %p6062_p12 = scmp.ne.s32.totalorder %s6666_s11, %s6061_s5  ;;  %s155_s15 = int_to_ptr.vmem [resolvable:$true] %s154_s15 }
  0x5d   :  { %p6065_p13 = scmp.lt.u32.totalorder %s6061_s5, %s6666_s11 }
  0x5f   :  { %p6067_p0 = pnand %p6065_p13, %p6062_p12 }
  0x61   :  { %6070 = shalt.err (!%p6067_p0)
}
  0x62   :  { %s6071_s21 = scalar_lea.vmem %s155_s15, 4096  ;;  %p6076_p2 = scmp.lt.s32.totalorder %s155_s15, %s155_s15 }
  0x63   :  { %p6072_p1 = scmp.ne.s32.totalorder %s155_s15, %s6071_s21  ;;  %p6077_p3 = scmp.lt.s32.totalorder %s6071_s21, %s6071_s21 }
  0x65   :  { %p6078_p4 = por %p6077_p3, %p6076_p2 }
  0x67   :  { %p6079_p5 = pnand %p6078_p4, %p6072_p1 }
  0x69   :  { %6082 = shalt.err (!%p6079_p5)
}
  0x6a   :  { %s6311_s9 = smov 128   ;;  %s6312_s3 = smov 8  }
  0x6b   :  { %160 = dma.hbm_to_vmem [thread:$0]  %s6666_s11, 4096, %s155_s15, [#allocation21], %s6311_s9, %s6311_s9, %s6312_s3  }
  0x6c   :  { %s6313_s1 = smov [#allocation2]   ;;  %s6314_s24 = smov [#allocation7]  }
  0x6d   :  { %s35_s22 = sshll.u32 %s6313_s1, 4  ;;  %s57_s26 = sshll.u32 %s6314_s24, 4  ;;  %s36_s22 = int_to_ptr.vmem [resolvable:$true] %s35_s22  ;;  %s58_s26 = int_to_ptr.vmem [resolvable:$true] %s57_s26 }
  0x6e   :  { %s6083_s30 = scalar_lea.hbm %s6655_s0, 896 }
  0x6f   :  { %p6084_p6 = scmp.ne.s32.totalorder %s6655_s0, %s6083_s30  ;;  %p6087_p7 = scmp.lt.u32.totalorder %s6083_s30, %s6655_s0 }
  0x71   :  { %p6089_p8 = pnand %p6087_p7, %p6084_p6 }
  0x73   :  { %6092 = shalt.err (!%p6089_p8)
}
  0x74   :  { %s6093_s11 = scalar_lea.vmem %s36_s22, 896  ;;  %p6098_p10 = scmp.lt.s32.totalorder %s36_s22, %s36_s22 }
  0x75   :  { %p6094_p9 = scmp.ne.s32.totalorder %s36_s22, %s6093_s11  ;;  %p6099_p11 = scmp.lt.s32.totalorder %s6093_s11, %s6093_s11 }
  0x77   :  { %p6100_p12 = por %p6099_p11, %p6098_p10 }
  0x79   :  { %p6101_p13 = pnand %p6100_p12, %p6094_p9 }
  0x7b   :  { %6104 = shalt.err (!%p6101_p13)
}
  0x7c   :  { %38 = dma.hbm_to_vmem [thread:$0]  %s6655_s0, 896, %s36_s22, [#allocation3]  }
  0x7d   :  { %s6105_s20 = scalar_lea.hbm %s6657_s2, 128 }
  0x7e   :  { %p6106_p0 = scmp.ne.s32.totalorder %s6657_s2, %s6105_s20  ;;  %p6109_p1 = scmp.lt.u32.totalorder %s6105_s20, %s6657_s2 }
  0x80   :  { %p6111_p2 = pnand %p6109_p1, %p6106_p0 }
  0x82   :  { %6114 = shalt.err (!%p6111_p2)
}
  0x83   :  { %s6115_s23 = scalar_lea.vmem %s58_s26, 128  ;;  %p6120_p4 = scmp.lt.s32.totalorder %s58_s26, %s58_s26 }
  0x84   :  { %p6116_p3 = scmp.ne.s32.totalorder %s58_s26, %s6115_s23  ;;  %p6121_p5 = scmp.lt.s32.totalorder %s6115_s23, %s6115_s23 }
  0x86   :  { %p6122_p6 = por %p6121_p5, %p6120_p4 }
  0x88   :  { %p6123_p7 = pnand %p6122_p6, %p6116_p3 }
  0x8a   :  { %6126 = shalt.err (!%p6123_p7)
}
  0x8b   :  { %60 = dma.hbm_to_vmem [thread:$0]  %s6657_s2, 128, %s58_s26, [#allocation6]  }
  0x8c   :  { %s6315_s22 = smov [#allocation10]   ;;  %s6316_s27 = smov [#allocation13]  }
  0x8d   :  { %s79_s24 = sshll.u32 %s6315_s22, 4  ;;  %s101_s7 = sshll.u32 %s6316_s27, 4  ;;  %s80_s24 = int_to_ptr.vmem [resolvable:$true] %s79_s24  ;;  %s102_s7 = int_to_ptr.vmem [resolvable:$true] %s101_s7 }
  0x8e   :  { %s6127_s16 = scalar_lea.hbm %s6659_s4, 64 }
  0x8f   :  { %p6128_p8 = scmp.ne.s32.totalorder %s6659_s4, %s6127_s16  ;;  %p6131_p9 = scmp.lt.u32.totalorder %s6127_s16, %s6659_s4 }
  0x91   :  { %p6133_p10 = pnand %p6131_p9, %p6128_p8 }
  0x93   :  { %6136 = shalt.err (!%p6133_p10)
}
  0x94   :  { %s6137_s2 = scalar_lea.vmem %s80_s24, 64  ;;  %p6142_p12 = scmp.lt.s32.totalorder %s80_s24, %s80_s24 }
  0x95   :  { %p6138_p11 = scmp.ne.s32.totalorder %s80_s24, %s6137_s2  ;;  %p6143_p13 = scmp.lt.s32.totalorder %s6137_s2, %s6137_s2 }
  0x97   :  { %p6144_p0 = por %p6143_p13, %p6142_p12 }
  0x99   :  { %p6145_p1 = pnand %p6144_p0, %p6138_p11 }
  0x9b   :  { %6148 = shalt.err (!%p6145_p1)
}
  0x9c   :  { %82 = dma.hbm_to_vmem [thread:$0]  %s6659_s4, 64, %s80_s24, [#allocation9]  }
  0x9d   :  { %s6149_s20 = scalar_lea.hbm %s6661_s6, 32 }
  0x9e   :  { %p6150_p2 = scmp.ne.s32.totalorder %s6661_s6, %s6149_s20  ;;  %p6153_p3 = scmp.lt.u32.totalorder %s6149_s20, %s6661_s6 }
  0xa0   :  { %p6155_p4 = pnand %p6153_p3, %p6150_p2 }
  0xa2   :  { %6158 = shalt.err (!%p6155_p4)
}
  0xa3   :  { %s6159_s23 = scalar_lea.vmem %s102_s7, 32  ;;  %p6164_p6 = scmp.lt.s32.totalorder %s102_s7, %s102_s7 }
  0xa4   :  { %p6160_p5 = scmp.ne.s32.totalorder %s102_s7, %s6159_s23  ;;  %p6165_p7 = scmp.lt.s32.totalorder %s6159_s23, %s6159_s23 }
  0xa6   :  { %p6166_p8 = por %p6165_p7, %p6164_p6 }
  0xa8   :  { %p6167_p9 = pnand %p6166_p8, %p6160_p5 }
  0xaa   :  { %6170 = shalt.err (!%p6167_p9)
}
  0xab   :  { %104 = dma.hbm_to_vmem [thread:$0]  %s6661_s6, 32, %s102_s7, [#allocation12]  }
  0xac   :  { %s6317_s1 = smov [#allocation16]   ;;  %s6318_s24 = smov [#allocation19]  }
  0xad   :  { %s123_s22 = sshll.u32 %s6317_s1, 4  ;;  %s145_s27 = sshll.u32 %s6318_s24, 4  ;;  %s124_s22 = int_to_ptr.vmem [resolvable:$true] %s123_s22  ;;  %s146_s27 = int_to_ptr.vmem [resolvable:$true] %s145_s27 }
  0xae   :  { %s6171_s16 = scalar_lea.hbm %s6663_s8, 32 }
  0xaf   :  { %p6172_p10 = scmp.ne.s32.totalorder %s6663_s8, %s6171_s16  ;;  %p6175_p11 = scmp.lt.u32.totalorder %s6171_s16, %s6663_s8 }
  0xb1   :  { %p6177_p12 = pnand %p6175_p11, %p6172_p10 }
  0xb3   :  { %6180 = shalt.err (!%p6177_p12)
}
  0xb4   :  { %s6181_s6 = scalar_lea.vmem %s124_s22, 32  ;;  %p6186_p0 = scmp.lt.s32.totalorder %s124_s22, %s124_s22 }
  0xb5   :  { %p6182_p13 = scmp.ne.s32.totalorder %s124_s22, %s6181_s6  ;;  %p6187_p1 = scmp.lt.s32.totalorder %s6181_s6, %s6181_s6 }
  0xb7   :  { %p6188_p2 = por %p6187_p1, %p6186_p0 }
  0xb9   :  { %p6189_p3 = pnand %p6188_p2, %p6182_p13 }
  0xbb   :  { %6192 = shalt.err (!%p6189_p3)
}
  0xbc   :  { %126 = dma.hbm_to_vmem [thread:$0]  %s6663_s8, 32, %s124_s22, [#allocation15]  }
  0xbd   :  { %s6193_s18 = scalar_lea.hbm %s6665_s10, 32 }
  0xbe   :  { %p6194_p4 = scmp.ne.s32.totalorder %s6665_s10, %s6193_s18  ;;  %p6197_p5 = scmp.lt.u32.totalorder %s6193_s18, %s6665_s10 }
  0xc0   :  { %p6199_p6 = pnand %p6197_p5, %p6194_p4 }
  0xc2   :  { %6202 = shalt.err (!%p6199_p6)
}
  0xc3   :  { %s6203_s3 = scalar_lea.vmem %s146_s27, 32  ;;  %p6208_p8 = scmp.lt.s32.totalorder %s146_s27, %s146_s27 }
  0xc4   :  { %p6204_p7 = scmp.ne.s32.totalorder %s146_s27, %s6203_s3  ;;  %p6209_p9 = scmp.lt.s32.totalorder %s6203_s3, %s6203_s3 }
  0xc6   :  { %p6210_p10 = por %p6209_p9, %p6208_p8 }
  0xc8   :  { %p6211_p11 = pnand %p6210_p10, %p6204_p7 }
  0xca   :  { %6214 = shalt.err (!%p6211_p11)
}
  0xcb   :  { %148 = dma.hbm_to_vmem [thread:$0]  %s6665_s10, 32, %s146_s27, [#allocation18]  }
  0xcc   :  { %s6319_s23 = smov [#allocation22]   ;;  %s6215_s22 = scalar_lea.hbm %s6667_s12, 16 }
  0xcd   :  { %s167_s4 = sshll.u32 %s6319_s23, 4  ;;  %p6216_p12 = scmp.ne.s32.totalorder %s6667_s12, %s6215_s22  ;;  %s168_s4 = int_to_ptr.vmem [resolvable:$true] %s167_s4 }
  0xce   :  { %p6219_p13 = scmp.lt.u32.totalorder %s6215_s22, %s6667_s12 }
  0xd0   :  { %p6221_p0 = pnand %p6219_p13, %p6216_p12 }
  0xd2   :  { %6224 = shalt.err (!%p6221_p0)
}
  0xd3   :  { %s6225_s17 = scalar_lea.vmem %s168_s4, 16  ;;  %s6229_s10 = scalar_lea.vmem %s168_s4, 32 }
  0xd4   :  { %p6226_p1 = scmp.ne.s32.totalorder %s168_s4, %s6225_s17  ;;  %p6230_p2 = scmp.lt.s32.totalorder %s168_s4, %s168_s4 }
  0xd5   :  { %p6231_p3 = scmp.lt.s32.totalorder %s6229_s10, %s6225_s17 }
  0xd7   :  { %p6232_p4 = por %p6231_p3, %p6230_p2 }
  0xd9   :  { %p6233_p5 = pnand %p6232_p4, %p6226_p1 }
  0xdb   :  { %6236 = shalt.err (!%p6233_p5)
}
  0xdc   :  { %170 = dma.hbm_to_vmem [thread:$0]  %s6667_s12, 16, %s168_s4, [#allocation21]  }
  0xdd   :  { %6281 = dma.done.wait [#allocation3], 896  }
  0xde   :  { %6282 = vsyncadd [#allocation3], 4294966400 }
  0xdf   :  { %6283 = dma.done.wait [#allocation6], 114816  }
  0xe0   :  { %6284 = vsyncadd [#allocation6], 4294852480 }
  0xe1   :  { %6285 = dma.done.wait [#allocation9], 65600  }
  0xe2   :  { %6286 = vsyncadd [#allocation9], 4294901696 }
  0xe3   :  { %6287 = dma.done.wait [#allocation12], 16416  }
  0xe4   :  { %6288 = vsyncadd [#allocation12], 4294950880 }
  0xe5   :  { %6289 = dma.done.wait [#allocation15], 8224  }
  0xe6   :  { %6290 = vsyncadd [#allocation15], 4294959072 }
  0xe7   :  { %6291 = dma.done.wait [#allocation18], 8224  }
  0xe8   :  { %6292 = vsyncadd [#allocation18], 4294959072 }
  0xe9   :  { %6293 = dma.done.wait [#allocation21], 4112  }
  0xea   :  { %6294 = vsyncadd [#allocation21], 4294963184  ;;  %v218_v0 = vld [vmem:[#allocation5 + $0x8] sm:$0xff]  ;;  %v220_v2 = vld [vmem:[#allocation5 + $0x18] sm:$0xff]  ;;  %s6321_s12 = smov [#allocation23]  }
  0xeb   :  { %v226_v1 = vld [vmem:[#allocation5 + $0x48] sm:$0xff]  ;;  %v228_v4 = vld [vmem:[#allocation5 + $0x58] sm:$0xff]  ;;  %v217_v5 = vld [vmem:[#allocation5] sm:$0xff]  ;;  %s4105_s11 = sshll.u32 %s6321_s12, 4  ;;  %s4106_s11 = int_to_ptr.vmem [resolvable:$true] %s4105_s11 }
  0xec   :  { %v4170_v3 = vpack.c.bf16 %v226_v1, %v218_v0  ;;  %v225_v6 = vld [vmem:[#allocation5 + $0x40] sm:$0xff]  ;;  %v4394_v7 = vpack.c.bf16 %v228_v4, %v220_v2  ;;  %v219_v9 = vld [vmem:[#allocation5 + $0x10] sm:$0xff]  ;;  %v234_v11 = vld [vmem:[#allocation5 + $0x88] sm:$0xff]  ;;  %s6237_s15 = scalar_lea.vmem %s4106_s11, 256  ;;  %p6242_p7 = scmp.lt.s32.totalorder %s4106_s11, %s4106_s11 }
  0xed   :  { %v4172_v8 = vpack.c.bf16 %v225_v6, %v217_v5  ;;  %v227_v10 = vld [vmem:[#allocation5 + $0x50] sm:$0xff]  ;;  %v242_v13 = vld [vmem:[#allocation5 + $0xc8] sm:$0xff]  ;;  %v236_v14 = vld [vmem:[#allocation5 + $0x98] sm:$0xff]  ;;  %p6238_p6 = scmp.ne.s32.totalorder %s4106_s11, %s6237_s15  ;;  %p6243_p8 = scmp.lt.s32.totalorder %s6237_s15, %s6237_s15 }
  0xee   :  { %4171 = vmatprep.subr.bf16.mxu0 %v4170_v3  ;;  %v4396_v12 = vpack.c.bf16 %v227_v10, %v219_v9  ;;  %v244_v15 = vld [vmem:[#allocation5 + $0xd8] sm:$0xff]  ;;  %4395 = vmatprep.subr.bf16.mxu1 %v4394_v7  ;;  %v4174_v16 = vpack.c.bf16 %v242_v13, %v234_v11  ;;  %v233_v18 = vld [vmem:[#allocation5 + $0x80] sm:$0xff]  ;;  %v235_v20 = vld [vmem:[#allocation5 + $0x90] sm:$0xff] }
  0xef   :  { %4173 = vmatpush1.bf16.msra.mxu0 %v4172_v8  ;;  %v4398_v17 = vpack.c.bf16 %v244_v15, %v236_v14  ;;  %v241_v19 = vld [vmem:[#allocation5 + $0xc0] sm:$0xff]  ;;  %v243_v22 = vld [vmem:[#allocation5 + $0xd0] sm:$0xff]  ;;  %v250_v23 = vld [vmem:[#allocation5 + $0x108] sm:$0xff]  ;;  %p6244_p9 = por %p6243_p8, %p6242_p7 }
  0xf0   :  { %4397 = vmatpush1.bf16.msra.mxu1 %v4396_v12  ;;  %v4176_v21 = vpack.c.bf16 %v241_v19, %v233_v18  ;;  %v258_v24 = vld [vmem:[#allocation5 + $0x148] sm:$0xff]  ;;  %4175 = vmatprep.subr.bf16.mxu0 %v4174_v16  ;;  %v4400_v25 = vpack.c.bf16 %v243_v22, %v235_v20  ;;  %v252_v27 = vld [vmem:[#allocation5 + $0x118] sm:$0xff]  ;;  %v249_v29 = vld [vmem:[#allocation5 + $0x100] sm:$0xff] }
  0xf1   :  { %4399 = vmatprep.subr.bf16.mxu1 %v4398_v17  ;;  %v4178_v26 = vpack.c.bf16 %v258_v24, %v250_v23  ;;  %v260_v28 = vld [vmem:[#allocation5 + $0x158] sm:$0xff]  ;;  %v257_v31 = vld [vmem:[#allocation5 + $0x140] sm:$0xff]  ;;  %v251_v32 = vld [vmem:[#allocation5 + $0x110] sm:$0xff]  ;;  %p6245_p10 = pnand %p6244_p9, %p6238_p6 }
  0xf2   :  { %v4402_v30 = vpack.c.bf16 %v260_v28, %v252_v27  ;;  %v259_v33 = vld [vmem:[#allocation5 + $0x150] sm:$0xff]  ;;  %v4180_v34 = vpack.c.bf16 %v257_v31, %v249_v29  ;;  %v266_v35 = vld [vmem:[#allocation5 + $0x188] sm:$0xff]  ;;  %v268_v37 = vld [vmem:[#allocation5 + $0x198] sm:$0xff] }
  0xf3   :  { %4177 = vmatpush1.bf16.msra.mxu0 %v4176_v21  ;;  %v274_v36 = vld [vmem:[#allocation5 + $0x1c8] sm:$0xff]  ;;  %v4404_v38 = vpack.c.bf16 %v259_v33, %v251_v32  ;;  %v276_v40 = vld [vmem:[#allocation5 + $0x1d8] sm:$0xff]  ;;  %v265_v41 = vld [vmem:[#allocation5 + $0x180] sm:$0xff] }
  0xf4   :  { %4401 = vmatpush1.bf16.msra.mxu1 %v4400_v25  ;;  %4179 = vmatprep.subr.bf16.mxu0 %v4178_v26  ;;  %v4182_v39 = vpack.c.bf16 %v274_v36, %v266_v35  ;;  %v273_v42 = vld [vmem:[#allocation5 + $0x1c0] sm:$0xff]  ;;  %v4406_v43 = vpack.c.bf16 %v276_v40, %v268_v37  ;;  %v267_v44 = vld [vmem:[#allocation5 + $0x190] sm:$0xff]  ;;  %v282_v46 = vld [vmem:[#allocation5 + $0x208] sm:$0xff] }
  0xf5   :  { %4403 = vmatprep.subr.bf16.mxu1 %v4402_v30  ;;  %v275_v45 = vld [vmem:[#allocation5 + $0x1d0] sm:$0xff]  ;;  %v290_v47 = vld [vmem:[#allocation5 + $0x248] sm:$0xff]  ;;  %v284_v48 = vld [vmem:[#allocation5 + $0x218] sm:$0xff]  ;;  %v4184_v50 = vpack.c.bf16 %v273_v42, %v265_v41 }
  0xf6   :  { %v292_v49 = vld [vmem:[#allocation5 + $0x258] sm:$0xff]  ;;  %v4408_v51 = vpack.c.bf16 %v275_v45, %v267_v44  ;;  %v4186_v52 = vpack.c.bf16 %v290_v47, %v282_v46  ;;  %v281_v53 = vld [vmem:[#allocation5 + $0x200] sm:$0xff]  ;;  %v283_v55 = vld [vmem:[#allocation5 + $0x210] sm:$0xff] }
  0xf7   :  { %4181 = vmatpush1.bf16.msra.mxu0 %v4180_v34  ;;  %v289_v54 = vld [vmem:[#allocation5 + $0x240] sm:$0xff]  ;;  %v4410_v56 = vpack.c.bf16 %v292_v49, %v284_v48  ;;  %v291_v57 = vld [vmem:[#allocation5 + $0x250] sm:$0xff]  ;;  %v298_v58 = vld [vmem:[#allocation5 + $0x288] sm:$0xff] }
  0xf8   :  { %4405 = vmatpush1.bf16.msra.mxu1 %v4404_v38  ;;  %4183 = vmatprep.subr.bf16.mxu0 %v4182_v39  ;;  %v306_v59 = vld [vmem:[#allocation5 + $0x2c8] sm:$0xff]  ;;  %v300_v60 = vld [vmem:[#allocation5 + $0x298] sm:$0xff]  ;;  %v4188_v62 = vpack.c.bf16 %v289_v54, %v281_v53  ;;  %v4412_v63 = vpack.c.bf16 %v291_v57, %v283_v55  ;;  %v297_v1 = vld [vmem:[#allocation5 + $0x280] sm:$0xff] }
  0xf9   :  { %4407 = vmatprep.subr.bf16.mxu1 %v4406_v43  ;;  %v308_v61 = vld [vmem:[#allocation5 + $0x2d8] sm:$0xff]  ;;  %v4190_v0 = vpack.c.bf16 %v306_v59, %v298_v58  ;;  %v305_v2 = vld [vmem:[#allocation5 + $0x2c0] sm:$0xff]  ;;  %v299_v3 = vld [vmem:[#allocation5 + $0x290] sm:$0xff] }
  0xfa   :  { %v4414_v4 = vpack.c.bf16 %v308_v61, %v300_v60  ;;  %v307_v5 = vld [vmem:[#allocation5 + $0x2d0] sm:$0xff]  ;;  %v314_v6 = vld [vmem:[#allocation5 + $0x308] sm:$0xff]  ;;  %v316_v8 = vld [vmem:[#allocation5 + $0x318] sm:$0xff]  ;;  %v4192_v10 = vpack.c.bf16 %v305_v2, %v297_v1 }
  0xfb   :  { %4185 = vmatpush1.bf16.msra.mxu0 %v4184_v50  ;;  %v322_v7 = vld [vmem:[#allocation5 + $0x348] sm:$0xff]  ;;  %v324_v9 = vld [vmem:[#allocation5 + $0x358] sm:$0xff]  ;;  %v4416_v11 = vpack.c.bf16 %v307_v5, %v299_v3  ;;  %v313_v13 = vld [vmem:[#allocation5 + $0x300] sm:$0xff] }
  0xfc   :  { %4409 = vmatpush1.bf16.msra.mxu1 %v4408_v51  ;;  %4187 = vmatprep.subr.bf16.mxu0 %v4186_v52  ;;  %v4194_v12 = vpack.c.bf16 %v322_v7, %v314_v6  ;;  %v321_v14 = vld [vmem:[#allocation5 + $0x340] sm:$0xff]  ;;  %v315_v15 = vld [vmem:[#allocation5 + $0x310] sm:$0xff]  ;;  %v4418_v16 = vpack.c.bf16 %v324_v9, %v316_v8  ;;  %v330_v18 = vld [vmem:[#allocation5 + $0x388] sm:$0xff] }
  0xfd   :  { %4411 = vmatprep.subr.bf16.mxu1 %v4410_v56  ;;  %v323_v17 = vld [vmem:[#allocation5 + $0x350] sm:$0xff]  ;;  %v338_v19 = vld [vmem:[#allocation5 + $0x3c8] sm:$0xff]  ;;  %v332_v20 = vld [vmem:[#allocation5 + $0x398] sm:$0xff]  ;;  %v4196_v22 = vpack.c.bf16 %v321_v14, %v313_v13 }
  0xfe   :  { %v340_v21 = vld [vmem:[#allocation5 + $0x3d8] sm:$0xff]  ;;  %v4420_v23 = vpack.c.bf16 %v323_v17, %v315_v15  ;;  %v4198_v24 = vpack.c.bf16 %v338_v19, %v330_v18  ;;  %v329_v25 = vld [vmem:[#allocation5 + $0x380] sm:$0xff]  ;;  %v331_v27 = vld [vmem:[#allocation5 + $0x390] sm:$0xff] }
  0xff   :  { %4189 = vmatpush1.bf16.msra.mxu0 %v4188_v62  ;;  %v337_v26 = vld [vmem:[#allocation5 + $0x3c0] sm:$0xff]  ;;  %v4422_v28 = vpack.c.bf16 %v340_v21, %v332_v20  ;;  %v339_v29 = vld [vmem:[#allocation5 + $0x3d0] sm:$0xff]  ;;  %v346_v30 = vld [vmem:[#allocation5 + $0x408] sm:$0xff] }
 0x100   :  { %4413 = vmatpush1.bf16.msra.mxu1 %v4412_v63  ;;  %4191 = vmatprep.subr.bf16.mxu0 %v4190_v0  ;;  %v354_v31 = vld [vmem:[#allocation5 + $0x448] sm:$0xff]  ;;  %v348_v32 = vld [vmem:[#allocation5 + $0x418] sm:$0xff]  ;;  %v4200_v34 = vpack.c.bf16 %v337_v26, %v329_v25  ;;  %v4424_v35 = vpack.c.bf16 %v339_v29, %v331_v27  ;;  %v345_v37 = vld [vmem:[#allocation5 + $0x400] sm:$0xff] }
 0x101   :  { %4415 = vmatprep.subr.bf16.mxu1 %v4414_v4  ;;  %v356_v33 = vld [vmem:[#allocation5 + $0x458] sm:$0xff]  ;;  %v4202_v36 = vpack.c.bf16 %v354_v31, %v346_v30  ;;  %v353_v38 = vld [vmem:[#allocation5 + $0x440] sm:$0xff]  ;;  %v347_v39 = vld [vmem:[#allocation5 + $0x410] sm:$0xff] }
 0x102   :  { %v4426_v40 = vpack.c.bf16 %v356_v33, %v348_v32  ;;  %v355_v41 = vld [vmem:[#allocation5 + $0x450] sm:$0xff]  ;;  %v362_v42 = vld [vmem:[#allocation5 + $0x488] sm:$0xff]  ;;  %v364_v44 = vld [vmem:[#allocation5 + $0x498] sm:$0xff]  ;;  %v4204_v46 = vpack.c.bf16 %v353_v38, %v345_v37 }
 0x103   :  { %4193 = vmatpush1.bf16.msra.mxu0 %v4192_v10  ;;  %v370_v43 = vld [vmem:[#allocation5 + $0x4c8] sm:$0xff]  ;;  %v372_v45 = vld [vmem:[#allocation5 + $0x4d8] sm:$0xff]  ;;  %v4428_v47 = vpack.c.bf16 %v355_v41, %v347_v39  ;;  %v361_v49 = vld [vmem:[#allocation5 + $0x480] sm:$0xff] }
 0x104   :  { %4417 = vmatpush1.bf16.msra.mxu1 %v4416_v11  ;;  %4195 = vmatprep.subr.bf16.mxu0 %v4194_v12  ;;  %v4206_v48 = vpack.c.bf16 %v370_v43, %v362_v42  ;;  %v369_v50 = vld [vmem:[#allocation5 + $0x4c0] sm:$0xff]  ;;  %v363_v51 = vld [vmem:[#allocation5 + $0x490] sm:$0xff]  ;;  %v4430_v52 = vpack.c.bf16 %v372_v45, %v364_v44  ;;  %v378_v54 = vld [vmem:[#allocation5 + $0x508] sm:$0xff] }
 0x105   :  { %4419 = vmatprep.subr.bf16.mxu1 %v4418_v16  ;;  %v371_v53 = vld [vmem:[#allocation5 + $0x4d0] sm:$0xff]  ;;  %v386_v55 = vld [vmem:[#allocation5 + $0x548] sm:$0xff]  ;;  %v380_v56 = vld [vmem:[#allocation5 + $0x518] sm:$0xff]  ;;  %v4208_v58 = vpack.c.bf16 %v369_v50, %v361_v49 }
 0x106   :  { %v388_v57 = vld [vmem:[#allocation5 + $0x558] sm:$0xff]  ;;  %v4432_v59 = vpack.c.bf16 %v371_v53, %v363_v51  ;;  %v4210_v60 = vpack.c.bf16 %v386_v55, %v378_v54  ;;  %v377_v61 = vld [vmem:[#allocation5 + $0x500] sm:$0xff]  ;;  %v379_v63 = vld [vmem:[#allocation5 + $0x510] sm:$0xff] }
 0x107   :  { %4197 = vmatpush1.bf16.msra.mxu0 %v4196_v22  ;;  %v385_v62 = vld [vmem:[#allocation5 + $0x540] sm:$0xff]  ;;  %v4434_v0 = vpack.c.bf16 %v388_v57, %v380_v56  ;;  %v387_v1 = vld [vmem:[#allocation5 + $0x550] sm:$0xff]  ;;  %v394_v2 = vld [vmem:[#allocation5 + $0x588] sm:$0xff] }
 0x108   :  { %4421 = vmatpush1.bf16.msra.mxu1 %v4420_v23  ;;  %4199 = vmatprep.subr.bf16.mxu0 %v4198_v24  ;;  %v402_v3 = vld [vmem:[#allocation5 + $0x5c8] sm:$0xff]  ;;  %v396_v4 = vld [vmem:[#allocation5 + $0x598] sm:$0xff]  ;;  %v4212_v6 = vpack.c.bf16 %v385_v62, %v377_v61  ;;  %v393_v7 = vld [vmem:[#allocation5 + $0x580] sm:$0xff]  ;;  %v4436_v8 = vpack.c.bf16 %v387_v1, %v379_v63 }
 0x109   :  { %4423 = vmatprep.subr.bf16.mxu1 %v4422_v28  ;;  %v404_v5 = vld [vmem:[#allocation5 + $0x5d8] sm:$0xff]  ;;  %v4214_v9 = vpack.c.bf16 %v402_v3, %v394_v2  ;;  %v401_v10 = vld [vmem:[#allocation5 + $0x5c0] sm:$0xff]  ;;  %v395_v11 = vld [vmem:[#allocation5 + $0x590] sm:$0xff] }
 0x10a   :  { %v403_v12 = vld [vmem:[#allocation5 + $0x5d0] sm:$0xff]  ;;  %v4438_v13 = vpack.c.bf16 %v404_v5, %v396_v4  ;;  %v410_v14 = vld [vmem:[#allocation5 + $0x608] sm:$0xff]  ;;  %v412_v17 = vld [vmem:[#allocation5 + $0x618] sm:$0xff]  ;;  %v4216_v19 = vpack.c.bf16 %v401_v10, %v393_v7 }
 0x10b   :  { %4201 = vmatpush1.bf16.msra.mxu0 %v4200_v34  ;;  %v418_v15 = vld [vmem:[#allocation5 + $0x648] sm:$0xff]  ;;  %v211_v16 = vld [vmem:[#allocation2 + $0x8] sm:$0xff]  ;;  %v420_v18 = vld [vmem:[#allocation5 + $0x658] sm:$0xff]  ;;  %v4440_v20 = vpack.c.bf16 %v403_v12, %v395_v11 }
 0x10c   :  { %4425 = vmatpush1.bf16.msra.mxu1 %v4424_v35  ;;  %4203 = vmatprep.subr.bf16.mxu0 %v4202_v36  ;;  %v4218_v21 = vpack.c.bf16 %v418_v15, %v410_v14  ;;  %v409_v22 = vld [vmem:[#allocation5 + $0x600] sm:$0xff]  ;;  %v411_v24 = vld [vmem:[#allocation5 + $0x610] sm:$0xff]  ;;  %v4442_v25 = vpack.c.bf16 %v420_v18, %v412_v17  ;;  %v426_v27 = vld [vmem:[#allocation5 + $0x688] sm:$0xff] }
 0x10d   :  { %4427 = vmatprep.subr.bf16.mxu1 %v4426_v40  ;;  %1219 = vmatprep.mubr.f32.mxu0 %v211_v16  ;;  %v417_v23 = vld [vmem:[#allocation5 + $0x640] sm:$0xff]  ;;  %v419_v26 = vld [vmem:[#allocation5 + $0x650] sm:$0xff]  ;;  %v434_v28 = vld [vmem:[#allocation5 + $0x6c8] sm:$0xff] }
 0x10e   :  { %1503 = vmatprep.mubr.f32.mxu1 %v211_v16  ;;  %v428_v29 = vld [vmem:[#allocation5 + $0x698] sm:$0xff]  ;;  %v4220_v31 = vpack.c.bf16 %v417_v23, %v409_v22  ;;  %v4444_v32 = vpack.c.bf16 %v419_v26, %v411_v24  ;;  %v4222_v33 = vpack.c.bf16 %v434_v28, %v426_v27  ;;  %v425_v34 = vld [vmem:[#allocation5 + $0x680] sm:$0xff]  ;;  %v427_v36 = vld [vmem:[#allocation5 + $0x690] sm:$0xff] }
 0x10f   :  { %4205 = vmatpush1.bf16.msra.mxu0 %v4204_v46  ;;  %v436_v30 = vld [vmem:[#allocation5 + $0x6d8] sm:$0xff]  ;;  %v433_v35 = vld [vmem:[#allocation5 + $0x6c0] sm:$0xff]  ;;  %v435_v38 = vld [vmem:[#allocation5 + $0x6d0] sm:$0xff] }
 0x110   :  { %4429 = vmatpush1.bf16.msra.mxu1 %v4428_v47  ;;  %4207 = vmatprep.subr.bf16.mxu0 %v4206_v48  ;;  %v4446_v37 = vpack.c.bf16 %v436_v30, %v428_v29  ;;  %v442_v39 = vld [vmem:[#allocation5 + $0x708] sm:$0xff]  ;;  %v444_v41 = vld [vmem:[#allocation5 + $0x718] sm:$0xff]  ;;  %v4224_v43 = vpack.c.bf16 %v433_v35, %v425_v34  ;;  %v4448_v44 = vpack.c.bf16 %v435_v38, %v427_v36  ;;  %v441_v46 = vld [vmem:[#allocation5 + $0x700] sm:$0xff] }
 0x111   :  { %4431 = vmatprep.subr.bf16.mxu1 %v4430_v52  ;;  %v450_v40 = vld [vmem:[#allocation5 + $0x748] sm:$0xff]  ;;  %v452_v42 = vld [vmem:[#allocation5 + $0x758] sm:$0xff]  ;;  %v449_v47 = vld [vmem:[#allocation5 + $0x740] sm:$0xff] }
 0x112   :  { %v4226_v45 = vpack.c.bf16 %v450_v40, %v442_v39  ;;  %v443_v48 = vld [vmem:[#allocation5 + $0x710] sm:$0xff]  ;;  %v4450_v49 = vpack.c.bf16 %v452_v42, %v444_v41  ;;  %v458_v51 = vld [vmem:[#allocation5 + $0x788] sm:$0xff]  ;;  %v460_v53 = vld [vmem:[#allocation5 + $0x798] sm:$0xff]  ;;  %v4228_v55 = vpack.c.bf16 %v449_v47, %v441_v46 }
 0x113   :  { %4209 = vmatpush1.bf16.msra.mxu0 %v4208_v58  ;;  %v451_v50 = vld [vmem:[#allocation5 + $0x750] sm:$0xff]  ;;  %v466_v52 = vld [vmem:[#allocation5 + $0x7c8] sm:$0xff]  ;;  %v468_v54 = vld [vmem:[#allocation5 + $0x7d8] sm:$0xff] }
 0x114   :  { %4433 = vmatpush1.bf16.msra.mxu1 %v4432_v59  ;;  %4211 = vmatprep.subr.bf16.mxu0 %v4210_v60  ;;  %v4452_v56 = vpack.c.bf16 %v451_v50, %v443_v48  ;;  %v4230_v57 = vpack.c.bf16 %v466_v52, %v458_v51  ;;  %v457_v58 = vld [vmem:[#allocation5 + $0x780] sm:$0xff]  ;;  %v459_v60 = vld [vmem:[#allocation5 + $0x790] sm:$0xff]  ;;  %v4454_v61 = vpack.c.bf16 %v468_v54, %v460_v53  ;;  %v474_v63 = vld [vmem:[#allocation5 + $0x808] sm:$0xff] }
 0x115   :  { %4435 = vmatprep.subr.bf16.mxu1 %v4434_v0  ;;  %v465_v59 = vld [vmem:[#allocation5 + $0x7c0] sm:$0xff]  ;;  %v467_v62 = vld [vmem:[#allocation5 + $0x7d0] sm:$0xff]  ;;  %v482_v0 = vld [vmem:[#allocation5 + $0x848] sm:$0xff] }
 0x116   :  { %v476_v1 = vld [vmem:[#allocation5 + $0x818] sm:$0xff]  ;;  %v4232_v3 = vpack.c.bf16 %v465_v59, %v457_v58  ;;  %v4456_v4 = vpack.c.bf16 %v467_v62, %v459_v60  ;;  %v4234_v5 = vpack.c.bf16 %v482_v0, %v474_v63  ;;  %v481_v7 = vld [vmem:[#allocation5 + $0x840] sm:$0xff]  ;;  %v483_v10 = vld [vmem:[#allocation5 + $0x850] sm:$0xff] }
 0x117   :  { %4213 = vmatpush1.bf16.msra.mxu0 %v4212_v6  ;;  %v484_v2 = vld [vmem:[#allocation5 + $0x858] sm:$0xff]  ;;  %v473_v6 = vld [vmem:[#allocation5 + $0x800] sm:$0xff]  ;;  %v490_v11 = vld [vmem:[#allocation5 + $0x888] sm:$0xff] }
 0x118   :  { %4437 = vmatpush1.bf16.msra.mxu1 %v4436_v8  ;;  %4215 = vmatprep.subr.bf16.mxu0 %v4214_v9  ;;  %v475_v8 = vld [vmem:[#allocation5 + $0x810] sm:$0xff]  ;;  %v4458_v9 = vpack.c.bf16 %v484_v2, %v476_v1  ;;  %v498_v12 = vld [vmem:[#allocation5 + $0x8c8] sm:$0xff]  ;;  %v500_v14 = vld [vmem:[#allocation5 + $0x8d8] sm:$0xff]  ;;  %v4236_v16 = vpack.c.bf16 %v481_v7, %v473_v6 }
 0x119   :  { %4439 = vmatprep.subr.bf16.mxu1 %v4438_v13  ;;  %v492_v13 = vld [vmem:[#allocation5 + $0x898] sm:$0xff]  ;;  %v210_v15 = vld [vmem:[#allocation2] sm:$0xff]  ;;  %v4460_v17 = vpack.c.bf16 %v483_v10, %v475_v8  ;;  %v4238_v18 = vpack.c.bf16 %v498_v12, %v490_v11  ;;  %v499_v23 = vld [vmem:[#allocation5 + $0x8d0] sm:$0xff] }
 0x11a   :  { %v4462_v22 = vpack.c.bf16 %v500_v14, %v492_v13  ;;  %v506_v24 = vld [vmem:[#allocation5 + $0x908] sm:$0xff]  ;;  %v508_v26 = vld [vmem:[#allocation5 + $0x918] sm:$0xff]  ;;  %v515_v35 = vld [vmem:[#allocation5 + $0x950] sm:$0xff] }
 0x11b   :  { %4217 = vmatpush1.bf16.msra.mxu0 %v4216_v19  ;;  %v489_v19 = vld [vmem:[#allocation5 + $0x880] sm:$0xff]  ;;  %v516_v27 = vld [vmem:[#allocation5 + $0x958] sm:$0xff]  ;;  %v522_v36 = vld [vmem:[#allocation5 + $0x988] sm:$0xff] }
 0x11c   :  { %4441 = vmatpush1.bf16.msra.mxu1 %v4440_v20  ;;  %4219 = vmatprep.subr.bf16.mxu0 %v4218_v21  ;;  %v497_v20 = vld [vmem:[#allocation5 + $0x8c0] sm:$0xff]  ;;  %v491_v21 = vld [vmem:[#allocation5 + $0x890] sm:$0xff]  ;;  %v4466_v34 = vpack.c.bf16 %v516_v27, %v508_v26  ;;  %v524_v38 = vld [vmem:[#allocation5 + $0x998] sm:$0xff] }
 0x11d   :  { %4443 = vmatprep.subr.bf16.mxu1 %v4442_v25  ;;  %v514_v25 = vld [vmem:[#allocation5 + $0x948] sm:$0xff]  ;;  %v4240_v28 = vpack.c.bf16 %v497_v20, %v489_v19  ;;  %v4464_v29 = vpack.c.bf16 %v499_v23, %v491_v21  ;;  %v532_v39 = vld [vmem:[#allocation5 + $0x9d8] sm:$0xff]  ;;  %v531_v47 = vld [vmem:[#allocation5 + $0x9d0] sm:$0xff] }
 0x11e   :  { %v4242_v30 = vpack.c.bf16 %v514_v25, %v506_v24  ;;  %v4470_v46 = vpack.c.bf16 %v532_v39, %v524_v38  ;;  %v538_v48 = vld [vmem:[#allocation5 + $0xa08] sm:$0xff]  ;;  %v540_v50 = vld [vmem:[#allocation5 + $0xa18] sm:$0xff]  ;;  %v547_v59 = vld [vmem:[#allocation5 + $0xa50] sm:$0xff] }
 0x11f   :  { %4221 = vmatpush1.bf16.msra.mxu0 %v4220_v31  ;;  %v505_v31 = vld [vmem:[#allocation5 + $0x900] sm:$0xff]  ;;  %v548_v51 = vld [vmem:[#allocation5 + $0xa58] sm:$0xff]  ;;  %v554_v60 = vld [vmem:[#allocation5 + $0xa88] sm:$0xff] }
 0x120   :  { %4445 = vmatpush1.bf16.msra.mxu1 %v4444_v32  ;;  %4223 = vmatprep.subr.bf16.mxu0 %v4222_v33  ;;  %v513_v32 = vld [vmem:[#allocation5 + $0x940] sm:$0xff]  ;;  %v507_v33 = vld [vmem:[#allocation5 + $0x910] sm:$0xff]  ;;  %v4474_v58 = vpack.c.bf16 %v548_v51, %v540_v50  ;;  %v556_v62 = vld [vmem:[#allocation5 + $0xa98] sm:$0xff] }
 0x121   :  { %4447 = vmatprep.subr.bf16.mxu1 %v4446_v37  ;;  %v530_v37 = vld [vmem:[#allocation5 + $0x9c8] sm:$0xff]  ;;  %v4244_v40 = vpack.c.bf16 %v513_v32, %v505_v31  ;;  %v4468_v41 = vpack.c.bf16 %v515_v35, %v507_v33  ;;  %v564_v63 = vld [vmem:[#allocation5 + $0xad8] sm:$0xff]  ;;  %v563_v7 = vld [vmem:[#allocation5 + $0xad0] sm:$0xff] }
 0x122   :  { %v4246_v42 = vpack.c.bf16 %v530_v37, %v522_v36  ;;  %v4478_v6 = vpack.c.bf16 %v564_v63, %v556_v62  ;;  %v570_v8 = vld [vmem:[#allocation5 + $0xb08] sm:$0xff]  ;;  %v572_v10 = vld [vmem:[#allocation5 + $0xb18] sm:$0xff]  ;;  %v569_v13 = vld [vmem:[#allocation5 + $0xb00] sm:$0xff] }
 0x123   :  { %4225 = vmatpush1.bf16.msra.mxu0 %v4224_v43  ;;  %v521_v43 = vld [vmem:[#allocation5 + $0x980] sm:$0xff]  ;;  %v580_v11 = vld [vmem:[#allocation5 + $0xb58] sm:$0xff]  ;;  %v586_v20 = vld [vmem:[#allocation5 + $0xb88] sm:$0xff] }
 0x124   :  { %4449 = vmatpush1.bf16.msra.mxu1 %v4448_v44  ;;  %4227 = vmatprep.subr.bf16.mxu0 %v4226_v45  ;;  %v529_v44 = vld [vmem:[#allocation5 + $0x9c0] sm:$0xff]  ;;  %v523_v45 = vld [vmem:[#allocation5 + $0x990] sm:$0xff]  ;;  %v4482_v19 = vpack.c.bf16 %v580_v11, %v572_v10  ;;  %v594_v21 = vld [vmem:[#allocation5 + $0xbc8] sm:$0xff] }
 0x125   :  { %4451 = vmatprep.subr.bf16.mxu1 %v4450_v49  ;;  %v546_v49 = vld [vmem:[#allocation5 + $0xa48] sm:$0xff]  ;;  %v4248_v52 = vpack.c.bf16 %v529_v44, %v521_v43  ;;  %v4472_v53 = vpack.c.bf16 %v531_v47, %v523_v45  ;;  %v588_v23 = vld [vmem:[#allocation5 + $0xb98] sm:$0xff]  ;;  %v4262_v27 = vpack.c.bf16 %v594_v21, %v586_v20  ;;  %v595_v32 = vld [vmem:[#allocation5 + $0xbd0] sm:$0xff] }
 0x126   :  { %v4250_v54 = vpack.c.bf16 %v546_v49, %v538_v48  ;;  %v596_v24 = vld [vmem:[#allocation5 + $0xbd8] sm:$0xff]  ;;  %v602_v33 = vld [vmem:[#allocation5 + $0xc08] sm:$0xff]  ;;  %v611_v44 = vld [vmem:[#allocation5 + $0xc50] sm:$0xff] }
 0x127   :  { %4229 = vmatpush1.bf16.msra.mxu0 %v4228_v55  ;;  %v537_v55 = vld [vmem:[#allocation5 + $0xa00] sm:$0xff]  ;;  %v4486_v31 = vpack.c.bf16 %v596_v24, %v588_v23  ;;  %v604_v35 = vld [vmem:[#allocation5 + $0xc18] sm:$0xff]  ;;  %v618_v45 = vld [vmem:[#allocation5 + $0xc88] sm:$0xff] }
 0x128   :  { %4453 = vmatpush1.bf16.msra.mxu1 %v4452_v56  ;;  %4231 = vmatprep.subr.bf16.mxu0 %v4230_v57  ;;  %v545_v56 = vld [vmem:[#allocation5 + $0xa40] sm:$0xff]  ;;  %v539_v57 = vld [vmem:[#allocation5 + $0xa10] sm:$0xff]  ;;  %v612_v36 = vld [vmem:[#allocation5 + $0xc58] sm:$0xff] }
 0x129   :  { %4455 = vmatprep.subr.bf16.mxu1 %v4454_v61  ;;  %v562_v61 = vld [vmem:[#allocation5 + $0xac8] sm:$0xff]  ;;  %v4252_v0 = vpack.c.bf16 %v545_v56, %v537_v55  ;;  %v4476_v1 = vpack.c.bf16 %v547_v59, %v539_v57  ;;  %v4490_v43 = vpack.c.bf16 %v612_v36, %v604_v35  ;;  %v620_v47 = vld [vmem:[#allocation5 + $0xc98] sm:$0xff]  ;;  %v627_v56 = vld [vmem:[#allocation5 + $0xcd0] sm:$0xff] }
 0x12a   :  { %v4254_v2 = vpack.c.bf16 %v562_v61, %v554_v60  ;;  %v628_v48 = vld [vmem:[#allocation5 + $0xcd8] sm:$0xff]  ;;  %v634_v57 = vld [vmem:[#allocation5 + $0xd08] sm:$0xff]  ;;  %v665_v24 = vld [vmem:[#allocation5 + $0xe00] sm:$0xff] }
 0x12b   :  { %4233 = vmatpush1.bf16.msra.mxu0 %v4232_v3  ;;  %v553_v3 = vld [vmem:[#allocation5 + $0xa80] sm:$0xff]  ;;  %v4494_v55 = vpack.c.bf16 %v628_v48, %v620_v47  ;;  %v636_v59 = vld [vmem:[#allocation5 + $0xd18] sm:$0xff] }
 0x12c   :  { %4457 = vmatpush1.bf16.msra.mxu1 %v4456_v4  ;;  %4235 = vmatprep.subr.bf16.mxu0 %v4234_v5  ;;  %v561_v4 = vld [vmem:[#allocation5 + $0xac0] sm:$0xff]  ;;  %v555_v5 = vld [vmem:[#allocation5 + $0xa90] sm:$0xff]  ;;  %v644_v60 = vld [vmem:[#allocation5 + $0xd58] sm:$0xff] }
 0x12d   :  { %4459 = vmatprep.subr.bf16.mxu1 %v4458_v9  ;;  %v578_v9 = vld [vmem:[#allocation5 + $0xb48] sm:$0xff]  ;;  %v4256_v12 = vpack.c.bf16 %v561_v4, %v553_v3  ;;  %v4480_v14 = vpack.c.bf16 %v563_v7, %v555_v5  ;;  %v4498_v3 = vpack.c.bf16 %v644_v60, %v636_v59  ;;  %v643_v4 = vld [vmem:[#allocation5 + $0xd50] sm:$0xff]  ;;  %v652_v7 = vld [vmem:[#allocation5 + $0xd98] sm:$0xff] }
 0x12e   :  { %1220 = vmatmul.mubr.f32.vlgmr.msra.gmra.mrb[0].mxu0 %v210_v15  ;;  %v650_v5 = vld [vmem:[#allocation5 + $0xd88] sm:$0xff]  ;;  %v676_v20 = vld [vmem:[#allocation5 + $0xe58] sm:$0xff]  ;;  %v681_v36 = vld [vmem:[#allocation5 + $0xe80] sm:$0xff] }
 0x12f   :  { %4237 = vmatpush1.bf16.msra.mxu0 %v4236_v16  ;;  %1504 = vmatmul.mubr.f32.vlgmr.msra.gmra.mrb[0].mxu1 %v210_v15  ;;  %v4258_v15 = vpack.c.bf16 %v578_v9, %v570_v8  ;;  %v577_v16 = vld [vmem:[#allocation5 + $0xb40] sm:$0xff]  ;;  %v660_v8 = vld [vmem:[#allocation5 + $0xdd8] sm:$0xff] }
 0x130   :  { %4461 = vmatpush1.bf16.msra.mxu1 %v4460_v17  ;;  %4239 = vmatprep.subr.bf16.mxu0 %v4238_v18  ;;  %v571_v17 = vld [vmem:[#allocation5 + $0xb10] sm:$0xff]  ;;  %v4260_v25 = vpack.c.bf16 %v577_v16, %v569_v13  ;;  %v657_v13 = vld [vmem:[#allocation5 + $0xdc0] sm:$0xff] }
 0x131   :  { %4463 = vmatprep.subr.bf16.mxu1 %v4462_v22  ;;  %v579_v18 = vld [vmem:[#allocation5 + $0xb50] sm:$0xff]  ;;  %v213_v22 = vld [vmem:[#allocation2 + $0x18] sm:$0xff] }
 0x132   :  { %1290 = vmatprep.mubr.f32.mxu0 %v213_v22  ;;  %1574 = vmatprep.mubr.f32.mxu1 %v213_v22  ;;  %v4484_v26 = vpack.c.bf16 %v579_v18, %v571_v17  ;;  %v659_v16 = vld [vmem:[#allocation5 + $0xdd0] sm:$0xff]  ;;  %v666_v17 = vld [vmem:[#allocation5 + $0xe08] sm:$0xff]  ;;  %v697_v48 = vld [vmem:[#allocation5 + $0xf00] sm:$0xff] }
 0x133   :  { %4241 = vmatpush1.bf16.msra.mxu0 %v4240_v28  ;;  %v585_v28 = vld [vmem:[#allocation5 + $0xb80] sm:$0xff]  ;;  %v674_v18 = vld [vmem:[#allocation5 + $0xe48] sm:$0xff] }
 0x134   :  { %4465 = vmatpush1.bf16.msra.mxu1 %v4464_v29  ;;  %4243 = vmatprep.subr.bf16.mxu0 %v4242_v30  ;;  %v593_v29 = vld [vmem:[#allocation5 + $0xbc0] sm:$0xff]  ;;  %v587_v30 = vld [vmem:[#allocation5 + $0xb90] sm:$0xff]  ;;  %v4282_v23 = vpack.c.bf16 %v674_v18, %v666_v17  ;;  %v212_v17 = vld [vmem:[#allocation2 + $0x10] sm:$0xff] }
 0x135   :  { %4467 = vmatprep.subr.bf16.mxu1 %v4466_v34  ;;  %v610_v34 = vld [vmem:[#allocation5 + $0xc48] sm:$0xff]  ;;  %v4264_v37 = vpack.c.bf16 %v593_v29, %v585_v28  ;;  %v4488_v38 = vpack.c.bf16 %v595_v32, %v587_v30  ;;  %v675_v28 = vld [vmem:[#allocation5 + $0xe50] sm:$0xff]  ;;  %v692_v32 = vld [vmem:[#allocation5 + $0xed8] sm:$0xff] }
 0x136   :  { %v4266_v39 = vpack.c.bf16 %v610_v34, %v602_v33  ;;  %v682_v29 = vld [vmem:[#allocation5 + $0xe88] sm:$0xff]  ;;  %v713_v60 = vld [vmem:[#allocation5 + $0xf80] sm:$0xff] }
 0x137   :  { %4245 = vmatpush1.bf16.msra.mxu0 %v4244_v40  ;;  %v601_v40 = vld [vmem:[#allocation5 + $0xc00] sm:$0xff]  ;;  %v690_v30 = vld [vmem:[#allocation5 + $0xec8] sm:$0xff] }
 0x138   :  { %4469 = vmatpush1.bf16.msra.mxu1 %v4468_v41  ;;  %4247 = vmatprep.subr.bf16.mxu0 %v4246_v42  ;;  %v609_v41 = vld [vmem:[#allocation5 + $0xc40] sm:$0xff]  ;;  %v603_v42 = vld [vmem:[#allocation5 + $0xc10] sm:$0xff]  ;;  %v4286_v35 = vpack.c.bf16 %v690_v30, %v682_v29  ;;  %v772_v29 = vld [vmem:[#allocation5 + $0x1158] sm:$0xff] }
 0x139   :  { %4471 = vmatprep.subr.bf16.mxu1 %v4470_v46  ;;  %v626_v46 = vld [vmem:[#allocation5 + $0xcc8] sm:$0xff]  ;;  %v4268_v49 = vpack.c.bf16 %v609_v41, %v601_v40  ;;  %v4492_v50 = vpack.c.bf16 %v611_v44, %v603_v42  ;;  %v691_v40 = vld [vmem:[#allocation5 + $0xed0] sm:$0xff]  ;;  %v708_v44 = vld [vmem:[#allocation5 + $0xf58] sm:$0xff] }
 0x13a   :  { %v4270_v51 = vpack.c.bf16 %v626_v46, %v618_v45  ;;  %v698_v41 = vld [vmem:[#allocation5 + $0xf08] sm:$0xff]  ;;  %v215_v30 = vld [vmem:[#allocation2 + $0x28] sm:$0xff] }
 0x13b   :  { %4249 = vmatpush1.bf16.msra.mxu0 %v4248_v52  ;;  %v617_v52 = vld [vmem:[#allocation5 + $0xc80] sm:$0xff]  ;;  %v706_v42 = vld [vmem:[#allocation5 + $0xf48] sm:$0xff] }
 0x13c   :  { %4473 = vmatpush1.bf16.msra.mxu1 %v4472_v53  ;;  %4251 = vmatprep.subr.bf16.mxu0 %v4250_v54  ;;  %v625_v53 = vld [vmem:[#allocation5 + $0xcc0] sm:$0xff]  ;;  %v619_v54 = vld [vmem:[#allocation5 + $0xc90] sm:$0xff]  ;;  %v4290_v47 = vpack.c.bf16 %v706_v42, %v698_v41  ;;  %v780_v41 = vld [vmem:[#allocation5 + $0x1198] sm:$0xff] }
 0x13d   :  { %4475 = vmatprep.subr.bf16.mxu1 %v4474_v58  ;;  %v642_v58 = vld [vmem:[#allocation5 + $0xd48] sm:$0xff]  ;;  %v4272_v61 = vpack.c.bf16 %v625_v53, %v617_v52  ;;  %v4496_v62 = vpack.c.bf16 %v627_v56, %v619_v54  ;;  %v707_v52 = vld [vmem:[#allocation5 + $0xf50] sm:$0xff]  ;;  %v724_v56 = vld [vmem:[#allocation5 + $0xfd8] sm:$0xff] }
 0x13e   :  { %v4274_v63 = vpack.c.bf16 %v642_v58, %v634_v57  ;;  %v714_v53 = vld [vmem:[#allocation5 + $0xf88] sm:$0xff]  ;;  %v788_v42 = vld [vmem:[#allocation5 + $0x11d8] sm:$0xff] }
 0x13f   :  { %4253 = vmatpush1.bf16.msra.mxu0 %v4252_v0  ;;  %v633_v0 = vld [vmem:[#allocation5 + $0xd00] sm:$0xff]  ;;  %v722_v54 = vld [vmem:[#allocation5 + $0xfc8] sm:$0xff] }
 0x140   :  { %4477 = vmatpush1.bf16.msra.mxu1 %v4476_v1  ;;  %4255 = vmatprep.subr.bf16.mxu0 %v4254_v2  ;;  %v641_v1 = vld [vmem:[#allocation5 + $0xd40] sm:$0xff]  ;;  %v635_v2 = vld [vmem:[#allocation5 + $0xd10] sm:$0xff]  ;;  %v4294_v59 = vpack.c.bf16 %v722_v54, %v714_v53  ;;  %v796_v53 = vld [vmem:[#allocation5 + $0x1218] sm:$0xff] }
 0x141   :  { %4479 = vmatprep.subr.bf16.mxu1 %v4478_v6  ;;  %v658_v6 = vld [vmem:[#allocation5 + $0xdc8] sm:$0xff]  ;;  %v4276_v9 = vpack.c.bf16 %v641_v1, %v633_v0  ;;  %v4500_v10 = vpack.c.bf16 %v643_v4, %v635_v2  ;;  %v723_v0 = vld [vmem:[#allocation5 + $0xfd0] sm:$0xff]  ;;  %v740_v4 = vld [vmem:[#allocation5 + $0x1058] sm:$0xff] }
 0x142   :  { %v4278_v11 = vpack.c.bf16 %v658_v6, %v650_v5  ;;  %v730_v1 = vld [vmem:[#allocation5 + $0x1008] sm:$0xff]  ;;  %v804_v54 = vld [vmem:[#allocation5 + $0x1258] sm:$0xff] }
 0x143   :  { %4257 = vmatpush1.bf16.msra.mxu0 %v4256_v12  ;;  %v649_v12 = vld [vmem:[#allocation5 + $0xd80] sm:$0xff]  ;;  %v738_v2 = vld [vmem:[#allocation5 + $0x1048] sm:$0xff] }
 0x144   :  { %4481 = vmatpush1.bf16.msra.mxu1 %v4480_v14  ;;  %4259 = vmatprep.subr.bf16.mxu0 %v4258_v15  ;;  %v651_v14 = vld [vmem:[#allocation5 + $0xd90] sm:$0xff]  ;;  %v4502_v15 = vpack.c.bf16 %v660_v8, %v652_v7  ;;  %v4280_v21 = vpack.c.bf16 %v657_v13, %v649_v12  ;;  %v4298_v7 = vpack.c.bf16 %v738_v2, %v730_v1  ;;  %v729_v8 = vld [vmem:[#allocation5 + $0x1000] sm:$0xff]  ;;  %v746_v13 = vld [vmem:[#allocation5 + $0x1088] sm:$0xff] }
 0x145   :  { %4483 = vmatprep.subr.bf16.mxu1 %v4482_v19  ;;  %v668_v19 = vld [vmem:[#allocation5 + $0xe18] sm:$0xff]  ;;  %v4504_v22 = vpack.c.bf16 %v659_v16, %v651_v14  ;;  %v739_v12 = vld [vmem:[#allocation5 + $0x1050] sm:$0xff]  ;;  %v754_v14 = vld [vmem:[#allocation5 + $0x10c8] sm:$0xff] }
 0x146   :  { %v756_v16 = vld [vmem:[#allocation5 + $0x10d8] sm:$0xff] }
 0x147   :  { %4261 = vmatpush1.bf16.msra.mxu0 %v4260_v25  ;;  %v673_v25 = vld [vmem:[#allocation5 + $0xe40] sm:$0xff]  ;;  %v812_v1 = vld [vmem:[#allocation5 + $0x1298] sm:$0xff] }
 0x148   :  { %4485 = vmatpush1.bf16.msra.mxu1 %v4484_v26  ;;  %4263 = vmatprep.subr.bf16.mxu0 %v4262_v27  ;;  %v667_v26 = vld [vmem:[#allocation5 + $0xe10] sm:$0xff]  ;;  %v4506_v27 = vpack.c.bf16 %v676_v20, %v668_v19  ;;  %v4284_v33 = vpack.c.bf16 %v673_v25, %v665_v24  ;;  %v4302_v20 = vpack.c.bf16 %v754_v14, %v746_v13  ;;  %v820_v2 = vld [vmem:[#allocation5 + $0x12d8] sm:$0xff] }
 0x149   :  { %4487 = vmatprep.subr.bf16.mxu1 %v4486_v31  ;;  %v684_v31 = vld [vmem:[#allocation5 + $0xe98] sm:$0xff]  ;;  %v4508_v34 = vpack.c.bf16 %v675_v28, %v667_v26  ;;  %v755_v25 = vld [vmem:[#allocation5 + $0x10d0] sm:$0xff]  ;;  %v762_v26 = vld [vmem:[#allocation5 + $0x1108] sm:$0xff] }
 0x14a   :  { %v764_v28 = vld [vmem:[#allocation5 + $0x1118] sm:$0xff] }
 0x14b   :  { %4265 = vmatpush1.bf16.msra.mxu0 %v4264_v37  ;;  %v689_v37 = vld [vmem:[#allocation5 + $0xec0] sm:$0xff]  ;;  %v828_v13 = vld [vmem:[#allocation5 + $0x1318] sm:$0xff] }
 0x14c   :  { %4489 = vmatpush1.bf16.msra.mxu1 %v4488_v38  ;;  %4267 = vmatprep.subr.bf16.mxu0 %v4266_v39  ;;  %v683_v38 = vld [vmem:[#allocation5 + $0xe90] sm:$0xff]  ;;  %v4510_v39 = vpack.c.bf16 %v692_v32, %v684_v31  ;;  %v4288_v45 = vpack.c.bf16 %v689_v37, %v681_v36  ;;  %v4530_v37 = vpack.c.bf16 %v772_v29, %v764_v28  ;;  %v836_v14 = vld [vmem:[#allocation5 + $0x1358] sm:$0xff] }
 0x14d   :  { %4491 = vmatprep.subr.bf16.mxu1 %v4490_v43  ;;  %v700_v43 = vld [vmem:[#allocation5 + $0xf18] sm:$0xff]  ;;  %v4512_v46 = vpack.c.bf16 %v691_v40, %v683_v38  ;;  %v763_v36 = vld [vmem:[#allocation5 + $0x1110] sm:$0xff]  ;;  %v786_v40 = vld [vmem:[#allocation5 + $0x11c8] sm:$0xff] }
 0x14e   :  { %v771_v38 = vld [vmem:[#allocation5 + $0x1150] sm:$0xff] }
 0x14f   :  { %4269 = vmatpush1.bf16.msra.mxu0 %v4268_v49  ;;  %v705_v49 = vld [vmem:[#allocation5 + $0xf40] sm:$0xff] }
 0x150   :  { %4493 = vmatpush1.bf16.msra.mxu1 %v4492_v50  ;;  %4271 = vmatprep.subr.bf16.mxu0 %v4270_v51  ;;  %v699_v50 = vld [vmem:[#allocation5 + $0xf10] sm:$0xff]  ;;  %v4514_v51 = vpack.c.bf16 %v708_v44, %v700_v43  ;;  %v4292_v57 = vpack.c.bf16 %v705_v49, %v697_v48  ;;  %v4532_v44 = vpack.c.bf16 %v771_v38, %v763_v36  ;;  %v866_v36 = vld [vmem:[#allocation5 + $0x1448] sm:$0xff]  ;;  %v868_v38 = vld [vmem:[#allocation5 + $0x1458] sm:$0xff] }
 0x151   :  { %4495 = vmatprep.subr.bf16.mxu1 %v4494_v55  ;;  %v716_v55 = vld [vmem:[#allocation5 + $0xf98] sm:$0xff]  ;;  %v4516_v58 = vpack.c.bf16 %v707_v52, %v699_v50  ;;  %v779_v48 = vld [vmem:[#allocation5 + $0x1190] sm:$0xff]  ;;  %v4534_v49 = vpack.c.bf16 %v788_v42, %v780_v41  ;;  %v802_v52 = vld [vmem:[#allocation5 + $0x1248] sm:$0xff] }
 0x152   :  { %v787_v50 = vld [vmem:[#allocation5 + $0x11d0] sm:$0xff]  ;;  %v857_v42 = vld [vmem:[#allocation5 + $0x1400] sm:$0xff] }
 0x153   :  { %4273 = vmatpush1.bf16.msra.mxu0 %v4272_v61  ;;  %v721_v61 = vld [vmem:[#allocation5 + $0xfc0] sm:$0xff] }
 0x154   :  { %4497 = vmatpush1.bf16.msra.mxu1 %v4496_v62  ;;  %4275 = vmatprep.subr.bf16.mxu0 %v4274_v63  ;;  %v715_v62 = vld [vmem:[#allocation5 + $0xf90] sm:$0xff]  ;;  %v4518_v63 = vpack.c.bf16 %v724_v56, %v716_v55  ;;  %v4296_v5 = vpack.c.bf16 %v721_v61, %v713_v60  ;;  %v4536_v56 = vpack.c.bf16 %v787_v50, %v779_v48  ;;  %v882_v48 = vld [vmem:[#allocation5 + $0x14c8] sm:$0xff]  ;;  %v884_v50 = vld [vmem:[#allocation5 + $0x14d8] sm:$0xff] }
 0x155   :  { %4499 = vmatprep.subr.bf16.mxu1 %v4498_v3  ;;  %v732_v3 = vld [vmem:[#allocation5 + $0x1018] sm:$0xff]  ;;  %v4520_v6 = vpack.c.bf16 %v723_v0, %v715_v62  ;;  %v795_v60 = vld [vmem:[#allocation5 + $0x1210] sm:$0xff]  ;;  %v4538_v61 = vpack.c.bf16 %v804_v54, %v796_v53  ;;  %v818_v0 = vld [vmem:[#allocation5 + $0x12c8] sm:$0xff] }
 0x156   :  { %v803_v62 = vld [vmem:[#allocation5 + $0x1250] sm:$0xff]  ;;  %v873_v54 = vld [vmem:[#allocation5 + $0x1480] sm:$0xff] }
 0x157   :  { %4277 = vmatpush1.bf16.msra.mxu0 %v4276_v9  ;;  %v737_v9 = vld [vmem:[#allocation5 + $0x1040] sm:$0xff] }
 0x158   :  { %4501 = vmatpush1.bf16.msra.mxu1 %v4500_v10  ;;  %4279 = vmatprep.subr.bf16.mxu0 %v4278_v11  ;;  %v731_v10 = vld [vmem:[#allocation5 + $0x1010] sm:$0xff]  ;;  %v4522_v11 = vpack.c.bf16 %v740_v4, %v732_v3  ;;  %v4300_v18 = vpack.c.bf16 %v737_v9, %v729_v8  ;;  %v4540_v4 = vpack.c.bf16 %v803_v62, %v795_v60  ;;  %v898_v60 = vld [vmem:[#allocation5 + $0x1548] sm:$0xff]  ;;  %v900_v62 = vld [vmem:[#allocation5 + $0x1558] sm:$0xff] }
 0x159   :  { %4503 = vmatprep.subr.bf16.mxu1 %v4502_v15  ;;  %v748_v15 = vld [vmem:[#allocation5 + $0x1098] sm:$0xff]  ;;  %v4524_v19 = vpack.c.bf16 %v739_v12, %v731_v10  ;;  %v811_v8 = vld [vmem:[#allocation5 + $0x1290] sm:$0xff]  ;;  %v4542_v9 = vpack.c.bf16 %v820_v2, %v812_v1  ;;  %v834_v12 = vld [vmem:[#allocation5 + $0x1348] sm:$0xff] }
 0x15a   :  { %v4526_v24 = vpack.c.bf16 %v756_v16, %v748_v15  ;;  %v819_v10 = vld [vmem:[#allocation5 + $0x12d0] sm:$0xff]  ;;  %v889_v2 = vld [vmem:[#allocation5 + $0x1500] sm:$0xff] }
 0x15b   :  { %4281 = vmatpush1.bf16.msra.mxu0 %v4280_v21  ;;  %v745_v21 = vld [vmem:[#allocation5 + $0x1080] sm:$0xff]  ;;  %v4544_v16 = vpack.c.bf16 %v819_v10, %v811_v8  ;;  %v914_v8 = vld [vmem:[#allocation5 + $0x15c8] sm:$0xff]  ;;  %v916_v10 = vld [vmem:[#allocation5 + $0x15d8] sm:$0xff] }
 0x15c   :  { %4505 = vmatpush1.bf16.msra.mxu1 %v4504_v22  ;;  %4283 = vmatprep.subr.bf16.mxu0 %v4282_v23  ;;  %v753_v22 = vld [vmem:[#allocation5 + $0x10c0] sm:$0xff]  ;;  %v747_v23 = vld [vmem:[#allocation5 + $0x1090] sm:$0xff] }
 0x15d   :  { %4507 = vmatprep.subr.bf16.mxu1 %v4506_v27  ;;  %v770_v27 = vld [vmem:[#allocation5 + $0x1148] sm:$0xff]  ;;  %v4304_v31 = vpack.c.bf16 %v753_v22, %v745_v21  ;;  %v4528_v32 = vpack.c.bf16 %v755_v25, %v747_v23  ;;  %v4546_v21 = vpack.c.bf16 %v836_v14, %v828_v13  ;;  %v835_v22 = vld [vmem:[#allocation5 + $0x1350] sm:$0xff]  ;;  %v844_v25 = vld [vmem:[#allocation5 + $0x1398] sm:$0xff] }
 0x15e   :  { %v842_v23 = vld [vmem:[#allocation5 + $0x1388] sm:$0xff]  ;;  %v905_v14 = vld [vmem:[#allocation5 + $0x1580] sm:$0xff] }
 0x15f   :  { %4285 = vmatpush1.bf16.msra.mxu0 %v4284_v33  ;;  %v4306_v33 = vpack.c.bf16 %v770_v27, %v762_v26  ;;  %v852_v26 = vld [vmem:[#allocation5 + $0x13d8] sm:$0xff] }
 0x160   :  { %4509 = vmatpush1.bf16.msra.mxu1 %v4508_v34  ;;  %4287 = vmatprep.subr.bf16.mxu0 %v4286_v35  ;;  %v761_v34 = vld [vmem:[#allocation5 + $0x1100] sm:$0xff] }
 0x161   :  { %4511 = vmatprep.subr.bf16.mxu1 %v4510_v39  ;;  %v769_v35 = vld [vmem:[#allocation5 + $0x1140] sm:$0xff]  ;;  %v778_v39 = vld [vmem:[#allocation5 + $0x1188] sm:$0xff] }
 0x162   :  { %v4308_v43 = vpack.c.bf16 %v769_v35, %v761_v34  ;;  %v851_v34 = vld [vmem:[#allocation5 + $0x13d0] sm:$0xff]  ;;  %v858_v35 = vld [vmem:[#allocation5 + $0x1408] sm:$0xff] }
 0x163   :  { %4289 = vmatpush1.bf16.msra.mxu0 %v4288_v45  ;;  %v4310_v45 = vpack.c.bf16 %v786_v40, %v778_v39  ;;  %v4330_v41 = vpack.c.bf16 %v866_v36, %v858_v35 }
 0x164   :  { %4513 = vmatpush1.bf16.msra.mxu1 %v4512_v46  ;;  %4291 = vmatprep.subr.bf16.mxu0 %v4290_v47  ;;  %v777_v46 = vld [vmem:[#allocation5 + $0x1180] sm:$0xff] }
 0x165   :  { %4515 = vmatprep.subr.bf16.mxu1 %v4514_v51  ;;  %v785_v47 = vld [vmem:[#allocation5 + $0x11c0] sm:$0xff]  ;;  %v794_v51 = vld [vmem:[#allocation5 + $0x1208] sm:$0xff] }
 0x166   :  { %v4312_v55 = vpack.c.bf16 %v785_v47, %v777_v46  ;;  %v867_v46 = vld [vmem:[#allocation5 + $0x1450] sm:$0xff]  ;;  %v874_v47 = vld [vmem:[#allocation5 + $0x1488] sm:$0xff] }
 0x167   :  { %4293 = vmatpush1.bf16.msra.mxu0 %v4292_v57  ;;  %v4314_v57 = vpack.c.bf16 %v802_v52, %v794_v51  ;;  %v4334_v53 = vpack.c.bf16 %v882_v48, %v874_v47 }
 0x168   :  { %4517 = vmatpush1.bf16.msra.mxu1 %v4516_v58  ;;  %4295 = vmatprep.subr.bf16.mxu0 %v4294_v59  ;;  %v793_v58 = vld [vmem:[#allocation5 + $0x1200] sm:$0xff] }
 0x169   :  { %4519 = vmatprep.subr.bf16.mxu1 %v4518_v63  ;;  %v801_v59 = vld [vmem:[#allocation5 + $0x1240] sm:$0xff]  ;;  %v810_v63 = vld [vmem:[#allocation5 + $0x1288] sm:$0xff] }
 0x16a   :  { %v4316_v3 = vpack.c.bf16 %v801_v59, %v793_v58  ;;  %v883_v58 = vld [vmem:[#allocation5 + $0x14d0] sm:$0xff]  ;;  %v890_v59 = vld [vmem:[#allocation5 + $0x1508] sm:$0xff] }
 0x16b   :  { %4297 = vmatpush1.bf16.msra.mxu0 %v4296_v5  ;;  %v4318_v5 = vpack.c.bf16 %v818_v0, %v810_v63  ;;  %v4338_v1 = vpack.c.bf16 %v898_v60, %v890_v59 }
 0x16c   :  { %4521 = vmatpush1.bf16.msra.mxu1 %v4520_v6  ;;  %4299 = vmatprep.subr.bf16.mxu0 %v4298_v7  ;;  %v809_v6 = vld [vmem:[#allocation5 + $0x1280] sm:$0xff] }
 0x16d   :  { %4523 = vmatprep.subr.bf16.mxu1 %v4522_v11  ;;  %v817_v7 = vld [vmem:[#allocation5 + $0x12c0] sm:$0xff]  ;;  %v826_v11 = vld [vmem:[#allocation5 + $0x1308] sm:$0xff] }
 0x16e   :  { %1291 = vmatmul.mubr.f32.vlgmr.msra.gmra.mrb[0].mxu0 %v212_v17  ;;  %v4320_v15 = vpack.c.bf16 %v817_v7, %v809_v6  ;;  %v899_v6 = vld [vmem:[#allocation5 + $0x1550] sm:$0xff]  ;;  %v906_v7 = vld [vmem:[#allocation5 + $0x1588] sm:$0xff] }
 0x16f   :  { %4301 = vmatpush1.bf16.msra.mxu0 %v4300_v18  ;;  %1575 = vmatmul.mubr.f32.vlgmr.msra.gmra.mrb[0].mxu1 %v212_v17  ;;  %v4322_v17 = vpack.c.bf16 %v834_v12, %v826_v11  ;;  %v825_v18 = vld [vmem:[#allocation5 + $0x1300] sm:$0xff]  ;;  %v4342_v13 = vpack.c.bf16 %v914_v8, %v906_v7 }
 0x170   :  { %4525 = vmatpush1.bf16.msra.mxu1 %v4524_v19  ;;  %4303 = vmatprep.subr.bf16.mxu0 %v4302_v20  ;;  %v833_v19 = vld [vmem:[#allocation5 + $0x1340] sm:$0xff]  ;;  %v827_v20 = vld [vmem:[#allocation5 + $0x1310] sm:$0xff] }
 0x171   :  { %4527 = vmatprep.subr.bf16.mxu1 %v4526_v24  ;;  %1361 = vmatprep.mubr.f32.mxu0 %v215_v30  ;;  %v850_v24 = vld [vmem:[#allocation5 + $0x13c8] sm:$0xff]  ;;  %v4324_v27 = vpack.c.bf16 %v833_v19, %v825_v18  ;;  %v4548_v28 = vpack.c.bf16 %v835_v22, %v827_v20  ;;  %v915_v18 = vld [vmem:[#allocation5 + $0x15d0] sm:$0xff]  ;;  %v932_v22 = vld [vmem:[#allocation5 + $0x1658] sm:$0xff] }
 0x172   :  { %1645 = vmatprep.mubr.f32.mxu1 %v215_v30  ;;  %v4326_v29 = vpack.c.bf16 %v850_v24, %v842_v23  ;;  %v841_v30 = vld [vmem:[#allocation5 + $0x1380] sm:$0xff]  ;;  %v922_v19 = vld [vmem:[#allocation5 + $0x1608] sm:$0xff] }
 0x173   :  { %4305 = vmatpush1.bf16.msra.mxu0 %v4304_v31  ;;  %v849_v31 = vld [vmem:[#allocation5 + $0x13c0] sm:$0xff]  ;;  %v930_v20 = vld [vmem:[#allocation5 + $0x1648] sm:$0xff] }
 0x174   :  { %4529 = vmatpush1.bf16.msra.mxu1 %v4528_v32  ;;  %4307 = vmatprep.subr.bf16.mxu0 %v4306_v33  ;;  %v843_v32 = vld [vmem:[#allocation5 + $0x1390] sm:$0xff]  ;;  %v4550_v33 = vpack.c.bf16 %v852_v26, %v844_v25  ;;  %v4328_v39 = vpack.c.bf16 %v849_v31, %v841_v30  ;;  %v4346_v25 = vpack.c.bf16 %v930_v20, %v922_v19  ;;  %v921_v26 = vld [vmem:[#allocation5 + $0x1600] sm:$0xff]  ;;  %v938_v31 = vld [vmem:[#allocation5 + $0x1688] sm:$0xff] }
 0x175   :  { %4531 = vmatprep.subr.bf16.mxu1 %v4530_v37  ;;  %v860_v37 = vld [vmem:[#allocation5 + $0x1418] sm:$0xff]  ;;  %v4552_v40 = vpack.c.bf16 %v851_v34, %v843_v32  ;;  %v931_v30 = vld [vmem:[#allocation5 + $0x1650] sm:$0xff]  ;;  %v946_v32 = vld [vmem:[#allocation5 + $0x16c8] sm:$0xff] }
 0x176   :  { %v948_v34 = vld [vmem:[#allocation5 + $0x16d8] sm:$0xff]  ;;  %v214_v19 = vld [vmem:[#allocation2 + $0x20] sm:$0xff] }
 0x177   :  { %4309 = vmatpush1.bf16.msra.mxu0 %v4308_v43  ;;  %v865_v43 = vld [vmem:[#allocation5 + $0x1440] sm:$0xff] }
 0x178   :  { %4533 = vmatpush1.bf16.msra.mxu1 %v4532_v44  ;;  %4311 = vmatprep.subr.bf16.mxu0 %v4310_v45  ;;  %v859_v44 = vld [vmem:[#allocation5 + $0x1410] sm:$0xff]  ;;  %v4554_v45 = vpack.c.bf16 %v868_v38, %v860_v37  ;;  %v4332_v51 = vpack.c.bf16 %v865_v43, %v857_v42  ;;  %v4350_v37 = vpack.c.bf16 %v946_v32, %v938_v31  ;;  %v937_v38 = vld [vmem:[#allocation5 + $0x1680] sm:$0xff]  ;;  %v954_v43 = vld [vmem:[#allocation5 + $0x1708] sm:$0xff] }
 0x179   :  { %4535 = vmatprep.subr.bf16.mxu1 %v4534_v49  ;;  %v876_v49 = vld [vmem:[#allocation5 + $0x1498] sm:$0xff]  ;;  %v4556_v52 = vpack.c.bf16 %v867_v46, %v859_v44  ;;  %v947_v42 = vld [vmem:[#allocation5 + $0x16d0] sm:$0xff]  ;;  %v962_v44 = vld [vmem:[#allocation5 + $0x1748] sm:$0xff] }
 0x17a   :  { %v964_v46 = vld [vmem:[#allocation5 + $0x1758] sm:$0xff] }
 0x17b   :  { %4313 = vmatpush1.bf16.msra.mxu0 %v4312_v55  ;;  %v881_v55 = vld [vmem:[#allocation5 + $0x14c0] sm:$0xff]  ;;  %v1028_v31 = vld [vmem:[#allocation5 + $0x1958] sm:$0xff] }
 0x17c   :  { %4537 = vmatpush1.bf16.msra.mxu1 %v4536_v56  ;;  %4315 = vmatprep.subr.bf16.mxu0 %v4314_v57  ;;  %v875_v56 = vld [vmem:[#allocation5 + $0x1490] sm:$0xff]  ;;  %v4558_v57 = vpack.c.bf16 %v884_v50, %v876_v49  ;;  %v4336_v63 = vpack.c.bf16 %v881_v55, %v873_v54  ;;  %v4354_v49 = vpack.c.bf16 %v962_v44, %v954_v43  ;;  %v953_v50 = vld [vmem:[#allocation5 + $0x1700] sm:$0xff]  ;;  %v970_v55 = vld [vmem:[#allocation5 + $0x1788] sm:$0xff] }
 0x17d   :  { %4539 = vmatprep.subr.bf16.mxu1 %v4538_v61  ;;  %v892_v61 = vld [vmem:[#allocation5 + $0x1518] sm:$0xff]  ;;  %v4560_v0 = vpack.c.bf16 %v883_v58, %v875_v56  ;;  %v963_v54 = vld [vmem:[#allocation5 + $0x1750] sm:$0xff]  ;;  %v978_v56 = vld [vmem:[#allocation5 + $0x17c8] sm:$0xff] }
 0x17e   :  { %v980_v58 = vld [vmem:[#allocation5 + $0x17d8] sm:$0xff] }
 0x17f   :  { %4317 = vmatpush1.bf16.msra.mxu0 %v4316_v3  ;;  %v897_v3 = vld [vmem:[#allocation5 + $0x1540] sm:$0xff]  ;;  %v1036_v43 = vld [vmem:[#allocation5 + $0x1998] sm:$0xff] }
 0x180   :  { %4541 = vmatpush1.bf16.msra.mxu1 %v4540_v4  ;;  %4319 = vmatprep.subr.bf16.mxu0 %v4318_v5  ;;  %v891_v4 = vld [vmem:[#allocation5 + $0x1510] sm:$0xff]  ;;  %v4562_v5 = vpack.c.bf16 %v900_v62, %v892_v61  ;;  %v4340_v11 = vpack.c.bf16 %v897_v3, %v889_v2  ;;  %v4358_v61 = vpack.c.bf16 %v978_v56, %v970_v55  ;;  %v969_v62 = vld [vmem:[#allocation5 + $0x1780] sm:$0xff]  ;;  %v986_v3 = vld [vmem:[#allocation5 + $0x1808] sm:$0xff] }
 0x181   :  { %4543 = vmatprep.subr.bf16.mxu1 %v4542_v9  ;;  %v908_v9 = vld [vmem:[#allocation5 + $0x1598] sm:$0xff]  ;;  %v4564_v12 = vpack.c.bf16 %v899_v6, %v891_v4  ;;  %v979_v2 = vld [vmem:[#allocation5 + $0x17d0] sm:$0xff]  ;;  %v994_v4 = vld [vmem:[#allocation5 + $0x1848] sm:$0xff] }
 0x182   :  { %v996_v6 = vld [vmem:[#allocation5 + $0x1858] sm:$0xff] }
 0x183   :  { %4321 = vmatpush1.bf16.msra.mxu0 %v4320_v15  ;;  %v913_v15 = vld [vmem:[#allocation5 + $0x15c0] sm:$0xff]  ;;  %v1044_v44 = vld [vmem:[#allocation5 + $0x19d8] sm:$0xff] }
 0x184   :  { %4545 = vmatpush1.bf16.msra.mxu1 %v4544_v16  ;;  %4323 = vmatprep.subr.bf16.mxu0 %v4322_v17  ;;  %v907_v16 = vld [vmem:[#allocation5 + $0x1590] sm:$0xff]  ;;  %v4566_v17 = vpack.c.bf16 %v916_v10, %v908_v9  ;;  %v4344_v23 = vpack.c.bf16 %v913_v15, %v905_v14  ;;  %v4362_v9 = vpack.c.bf16 %v994_v4, %v986_v3  ;;  %v985_v10 = vld [vmem:[#allocation5 + $0x1800] sm:$0xff]  ;;  %v1002_v15 = vld [vmem:[#allocation5 + $0x1888] sm:$0xff] }
 0x185   :  { %4547 = vmatprep.subr.bf16.mxu1 %v4546_v21  ;;  %v924_v21 = vld [vmem:[#allocation5 + $0x1618] sm:$0xff]  ;;  %v4568_v24 = vpack.c.bf16 %v915_v18, %v907_v16  ;;  %v995_v14 = vld [vmem:[#allocation5 + $0x1850] sm:$0xff]  ;;  %v1010_v16 = vld [vmem:[#allocation5 + $0x18c8] sm:$0xff] }
 0x186   :  { %v1012_v18 = vld [vmem:[#allocation5 + $0x18d8] sm:$0xff] }
 0x187   :  { %4325 = vmatpush1.bf16.msra.mxu0 %v4324_v27  ;;  %v929_v27 = vld [vmem:[#allocation5 + $0x1640] sm:$0xff]  ;;  %v1052_v55 = vld [vmem:[#allocation5 + $0x1a18] sm:$0xff] }
 0x188   :  { %4549 = vmatpush1.bf16.msra.mxu1 %v4548_v28  ;;  %4327 = vmatprep.subr.bf16.mxu0 %v4326_v29  ;;  %v923_v28 = vld [vmem:[#allocation5 + $0x1610] sm:$0xff]  ;;  %v4570_v29 = vpack.c.bf16 %v932_v22, %v924_v21  ;;  %v4348_v35 = vpack.c.bf16 %v929_v27, %v921_v26  ;;  %v4366_v22 = vpack.c.bf16 %v1010_v16, %v1002_v15  ;;  %v1060_v56 = vld [vmem:[#allocation5 + $0x1a58] sm:$0xff] }
 0x189   :  { %4551 = vmatprep.subr.bf16.mxu1 %v4550_v33  ;;  %v940_v33 = vld [vmem:[#allocation5 + $0x1698] sm:$0xff]  ;;  %v4572_v36 = vpack.c.bf16 %v931_v30, %v923_v28  ;;  %v1011_v27 = vld [vmem:[#allocation5 + $0x18d0] sm:$0xff]  ;;  %v1018_v28 = vld [vmem:[#allocation5 + $0x1908] sm:$0xff] }
 0x18a   :  { %v1020_v30 = vld [vmem:[#allocation5 + $0x1918] sm:$0xff] }
 0x18b   :  { %4329 = vmatpush1.bf16.msra.mxu0 %v4328_v39  ;;  %v945_v39 = vld [vmem:[#allocation5 + $0x16c0] sm:$0xff]  ;;  %v1068_v3 = vld [vmem:[#allocation5 + $0x1a98] sm:$0xff] }
 0x18c   :  { %4553 = vmatpush1.bf16.msra.mxu1 %v4552_v40  ;;  %4331 = vmatprep.subr.bf16.mxu0 %v4330_v41  ;;  %v939_v40 = vld [vmem:[#allocation5 + $0x1690] sm:$0xff]  ;;  %v4574_v41 = vpack.c.bf16 %v948_v34, %v940_v33  ;;  %v4352_v47 = vpack.c.bf16 %v945_v39, %v937_v38  ;;  %v4594_v38 = vpack.c.bf16 %v1028_v31, %v1020_v30  ;;  %v1076_v4 = vld [vmem:[#allocation5 + $0x1ad8] sm:$0xff] }
 0x18d   :  { %4555 = vmatprep.subr.bf16.mxu1 %v4554_v45  ;;  %v956_v45 = vld [vmem:[#allocation5 + $0x1718] sm:$0xff]  ;;  %v4576_v48 = vpack.c.bf16 %v947_v42, %v939_v40  ;;  %v1027_v39 = vld [vmem:[#allocation5 + $0x1950] sm:$0xff]  ;;  %v1034_v40 = vld [vmem:[#allocation5 + $0x1988] sm:$0xff]  ;;  %v6320_v42 = vmov 0.0  }
 0x18e   :  { %v1084_v15 = vld [vmem:[#allocation5 + $0x1b18] sm:$0xff] }
 0x18f   :  { %4333 = vmatpush1.bf16.msra.mxu0 %v4332_v51  ;;  %v961_v51 = vld [vmem:[#allocation5 + $0x1740] sm:$0xff]  ;;  %v1092_v16 = vld [vmem:[#allocation5 + $0x1b58] sm:$0xff] }
 0x190   :  { %4557 = vmatpush1.bf16.msra.mxu1 %v4556_v52  ;;  %4335 = vmatprep.subr.bf16.mxu0 %v4334_v53  ;;  %v955_v52 = vld [vmem:[#allocation5 + $0x1710] sm:$0xff]  ;;  %v4578_v53 = vpack.c.bf16 %v964_v46, %v956_v45  ;;  %v4356_v59 = vpack.c.bf16 %v961_v51, %v953_v50  ;;  %v4598_v51 = vpack.c.bf16 %v1044_v44, %v1036_v43 }
 0x191   :  { %4559 = vmatprep.subr.bf16.mxu1 %v4558_v57  ;;  %v972_v57 = vld [vmem:[#allocation5 + $0x1798] sm:$0xff]  ;;  %v4580_v60 = vpack.c.bf16 %v963_v54, %v955_v52  ;;  %v1035_v50 = vld [vmem:[#allocation5 + $0x1990] sm:$0xff]  ;;  %v1058_v54 = vld [vmem:[#allocation5 + $0x1a48] sm:$0xff] }
 0x192   :  { %v1043_v52 = vld [vmem:[#allocation5 + $0x19d0] sm:$0xff] }
 0x193   :  { %4337 = vmatpush1.bf16.msra.mxu0 %v4336_v63  ;;  %v977_v63 = vld [vmem:[#allocation5 + $0x17c0] sm:$0xff] }
 0x194   :  { %4561 = vmatpush1.bf16.msra.mxu1 %v4560_v0  ;;  %4339 = vmatprep.subr.bf16.mxu0 %v4338_v1  ;;  %v971_v0 = vld [vmem:[#allocation5 + $0x1790] sm:$0xff]  ;;  %v4582_v1 = vpack.c.bf16 %v980_v58, %v972_v57  ;;  %v4360_v7 = vpack.c.bf16 %v977_v63, %v969_v62  ;;  %v4600_v58 = vpack.c.bf16 %v1043_v52, %v1035_v50  ;;  %v238_v50 = vld [vmem:[#allocation5 + $0xa8] sm:$0xff]  ;;  %v240_v52 = vld [vmem:[#allocation5 + $0xb8] sm:$0xff] }
 0x195   :  { %4563 = vmatprep.subr.bf16.mxu1 %v4562_v5  ;;  %v988_v5 = vld [vmem:[#allocation5 + $0x1818] sm:$0xff]  ;;  %v4584_v8 = vpack.c.bf16 %v979_v2, %v971_v0  ;;  %v1051_v62 = vld [vmem:[#allocation5 + $0x1a10] sm:$0xff]  ;;  %v4602_v63 = vpack.c.bf16 %v1060_v56, %v1052_v55  ;;  %v1074_v2 = vld [vmem:[#allocation5 + $0x1ac8] sm:$0xff] }
 0x196   :  { %v1059_v0 = vld [vmem:[#allocation5 + $0x1a50] sm:$0xff] }
 0x197   :  { %4341 = vmatpush1.bf16.msra.mxu0 %v4340_v11  ;;  %v993_v11 = vld [vmem:[#allocation5 + $0x1840] sm:$0xff] }
 0x198   :  { %4565 = vmatpush1.bf16.msra.mxu1 %v4564_v12  ;;  %4343 = vmatprep.subr.bf16.mxu0 %v4342_v13  ;;  %v987_v12 = vld [vmem:[#allocation5 + $0x1810] sm:$0xff]  ;;  %v4586_v13 = vpack.c.bf16 %v996_v6, %v988_v5  ;;  %v4364_v20 = vpack.c.bf16 %v993_v11, %v985_v10  ;;  %v4604_v6 = vpack.c.bf16 %v1059_v0, %v1051_v62  ;;  %v262_v0 = vld [vmem:[#allocation5 + $0x168] sm:$0xff] }
 0x199   :  { %4567 = vmatprep.subr.bf16.mxu1 %v4566_v17  ;;  %v1004_v17 = vld [vmem:[#allocation5 + $0x1898] sm:$0xff]  ;;  %v4588_v21 = vpack.c.bf16 %v995_v14, %v987_v12  ;;  %v1067_v10 = vld [vmem:[#allocation5 + $0x1a90] sm:$0xff]  ;;  %v4606_v11 = vpack.c.bf16 %v1076_v4, %v1068_v3  ;;  %v1090_v14 = vld [vmem:[#allocation5 + $0x1b48] sm:$0xff] }
 0x19a   :  { %v4590_v26 = vpack.c.bf16 %v1012_v18, %v1004_v17  ;;  %v1075_v12 = vld [vmem:[#allocation5 + $0x1ad0] sm:$0xff] }
 0x19b   :  { %4345 = vmatpush1.bf16.msra.mxu0 %v4344_v23  ;;  %v1001_v23 = vld [vmem:[#allocation5 + $0x1880] sm:$0xff]  ;;  %v4608_v18 = vpack.c.bf16 %v1075_v12, %v1067_v10  ;;  %v247_v62 = vld [vmem:[#allocation5 + $0xf0] sm:$0xff]  ;;  %v278_v12 = vld [vmem:[#allocation5 + $0x1e8] sm:$0xff] }
 0x19c   :  { %4569 = vmatpush1.bf16.msra.mxu1 %v4568_v24  ;;  %4347 = vmatprep.subr.bf16.mxu0 %v4346_v25  ;;  %v1009_v24 = vld [vmem:[#allocation5 + $0x18c0] sm:$0xff]  ;;  %v1003_v25 = vld [vmem:[#allocation5 + $0x1890] sm:$0xff] }
 0x19d   :  { %4571 = vmatprep.subr.bf16.mxu1 %v4570_v29  ;;  %v1026_v29 = vld [vmem:[#allocation5 + $0x1948] sm:$0xff]  ;;  %v4368_v32 = vpack.c.bf16 %v1009_v24, %v1001_v23  ;;  %v4592_v33 = vpack.c.bf16 %v1011_v27, %v1003_v25  ;;  %v4610_v23 = vpack.c.bf16 %v1092_v16, %v1084_v15  ;;  %v1091_v24 = vld [vmem:[#allocation5 + $0x1b50] sm:$0xff]  ;;  %v1100_v27 = vld [vmem:[#allocation5 + $0x1b98] sm:$0xff] }
 0x19e   :  { %v4370_v34 = vpack.c.bf16 %v1026_v29, %v1018_v28  ;;  %v1098_v25 = vld [vmem:[#allocation5 + $0x1b88] sm:$0xff]  ;;  %v1108_v28 = vld [vmem:[#allocation5 + $0x1bd8] sm:$0xff]  ;;  %v263_v10 = vld [vmem:[#allocation5 + $0x170] sm:$0xff] }
 0x19f   :  { %4349 = vmatpush1.bf16.msra.mxu0 %v4348_v35  ;;  %v1017_v35 = vld [vmem:[#allocation5 + $0x1900] sm:$0xff]  ;;  %v280_v15 = vld [vmem:[#allocation5 + $0x1f8] sm:$0xff] }
 0x1a0   :  { %4573 = vmatpush1.bf16.msra.mxu1 %v4572_v36  ;;  %4351 = vmatprep.subr.bf16.mxu0 %v4350_v37  ;;  %v1025_v36 = vld [vmem:[#allocation5 + $0x1940] sm:$0xff]  ;;  %v1019_v37 = vld [vmem:[#allocation5 + $0x1910] sm:$0xff] }
 0x1a1   :  { %4575 = vmatprep.subr.bf16.mxu1 %v4574_v41  ;;  %v1042_v41 = vld [vmem:[#allocation5 + $0x19c8] sm:$0xff]  ;;  %v4372_v45 = vpack.c.bf16 %v1025_v36, %v1017_v35  ;;  %v4596_v46 = vpack.c.bf16 %v1027_v39, %v1019_v37  ;;  %v4614_v35 = vpack.c.bf16 %v1108_v28, %v1100_v27  ;;  %v1107_v36 = vld [vmem:[#allocation5 + $0x1bd0] sm:$0xff]  ;;  %v224_v39 = vld [vmem:[#allocation5 + $0x38] sm:$0xff] }
 0x1a2   :  { %v222_v37 = vld [vmem:[#allocation5 + $0x28] sm:$0xff]  ;;  %v296_v27 = vld [vmem:[#allocation5 + $0x278] sm:$0xff] }
 0x1a3   :  { %4353 = vmatpush1.bf16.msra.mxu0 %v4352_v47  ;;  %v4374_v47 = vpack.c.bf16 %v1042_v41, %v1034_v40  ;;  %v232_v40 = vld [vmem:[#allocation5 + $0x78] sm:$0xff] }
 0x1a4   :  { %4577 = vmatpush1.bf16.msra.mxu1 %v4576_v48  ;;  %4355 = vmatprep.subr.bf16.mxu0 %v4354_v49  ;;  %v1033_v48 = vld [vmem:[#allocation5 + $0x1980] sm:$0xff] }
 0x1a5   :  { %4579 = vmatprep.subr.bf16.mxu1 %v4578_v53  ;;  %v1041_v49 = vld [vmem:[#allocation5 + $0x19c0] sm:$0xff]  ;;  %v1050_v53 = vld [vmem:[#allocation5 + $0x1a08] sm:$0xff] }
 0x1a6   :  { %v4376_v57 = vpack.c.bf16 %v1041_v49, %v1033_v48  ;;  %v4842_v48 = vpack.c.bf16 %v232_v40, %v224_v39  ;;  %v231_v49 = vld [vmem:[#allocation5 + $0x70] sm:$0xff]  ;;  %v312_v39 = vld [vmem:[#allocation5 + $0x2f8] sm:$0xff] }
 0x1a7   :  { %4357 = vmatpush1.bf16.msra.mxu0 %v4356_v59  ;;  %v4378_v59 = vpack.c.bf16 %v1058_v54, %v1050_v53  ;;  %v248_v53 = vld [vmem:[#allocation5 + $0xf8] sm:$0xff] }
 0x1a8   :  { %4581 = vmatpush1.bf16.msra.mxu1 %v4580_v60  ;;  %4359 = vmatprep.subr.bf16.mxu0 %v4358_v61  ;;  %v1049_v60 = vld [vmem:[#allocation5 + $0x1a00] sm:$0xff]  ;;  %v216_v54 = vld [vmem:[#allocation2 + $0x30] sm:$0xff] }
 0x1a9   :  { %4583 = vmatprep.subr.bf16.mxu1 %v4582_v1  ;;  %v1057_v61 = vld [vmem:[#allocation5 + $0x1a40] sm:$0xff]  ;;  %v1066_v1 = vld [vmem:[#allocation5 + $0x1a88] sm:$0xff] }
 0x1aa   :  { %v4380_v5 = vpack.c.bf16 %v1057_v61, %v1049_v60  ;;  %v239_v60 = vld [vmem:[#allocation5 + $0xb0] sm:$0xff]  ;;  %v4846_v61 = vpack.c.bf16 %v248_v53, %v240_v52  ;;  %v328_v52 = vld [vmem:[#allocation5 + $0x378] sm:$0xff] }
 0x1ab   :  { %4361 = vmatpush1.bf16.msra.mxu0 %v4360_v7  ;;  %v4382_v7 = vpack.c.bf16 %v1074_v2, %v1066_v1  ;;  %v256_v1 = vld [vmem:[#allocation5 + $0x138] sm:$0xff]  ;;  %v4848_v4 = vpack.c.bf16 %v247_v62, %v239_v60  ;;  %v327_v60 = vld [vmem:[#allocation5 + $0x370] sm:$0xff]  ;;  %v342_v62 = vld [vmem:[#allocation5 + $0x3e8] sm:$0xff] }
 0x1ac   :  { %4585 = vmatpush1.bf16.msra.mxu1 %v4584_v8  ;;  %4363 = vmatprep.subr.bf16.mxu0 %v4362_v9  ;;  %v1065_v8 = vld [vmem:[#allocation5 + $0x1a80] sm:$0xff]  ;;  %v264_v2 = vld [vmem:[#allocation5 + $0x178] sm:$0xff] }
 0x1ad   :  { %4587 = vmatprep.subr.bf16.mxu1 %v4586_v13  ;;  %v1073_v9 = vld [vmem:[#allocation5 + $0x1ac0] sm:$0xff]  ;;  %v1082_v13 = vld [vmem:[#allocation5 + $0x1b08] sm:$0xff] }
 0x1ae   :  { %1362 = vmatmul.mubr.f32.vlgmr.msra.gmra.mrb[0].mxu0 %v214_v19  ;;  %v4384_v17 = vpack.c.bf16 %v1073_v9, %v1065_v8  ;;  %v255_v8 = vld [vmem:[#allocation5 + $0x130] sm:$0xff]  ;;  %v4850_v9 = vpack.c.bf16 %v264_v2, %v256_v1 }
 0x1af   :  { %4365 = vmatpush1.bf16.msra.mxu0 %v4364_v20  ;;  %1646 = vmatmul.mubr.f32.vlgmr.msra.gmra.mrb[0].mxu1 %v214_v19  ;;  %v4386_v19 = vpack.c.bf16 %v1090_v14, %v1082_v13  ;;  %v1081_v20 = vld [vmem:[#allocation5 + $0x1b00] sm:$0xff]  ;;  %v5942_v13 = vld [vmem:[#allocation2 + $0x8] sm:$0xff]  ;;  %v272_v14 = vld [vmem:[#allocation5 + $0x1b8] sm:$0xff] }
 0x1b0   :  { %4589 = vmatpush1.bf16.msra.mxu1 %v4588_v21  ;;  %4367 = vmatprep.subr.bf16.mxu0 %v4366_v22  ;;  %v1089_v21 = vld [vmem:[#allocation5 + $0x1b40] sm:$0xff]  ;;  %v1083_v22 = vld [vmem:[#allocation5 + $0x1b10] sm:$0xff] }
 0x1b1   :  { %4591 = vmatprep.subr.bf16.mxu1 %v4590_v26  ;;  %1432 = vmatprep.mubr.f32.mxu0 %v6320_v42  ;;  %v1106_v26 = vld [vmem:[#allocation5 + $0x1bc8] sm:$0xff]  ;;  %v4388_v29 = vpack.c.bf16 %v1089_v21, %v1081_v20  ;;  %v4612_v30 = vpack.c.bf16 %v1091_v24, %v1083_v22  ;;  %v277_v20 = vld [vmem:[#allocation5 + $0x1e0] sm:$0xff]  ;;  %v271_v21 = vld [vmem:[#allocation5 + $0x1b0] sm:$0xff]  ;;  %v4854_v22 = vpack.c.bf16 %v280_v15, %v272_v14 }
 0x1b2   :  { %1716 = vmatprep.mubr.f32.mxu1 %v6320_v42  ;;  %v4390_v31 = vpack.c.bf16 %v1106_v26, %v1098_v25  ;;  %v286_v24 = vld [vmem:[#allocation5 + $0x228] sm:$0xff]  ;;  %v288_v26 = vld [vmem:[#allocation5 + $0x238] sm:$0xff] }
 0x1b3   :  { %4369 = vmatpush1.bf16.msra.mxu0 %v4368_v32  ;;  %v1097_v32 = vld [vmem:[#allocation5 + $0x1b80] sm:$0xff]  ;;  %v294_v25 = vld [vmem:[#allocation5 + $0x268] sm:$0xff] }
 0x1b4   :  { %4593 = vmatpush1.bf16.msra.mxu1 %v4592_v33  ;;  %4371 = vmatprep.subr.bf16.mxu0 %v4370_v34  ;;  %v1105_v33 = vld [vmem:[#allocation5 + $0x1bc0] sm:$0xff]  ;;  %v1099_v34 = vld [vmem:[#allocation5 + $0x1b90] sm:$0xff] }
 0x1b5   :  { %4595 = vmatprep.subr.bf16.mxu1 %v4594_v38  ;;  %v230_v38 = vld [vmem:[#allocation5 + $0x68] sm:$0xff]  ;;  %v4392_v41 = vpack.c.bf16 %v1105_v33, %v1097_v32  ;;  %v4616_v43 = vpack.c.bf16 %v1107_v36, %v1099_v34  ;;  %v293_v32 = vld [vmem:[#allocation5 + $0x260] sm:$0xff]  ;;  %v287_v33 = vld [vmem:[#allocation5 + $0x230] sm:$0xff]  ;;  %v4858_v34 = vpack.c.bf16 %v296_v27, %v288_v26 }
 0x1b6   :  { %v4618_v44 = vpack.c.bf16 %v230_v38, %v222_v37  ;;  %v302_v36 = vld [vmem:[#allocation5 + $0x2a8] sm:$0xff]  ;;  %v304_v38 = vld [vmem:[#allocation5 + $0x2b8] sm:$0xff] }
 0x1b7   :  { %4373 = vmatpush1.bf16.msra.mxu0 %v4372_v45  ;;  %v221_v45 = vld [vmem:[#allocation5 + $0x20] sm:$0xff]  ;;  %v310_v37 = vld [vmem:[#allocation5 + $0x2e8] sm:$0xff] }
 0x1b8   :  { %4597 = vmatpush1.bf16.msra.mxu1 %v4596_v46  ;;  %4375 = vmatprep.subr.bf16.mxu0 %v4374_v47  ;;  %v229_v46 = vld [vmem:[#allocation5 + $0x60] sm:$0xff]  ;;  %v223_v47 = vld [vmem:[#allocation5 + $0x30] sm:$0xff] }
 0x1b9   :  { %4599 = vmatprep.subr.bf16.mxu1 %v4598_v51  ;;  %v246_v51 = vld [vmem:[#allocation5 + $0xe8] sm:$0xff]  ;;  %v4620_v55 = vpack.c.bf16 %v229_v46, %v221_v45  ;;  %v4844_v56 = vpack.c.bf16 %v231_v49, %v223_v47  ;;  %v309_v45 = vld [vmem:[#allocation5 + $0x2e0] sm:$0xff]  ;;  %v303_v46 = vld [vmem:[#allocation5 + $0x2b0] sm:$0xff]  ;;  %v4862_v47 = vpack.c.bf16 %v312_v39, %v304_v38 }
 0x1ba   :  { %v318_v49 = vld [vmem:[#allocation5 + $0x328] sm:$0xff] }
 0x1bb   :  { %4377 = vmatpush1.bf16.msra.mxu0 %v4376_v57  ;;  %v4622_v57 = vpack.c.bf16 %v246_v51, %v238_v50  ;;  %v326_v50 = vld [vmem:[#allocation5 + $0x368] sm:$0xff]  ;;  %v320_v51 = vld [vmem:[#allocation5 + $0x338] sm:$0xff] }
 0x1bc   :  { %4601 = vmatpush1.bf16.msra.mxu1 %v4600_v58  ;;  %4379 = vmatprep.subr.bf16.mxu0 %v4378_v59  ;;  %v237_v58 = vld [vmem:[#allocation5 + $0xa0] sm:$0xff] }
 0x1bd   :  { %4603 = vmatprep.subr.bf16.mxu1 %v4602_v63  ;;  %v245_v59 = vld [vmem:[#allocation5 + $0xe0] sm:$0xff]  ;;  %v254_v63 = vld [vmem:[#allocation5 + $0x128] sm:$0xff] }
 0x1be   :  { %v4624_v3 = vpack.c.bf16 %v245_v59, %v237_v58  ;;  %v319_v58 = vld [vmem:[#allocation5 + $0x330] sm:$0xff]  ;;  %v4866_v59 = vpack.c.bf16 %v328_v52, %v320_v51 }
 0x1bf   :  { %4381 = vmatpush1.bf16.msra.mxu0 %v4380_v5  ;;  %v4626_v5 = vpack.c.bf16 %v262_v0, %v254_v63  ;;  %v336_v63 = vld [vmem:[#allocation5 + $0x3b8] sm:$0xff]  ;;  %v4868_v2 = vpack.c.bf16 %v327_v60, %v319_v58  ;;  %v414_v58 = vld [vmem:[#allocation5 + $0x628] sm:$0xff] }
 0x1c0   :  { %4605 = vmatpush1.bf16.msra.mxu1 %v4604_v6  ;;  %4383 = vmatprep.subr.bf16.mxu0 %v4382_v7  ;;  %v253_v6 = vld [vmem:[#allocation5 + $0x120] sm:$0xff]  ;;  %v344_v0 = vld [vmem:[#allocation5 + $0x3f8] sm:$0xff] }
 0x1c1   :  { %4607 = vmatprep.subr.bf16.mxu1 %v4606_v11  ;;  %v261_v7 = vld [vmem:[#allocation5 + $0x160] sm:$0xff]  ;;  %v270_v11 = vld [vmem:[#allocation5 + $0x1a8] sm:$0xff]  ;;  %v416_v60 = vld [vmem:[#allocation5 + $0x638] sm:$0xff] }
 0x1c2   :  { %v4628_v16 = vpack.c.bf16 %v261_v7, %v253_v6  ;;  %v335_v6 = vld [vmem:[#allocation5 + $0x3b0] sm:$0xff]  ;;  %v4870_v7 = vpack.c.bf16 %v344_v0, %v336_v63 }
 0x1c3   :  { %4385 = vmatpush1.bf16.msra.mxu0 %v4384_v17  ;;  %v4852_v17 = vpack.c.bf16 %v263_v10, %v255_v8  ;;  %v343_v8 = vld [vmem:[#allocation5 + $0x3f0] sm:$0xff]  ;;  %v358_v10 = vld [vmem:[#allocation5 + $0x468] sm:$0xff] }
 0x1c4   :  { %4609 = vmatpush1.bf16.msra.mxu1 %v4608_v18  ;;  %4387 = vmatprep.subr.bf16.mxu0 %v4386_v19  ;;  %v4630_v18 = vpack.c.bf16 %v278_v12, %v270_v11  ;;  %v269_v19 = vld [vmem:[#allocation5 + $0x1a0] sm:$0xff]  ;;  %v352_v11 = vld [vmem:[#allocation5 + $0x438] sm:$0xff]  ;;  %v4872_v14 = vpack.c.bf16 %v343_v8, %v335_v6  ;;  %v430_v6 = vld [vmem:[#allocation5 + $0x6a8] sm:$0xff] }
 0x1c5   :  { %4611 = vmatprep.subr.bf16.mxu1 %v4610_v23  ;;  %v279_v23 = vld [vmem:[#allocation5 + $0x1f0] sm:$0xff]  ;;  %v4632_v28 = vpack.c.bf16 %v277_v20, %v269_v19  ;;  %v360_v12 = vld [vmem:[#allocation5 + $0x478] sm:$0xff] }
 0x1c6   :  { %v4874_v19 = vpack.c.bf16 %v360_v12, %v352_v11  ;;  %v359_v20 = vld [vmem:[#allocation5 + $0x470] sm:$0xff]  ;;  %v432_v8 = vld [vmem:[#allocation5 + $0x6b8] sm:$0xff] }
 0x1c7   :  { %4389 = vmatpush1.bf16.msra.mxu0 %v4388_v29  ;;  %v4856_v29 = vpack.c.bf16 %v279_v23, %v271_v21  ;;  %v366_v21 = vld [vmem:[#allocation5 + $0x4a8] sm:$0xff]  ;;  %v368_v23 = vld [vmem:[#allocation5 + $0x4b8] sm:$0xff] }
 0x1c8   :  { %4613 = vmatpush1.bf16.msra.mxu1 %v4612_v30  ;;  %4391 = vmatprep.subr.bf16.mxu0 %v4390_v31  ;;  %v4634_v30 = vpack.c.bf16 %v294_v25, %v286_v24  ;;  %v285_v31 = vld [vmem:[#allocation5 + $0x220] sm:$0xff]  ;;  %v376_v24 = vld [vmem:[#allocation5 + $0x4f8] sm:$0xff] }
 0x1c9   :  { %4615 = vmatprep.subr.bf16.mxu1 %v4614_v35  ;;  %v295_v35 = vld [vmem:[#allocation5 + $0x270] sm:$0xff]  ;;  %v4636_v40 = vpack.c.bf16 %v293_v32, %v285_v31  ;;  %v4878_v31 = vpack.c.bf16 %v376_v24, %v368_v23 }
 0x1ca   :  { %v375_v32 = vld [vmem:[#allocation5 + $0x4f0] sm:$0xff] }
 0x1cb   :  { %4393 = vmatpush1.bf16.msra.mxu0 %v4392_v41  ;;  %v4860_v41 = vpack.c.bf16 %v295_v35, %v287_v33  ;;  %v382_v33 = vld [vmem:[#allocation5 + $0x528] sm:$0xff]  ;;  %v384_v35 = vld [vmem:[#allocation5 + $0x538] sm:$0xff] }
 0x1cc   :  { %4617 = vmatpush1.bf16.msra.mxu1 %v4616_v43  ;;  %4619 = vmatprep.subr.bf16.mxu0 %v4618_v44  ;;  %v4638_v43 = vpack.c.bf16 %v310_v37, %v302_v36  ;;  %v301_v44 = vld [vmem:[#allocation5 + $0x2a0] sm:$0xff]  ;;  %v392_v36 = vld [vmem:[#allocation5 + $0x578] sm:$0xff] }
 0x1cd   :  { %4843 = vmatprep.subr.bf16.mxu1 %v4842_v48  ;;  %v311_v48 = vld [vmem:[#allocation5 + $0x2f0] sm:$0xff]  ;;  %v4640_v53 = vpack.c.bf16 %v309_v45, %v301_v44  ;;  %v4882_v44 = vpack.c.bf16 %v392_v36, %v384_v35 }
 0x1ce   :  { %1433 = vmatmul.mubr.f32.vlgmr.msra.gmra.mrb[0].mxu0 %v216_v54  ;;  %v391_v45 = vld [vmem:[#allocation5 + $0x570] sm:$0xff] }
 0x1cf   :  { %1717 = vmatmul.mubr.f32.vlgmr.msra.gmra.mrb[0].mxu1 %v216_v54  ;;  %4621 = vmatpush1.bf16.msra.mxu0 %v4620_v55  ;;  %v4864_v54 = vpack.c.bf16 %v311_v48, %v303_v46  ;;  %v4642_v55 = vpack.c.bf16 %v326_v50, %v318_v49  ;;  %v398_v46 = vld [vmem:[#allocation5 + $0x5a8] sm:$0xff]  ;;  %v400_v48 = vld [vmem:[#allocation5 + $0x5b8] sm:$0xff] }
 0x1d0   :  { %4845 = vmatpush1.bf16.msra.mxu1 %v4844_v56  ;;  %4623 = vmatprep.subr.bf16.mxu0 %v4622_v57  ;;  %v317_v56 = vld [vmem:[#allocation5 + $0x320] sm:$0xff]  ;;  %v408_v49 = vld [vmem:[#allocation5 + $0x5f8] sm:$0xff] }
 0x1d1   :  { %4847 = vmatprep.subr.bf16.mxu1 %v4846_v61  ;;  %1787 = vmatprep.mubr.f32.mxu0 %v5942_v13  ;;  %v325_v57 = vld [vmem:[#allocation5 + $0x360] sm:$0xff]  ;;  %v334_v61 = vld [vmem:[#allocation5 + $0x3a8] sm:$0xff] }
 0x1d2   :  { %2071 = vmatprep.mubr.f32.mxu1 %v5942_v13  ;;  %v4644_v1 = vpack.c.bf16 %v325_v57, %v317_v56  ;;  %v4886_v56 = vpack.c.bf16 %v408_v49, %v400_v48  ;;  %v407_v57 = vld [vmem:[#allocation5 + $0x5f0] sm:$0xff] }
 0x1d3   :  { %4625 = vmatpush1.bf16.msra.mxu0 %v4624_v3  ;;  %v4646_v3 = vpack.c.bf16 %v342_v62, %v334_v61  ;;  %v424_v61 = vld [vmem:[#allocation5 + $0x678] sm:$0xff] }
 0x1d4   :  { %4849 = vmatpush1.bf16.msra.mxu1 %v4848_v4  ;;  %4627 = vmatprep.subr.bf16.mxu0 %v4626_v5  ;;  %v333_v4 = vld [vmem:[#allocation5 + $0x3a0] sm:$0xff] }
 0x1d5   :  { %4851 = vmatprep.subr.bf16.mxu1 %v4850_v9  ;;  %v341_v5 = vld [vmem:[#allocation5 + $0x3e0] sm:$0xff]  ;;  %v350_v9 = vld [vmem:[#allocation5 + $0x428] sm:$0xff] }
 0x1d6   :  { %v4648_v13 = vpack.c.bf16 %v341_v5, %v333_v4  ;;  %v4650_v15 = vpack.c.bf16 %v358_v10, %v350_v9  ;;  %v4890_v4 = vpack.c.bf16 %v424_v61, %v416_v60  ;;  %v423_v5 = vld [vmem:[#allocation5 + $0x670] sm:$0xff]  ;;  %v440_v9 = vld [vmem:[#allocation5 + $0x6f8] sm:$0xff] }
 0x1d7   :  { %4629 = vmatpush1.bf16.msra.mxu0 %v4628_v16  ;;  %v349_v16 = vld [vmem:[#allocation5 + $0x420] sm:$0xff] }
 0x1d8   :  { %4853 = vmatpush1.bf16.msra.mxu1 %v4852_v17  ;;  %4631 = vmatprep.subr.bf16.mxu0 %v4630_v18  ;;  %v357_v17 = vld [vmem:[#allocation5 + $0x460] sm:$0xff]  ;;  %v351_v18 = vld [vmem:[#allocation5 + $0x430] sm:$0xff] }
 0x1d9   :  { %4855 = vmatprep.subr.bf16.mxu1 %v4854_v22  ;;  %v374_v22 = vld [vmem:[#allocation5 + $0x4e8] sm:$0xff]  ;;  %v4652_v25 = vpack.c.bf16 %v357_v17, %v349_v16  ;;  %v4876_v26 = vpack.c.bf16 %v359_v20, %v351_v18  ;;  %v4894_v16 = vpack.c.bf16 %v440_v9, %v432_v8  ;;  %v439_v17 = vld [vmem:[#allocation5 + $0x6f0] sm:$0xff]  ;;  %v448_v20 = vld [vmem:[#allocation5 + $0x738] sm:$0xff] }
 0x1da   :  { %v4654_v27 = vpack.c.bf16 %v374_v22, %v366_v21  ;;  %v446_v18 = vld [vmem:[#allocation5 + $0x728] sm:$0xff]  ;;  %v456_v21 = vld [vmem:[#allocation5 + $0x778] sm:$0xff] }
 0x1db   :  { %4633 = vmatpush1.bf16.msra.mxu0 %v4632_v28  ;;  %v365_v28 = vld [vmem:[#allocation5 + $0x4a0] sm:$0xff] }
 0x1dc   :  { %4857 = vmatpush1.bf16.msra.mxu1 %v4856_v29  ;;  %4635 = vmatprep.subr.bf16.mxu0 %v4634_v30  ;;  %v373_v29 = vld [vmem:[#allocation5 + $0x4e0] sm:$0xff]  ;;  %v367_v30 = vld [vmem:[#allocation5 + $0x4b0] sm:$0xff] }
 0x1dd   :  { %4859 = vmatprep.subr.bf16.mxu1 %v4858_v34  ;;  %v390_v34 = vld [vmem:[#allocation5 + $0x568] sm:$0xff]  ;;  %v4656_v37 = vpack.c.bf16 %v373_v29, %v365_v28  ;;  %v4880_v38 = vpack.c.bf16 %v375_v32, %v367_v30  ;;  %v4898_v28 = vpack.c.bf16 %v456_v21, %v448_v20  ;;  %v455_v29 = vld [vmem:[#allocation5 + $0x770] sm:$0xff]  ;;  %v464_v32 = vld [vmem:[#allocation5 + $0x7b8] sm:$0xff] }
 0x1de   :  { %v4658_v39 = vpack.c.bf16 %v390_v34, %v382_v33  ;;  %v462_v30 = vld [vmem:[#allocation5 + $0x7a8] sm:$0xff]  ;;  %v472_v33 = vld [vmem:[#allocation5 + $0x7f8] sm:$0xff] }
 0x1df   :  { %4637 = vmatpush1.bf16.msra.mxu0 %v4636_v40  ;;  %v381_v40 = vld [vmem:[#allocation5 + $0x520] sm:$0xff]  ;;  %v536_v20 = vld [vmem:[#allocation5 + $0x9f8] sm:$0xff] }
 0x1e0   :  { %4861 = vmatpush1.bf16.msra.mxu1 %v4860_v41  ;;  %4639 = vmatprep.subr.bf16.mxu0 %v4638_v43  ;;  %v389_v41 = vld [vmem:[#allocation5 + $0x560] sm:$0xff]  ;;  %v383_v43 = vld [vmem:[#allocation5 + $0x530] sm:$0xff] }
 0x1e1   :  { %4863 = vmatprep.subr.bf16.mxu1 %v4862_v47  ;;  %v406_v47 = vld [vmem:[#allocation5 + $0x5e8] sm:$0xff]  ;;  %v4660_v50 = vpack.c.bf16 %v389_v41, %v381_v40  ;;  %v4884_v51 = vpack.c.bf16 %v391_v45, %v383_v43  ;;  %v4902_v40 = vpack.c.bf16 %v472_v33, %v464_v32  ;;  %v471_v41 = vld [vmem:[#allocation5 + $0x7f0] sm:$0xff]  ;;  %v480_v45 = vld [vmem:[#allocation5 + $0x838] sm:$0xff] }
 0x1e2   :  { %v4662_v52 = vpack.c.bf16 %v406_v47, %v398_v46  ;;  %v478_v43 = vld [vmem:[#allocation5 + $0x828] sm:$0xff]  ;;  %v488_v46 = vld [vmem:[#allocation5 + $0x878] sm:$0xff] }
 0x1e3   :  { %4641 = vmatpush1.bf16.msra.mxu0 %v4640_v53  ;;  %v397_v53 = vld [vmem:[#allocation5 + $0x5a0] sm:$0xff]  ;;  %v552_v32 = vld [vmem:[#allocation5 + $0xa78] sm:$0xff] }
 0x1e4   :  { %4865 = vmatpush1.bf16.msra.mxu1 %v4864_v54  ;;  %4643 = vmatprep.subr.bf16.mxu0 %v4642_v55  ;;  %v405_v54 = vld [vmem:[#allocation5 + $0x5e0] sm:$0xff]  ;;  %v399_v55 = vld [vmem:[#allocation5 + $0x5b0] sm:$0xff] }
 0x1e5   :  { %4867 = vmatprep.subr.bf16.mxu1 %v4866_v59  ;;  %v422_v59 = vld [vmem:[#allocation5 + $0x668] sm:$0xff]  ;;  %v4664_v62 = vpack.c.bf16 %v405_v54, %v397_v53  ;;  %v4888_v63 = vpack.c.bf16 %v407_v57, %v399_v55  ;;  %v4906_v53 = vpack.c.bf16 %v488_v46, %v480_v45  ;;  %v487_v54 = vld [vmem:[#allocation5 + $0x870] sm:$0xff]  ;;  %v496_v57 = vld [vmem:[#allocation5 + $0x8b8] sm:$0xff] }
 0x1e6   :  { %v4666_v0 = vpack.c.bf16 %v422_v59, %v414_v58  ;;  %v494_v55 = vld [vmem:[#allocation5 + $0x8a8] sm:$0xff]  ;;  %v504_v58 = vld [vmem:[#allocation5 + $0x8f8] sm:$0xff] }
 0x1e7   :  { %4645 = vmatpush1.bf16.msra.mxu0 %v4644_v1  ;;  %v413_v1 = vld [vmem:[#allocation5 + $0x620] sm:$0xff]  ;;  %v568_v45 = vld [vmem:[#allocation5 + $0xaf8] sm:$0xff] }
 0x1e8   :  { %4869 = vmatpush1.bf16.msra.mxu1 %v4868_v2  ;;  %4647 = vmatprep.subr.bf16.mxu0 %v4646_v3  ;;  %v421_v2 = vld [vmem:[#allocation5 + $0x660] sm:$0xff]  ;;  %v415_v3 = vld [vmem:[#allocation5 + $0x630] sm:$0xff] }
 0x1e9   :  { %4871 = vmatprep.subr.bf16.mxu1 %v4870_v7  ;;  %v438_v7 = vld [vmem:[#allocation5 + $0x6e8] sm:$0xff]  ;;  %v4668_v10 = vpack.c.bf16 %v421_v2, %v413_v1  ;;  %v4892_v11 = vpack.c.bf16 %v423_v5, %v415_v3  ;;  %v4910_v1 = vpack.c.bf16 %v504_v58, %v496_v57  ;;  %v503_v2 = vld [vmem:[#allocation5 + $0x8f0] sm:$0xff]  ;;  %v584_v57 = vld [vmem:[#allocation5 + $0xb78] sm:$0xff] }
 0x1ea   :  { %v4670_v12 = vpack.c.bf16 %v438_v7, %v430_v6  ;;  %v510_v3 = vld [vmem:[#allocation5 + $0x928] sm:$0xff]  ;;  %v512_v6 = vld [vmem:[#allocation5 + $0x938] sm:$0xff] }
 0x1eb   :  { %4649 = vmatpush1.bf16.msra.mxu0 %v4648_v13  ;;  %v429_v13 = vld [vmem:[#allocation5 + $0x6a0] sm:$0xff]  ;;  %v5943_v5 = vld [vmem:[#allocation2] sm:$0xff]  ;;  %v520_v7 = vld [vmem:[#allocation5 + $0x978] sm:$0xff] }
 0x1ec   :  { %4873 = vmatpush1.bf16.msra.mxu1 %v4872_v14  ;;  %4651 = vmatprep.subr.bf16.mxu0 %v4650_v15  ;;  %v437_v14 = vld [vmem:[#allocation5 + $0x6e0] sm:$0xff]  ;;  %v431_v15 = vld [vmem:[#allocation5 + $0x6b0] sm:$0xff] }
 0x1ed   :  { %4875 = vmatprep.subr.bf16.mxu1 %v4874_v19  ;;  %v454_v19 = vld [vmem:[#allocation5 + $0x768] sm:$0xff]  ;;  %v4672_v22 = vpack.c.bf16 %v437_v14, %v429_v13  ;;  %v4896_v23 = vpack.c.bf16 %v439_v17, %v431_v15  ;;  %v511_v13 = vld [vmem:[#allocation5 + $0x930] sm:$0xff]  ;;  %v4914_v14 = vpack.c.bf16 %v520_v7, %v512_v6 }
 0x1ee   :  { %v4674_v24 = vpack.c.bf16 %v454_v19, %v446_v18  ;;  %v519_v15 = vld [vmem:[#allocation5 + $0x970] sm:$0xff]  ;;  %v534_v17 = vld [vmem:[#allocation5 + $0x9e8] sm:$0xff]  ;;  %v5944_v18 = vld [vmem:[#allocation2 + $0x18] sm:$0xff] }
 0x1ef   :  { %4653 = vmatpush1.bf16.msra.mxu0 %v4652_v25  ;;  %v445_v25 = vld [vmem:[#allocation5 + $0x720] sm:$0xff]  ;;  %v528_v19 = vld [vmem:[#allocation5 + $0x9b8] sm:$0xff] }
 0x1f0   :  { %4877 = vmatpush1.bf16.msra.mxu1 %v4876_v26  ;;  %4655 = vmatprep.subr.bf16.mxu0 %v4654_v27  ;;  %v453_v26 = vld [vmem:[#allocation5 + $0x760] sm:$0xff]  ;;  %v447_v27 = vld [vmem:[#allocation5 + $0x730] sm:$0xff] }
 0x1f1   :  { %4879 = vmatprep.subr.bf16.mxu1 %v4878_v31  ;;  %v470_v31 = vld [vmem:[#allocation5 + $0x7e8] sm:$0xff]  ;;  %v4676_v34 = vpack.c.bf16 %v453_v26, %v445_v25  ;;  %v4900_v35 = vpack.c.bf16 %v455_v29, %v447_v27  ;;  %v533_v25 = vld [vmem:[#allocation5 + $0x9e0] sm:$0xff]  ;;  %v527_v26 = vld [vmem:[#allocation5 + $0x9b0] sm:$0xff]  ;;  %v4918_v27 = vpack.c.bf16 %v536_v20, %v528_v19 }
 0x1f2   :  { %v4678_v36 = vpack.c.bf16 %v470_v31, %v462_v30  ;;  %v542_v29 = vld [vmem:[#allocation5 + $0xa28] sm:$0xff]  ;;  %v544_v31 = vld [vmem:[#allocation5 + $0xa38] sm:$0xff] }
 0x1f3   :  { %4657 = vmatpush1.bf16.msra.mxu0 %v4656_v37  ;;  %v461_v37 = vld [vmem:[#allocation5 + $0x7a0] sm:$0xff]  ;;  %v550_v30 = vld [vmem:[#allocation5 + $0xa68] sm:$0xff] }
 0x1f4   :  { %4881 = vmatpush1.bf16.msra.mxu1 %v4880_v38  ;;  %4659 = vmatprep.subr.bf16.mxu0 %v4658_v39  ;;  %v469_v38 = vld [vmem:[#allocation5 + $0x7e0] sm:$0xff]  ;;  %v463_v39 = vld [vmem:[#allocation5 + $0x7b0] sm:$0xff] }
 0x1f5   :  { %4883 = vmatprep.subr.bf16.mxu1 %v4882_v44  ;;  %v486_v44 = vld [vmem:[#allocation5 + $0x868] sm:$0xff]  ;;  %v4680_v47 = vpack.c.bf16 %v469_v38, %v461_v37  ;;  %v4904_v48 = vpack.c.bf16 %v471_v41, %v463_v39  ;;  %v549_v37 = vld [vmem:[#allocation5 + $0xa60] sm:$0xff]  ;;  %v543_v38 = vld [vmem:[#allocation5 + $0xa30] sm:$0xff]  ;;  %v4922_v39 = vpack.c.bf16 %v552_v32, %v544_v31 }
 0x1f6   :  { %v4682_v49 = vpack.c.bf16 %v486_v44, %v478_v43  ;;  %v558_v41 = vld [vmem:[#allocation5 + $0xaa8] sm:$0xff]  ;;  %v560_v44 = vld [vmem:[#allocation5 + $0xab8] sm:$0xff] }
 0x1f7   :  { %4661 = vmatpush1.bf16.msra.mxu0 %v4660_v50  ;;  %v477_v50 = vld [vmem:[#allocation5 + $0x820] sm:$0xff]  ;;  %v566_v43 = vld [vmem:[#allocation5 + $0xae8] sm:$0xff] }
 0x1f8   :  { %4885 = vmatpush1.bf16.msra.mxu1 %v4884_v51  ;;  %4663 = vmatprep.subr.bf16.mxu0 %v4662_v52  ;;  %v485_v51 = vld [vmem:[#allocation5 + $0x860] sm:$0xff]  ;;  %v479_v52 = vld [vmem:[#allocation5 + $0x830] sm:$0xff] }
 0x1f9   :  { %4887 = vmatprep.subr.bf16.mxu1 %v4886_v56  ;;  %v502_v56 = vld [vmem:[#allocation5 + $0x8e8] sm:$0xff]  ;;  %v4684_v59 = vpack.c.bf16 %v485_v51, %v477_v50  ;;  %v4908_v60 = vpack.c.bf16 %v487_v54, %v479_v52  ;;  %v565_v50 = vld [vmem:[#allocation5 + $0xae0] sm:$0xff]  ;;  %v559_v51 = vld [vmem:[#allocation5 + $0xab0] sm:$0xff]  ;;  %v4926_v52 = vpack.c.bf16 %v568_v45, %v560_v44 }
 0x1fa   :  { %v4686_v61 = vpack.c.bf16 %v502_v56, %v494_v55  ;;  %v574_v54 = vld [vmem:[#allocation5 + $0xb28] sm:$0xff]  ;;  %v576_v56 = vld [vmem:[#allocation5 + $0xb38] sm:$0xff] }
 0x1fb   :  { %4665 = vmatpush1.bf16.msra.mxu0 %v4664_v62  ;;  %v493_v62 = vld [vmem:[#allocation5 + $0x8a0] sm:$0xff]  ;;  %v582_v55 = vld [vmem:[#allocation5 + $0xb68] sm:$0xff] }
 0x1fc   :  { %4889 = vmatpush1.bf16.msra.mxu1 %v4888_v63  ;;  %4667 = vmatprep.subr.bf16.mxu0 %v4666_v0  ;;  %v501_v63 = vld [vmem:[#allocation5 + $0x8e0] sm:$0xff]  ;;  %v495_v0 = vld [vmem:[#allocation5 + $0x8b0] sm:$0xff] }
 0x1fd   :  { %4891 = vmatprep.subr.bf16.mxu1 %v4890_v4  ;;  %v518_v4 = vld [vmem:[#allocation5 + $0x968] sm:$0xff]  ;;  %v4688_v8 = vpack.c.bf16 %v501_v63, %v493_v62  ;;  %v4912_v9 = vpack.c.bf16 %v503_v2, %v495_v0  ;;  %v581_v62 = vld [vmem:[#allocation5 + $0xb60] sm:$0xff]  ;;  %v575_v63 = vld [vmem:[#allocation5 + $0xb30] sm:$0xff]  ;;  %v4930_v0 = vpack.c.bf16 %v584_v57, %v576_v56 }
 0x1fe   :  { %v590_v2 = vld [vmem:[#allocation5 + $0xba8] sm:$0xff] }
 0x1ff   :  { %4669 = vmatpush1.bf16.msra.mxu0 %v4668_v10  ;;  %v4690_v10 = vpack.c.bf16 %v518_v4, %v510_v3  ;;  %v598_v3 = vld [vmem:[#allocation5 + $0xbe8] sm:$0xff]  ;;  %v592_v4 = vld [vmem:[#allocation5 + $0xbb8] sm:$0xff] }
 0x200   :  { %4893 = vmatpush1.bf16.msra.mxu1 %v4892_v11  ;;  %4671 = vmatprep.subr.bf16.mxu0 %v4670_v12  ;;  %v509_v11 = vld [vmem:[#allocation5 + $0x920] sm:$0xff] }
 0x201   :  { %4895 = vmatprep.subr.bf16.mxu1 %v4894_v16  ;;  %v517_v12 = vld [vmem:[#allocation5 + $0x960] sm:$0xff]  ;;  %v526_v16 = vld [vmem:[#allocation5 + $0x9a8] sm:$0xff] }
 0x202   :  { %v4692_v21 = vpack.c.bf16 %v517_v12, %v509_v11  ;;  %v591_v11 = vld [vmem:[#allocation5 + $0xbb0] sm:$0xff] }
 0x203   :  { %4673 = vmatpush1.bf16.msra.mxu0 %v4672_v22  ;;  %v4916_v22 = vpack.c.bf16 %v519_v15, %v511_v13  ;;  %v599_v13 = vld [vmem:[#allocation5 + $0xbf0] sm:$0xff]  ;;  %v614_v15 = vld [vmem:[#allocation5 + $0xc68] sm:$0xff] }
 0x204   :  { %4897 = vmatpush1.bf16.msra.mxu1 %v4896_v23  ;;  %4675 = vmatprep.subr.bf16.mxu0 %v4674_v24  ;;  %v4694_v23 = vpack.c.bf16 %v534_v17, %v526_v16  ;;  %v525_v24 = vld [vmem:[#allocation5 + $0x9a0] sm:$0xff]  ;;  %v608_v16 = vld [vmem:[#allocation5 + $0xc38] sm:$0xff]  ;;  %v4936_v19 = vpack.c.bf16 %v599_v13, %v591_v11  ;;  %v686_v11 = vld [vmem:[#allocation5 + $0xea8] sm:$0xff] }
 0x205   :  { %4899 = vmatprep.subr.bf16.mxu1 %v4898_v28  ;;  %v535_v28 = vld [vmem:[#allocation5 + $0x9f0] sm:$0xff]  ;;  %v4696_v33 = vpack.c.bf16 %v533_v25, %v525_v24  ;;  %v616_v17 = vld [vmem:[#allocation5 + $0xc78] sm:$0xff] }
 0x206   :  { %v4938_v24 = vpack.c.bf16 %v616_v17, %v608_v16  ;;  %v615_v25 = vld [vmem:[#allocation5 + $0xc70] sm:$0xff]  ;;  %v688_v13 = vld [vmem:[#allocation5 + $0xeb8] sm:$0xff] }
 0x207   :  { %4677 = vmatpush1.bf16.msra.mxu0 %v4676_v34  ;;  %v4920_v34 = vpack.c.bf16 %v535_v28, %v527_v26  ;;  %v622_v26 = vld [vmem:[#allocation5 + $0xca8] sm:$0xff]  ;;  %v624_v28 = vld [vmem:[#allocation5 + $0xcb8] sm:$0xff] }
 0x208   :  { %4901 = vmatpush1.bf16.msra.mxu1 %v4900_v35  ;;  %4679 = vmatprep.subr.bf16.mxu0 %v4678_v36  ;;  %v4698_v35 = vpack.c.bf16 %v550_v30, %v542_v29  ;;  %v541_v36 = vld [vmem:[#allocation5 + $0xa20] sm:$0xff]  ;;  %v632_v29 = vld [vmem:[#allocation5 + $0xcf8] sm:$0xff] }
 0x209   :  { %4903 = vmatprep.subr.bf16.mxu1 %v4902_v40  ;;  %v551_v40 = vld [vmem:[#allocation5 + $0xa70] sm:$0xff]  ;;  %v4700_v46 = vpack.c.bf16 %v549_v37, %v541_v36  ;;  %v4942_v36 = vpack.c.bf16 %v632_v29, %v624_v28 }
 0x20a   :  { %v631_v37 = vld [vmem:[#allocation5 + $0xcf0] sm:$0xff] }
 0x20b   :  { %4681 = vmatpush1.bf16.msra.mxu0 %v4680_v47  ;;  %v4924_v47 = vpack.c.bf16 %v551_v40, %v543_v38  ;;  %v638_v38 = vld [vmem:[#allocation5 + $0xd28] sm:$0xff]  ;;  %v640_v40 = vld [vmem:[#allocation5 + $0xd38] sm:$0xff] }
 0x20c   :  { %4905 = vmatpush1.bf16.msra.mxu1 %v4904_v48  ;;  %4683 = vmatprep.subr.bf16.mxu0 %v4682_v49  ;;  %v4702_v48 = vpack.c.bf16 %v566_v43, %v558_v41  ;;  %v557_v49 = vld [vmem:[#allocation5 + $0xaa0] sm:$0xff]  ;;  %v648_v41 = vld [vmem:[#allocation5 + $0xd78] sm:$0xff] }
 0x20d   :  { %4907 = vmatprep.subr.bf16.mxu1 %v4906_v53  ;;  %v567_v53 = vld [vmem:[#allocation5 + $0xaf0] sm:$0xff]  ;;  %v4704_v58 = vpack.c.bf16 %v565_v50, %v557_v49  ;;  %v4946_v49 = vpack.c.bf16 %v648_v41, %v640_v40 }
 0x20e   :  { %1788 = vmatmul.mubr.f32.vlgmr.msra.gmra.mrb[2].mxu0 %v5943_v5  ;;  %v647_v50 = vld [vmem:[#allocation5 + $0xd70] sm:$0xff] }
 0x20f   :  { %4685 = vmatpush1.bf16.msra.mxu0 %v4684_v59  ;;  %2072 = vmatmul.mubr.f32.vlgmr.msra.gmra.mrb[2].mxu1 %v5943_v5  ;;  %v4928_v59 = vpack.c.bf16 %v567_v53, %v559_v51  ;;  %v600_v5 = vld [vmem:[#allocation5 + $0xbf8] sm:$0xff]  ;;  %v654_v51 = vld [vmem:[#allocation5 + $0xda8] sm:$0xff] }
 0x210   :  { %4909 = vmatpush1.bf16.msra.mxu1 %v4908_v60  ;;  %4687 = vmatprep.subr.bf16.mxu0 %v4686_v61  ;;  %v4706_v60 = vpack.c.bf16 %v582_v55, %v574_v54  ;;  %v573_v61 = vld [vmem:[#allocation5 + $0xb20] sm:$0xff]  ;;  %v4934_v12 = vpack.c.bf16 %v600_v5, %v592_v4  ;;  %v656_v53 = vld [vmem:[#allocation5 + $0xdb8] sm:$0xff] }
 0x211   :  { %4911 = vmatprep.subr.bf16.mxu1 %v4910_v1  ;;  %1858 = vmatprep.mubr.f32.mxu0 %v5944_v18  ;;  %v583_v1 = vld [vmem:[#allocation5 + $0xb70] sm:$0xff]  ;;  %v4708_v6 = vpack.c.bf16 %v581_v62, %v573_v61  ;;  %v664_v54 = vld [vmem:[#allocation5 + $0xdf8] sm:$0xff] }
 0x212   :  { %2142 = vmatprep.mubr.f32.mxu1 %v5944_v18  ;;  %v4932_v7 = vpack.c.bf16 %v583_v1, %v575_v63  ;;  %v4950_v61 = vpack.c.bf16 %v664_v54, %v656_v53  ;;  %v663_v62 = vld [vmem:[#allocation5 + $0xdf0] sm:$0xff]  ;;  %v670_v63 = vld [vmem:[#allocation5 + $0xe28] sm:$0xff]  ;;  %v672_v1 = vld [vmem:[#allocation5 + $0xe38] sm:$0xff] }
 0x213   :  { %4689 = vmatpush1.bf16.msra.mxu0 %v4688_v8  ;;  %v4710_v8 = vpack.c.bf16 %v598_v3, %v590_v2  ;;  %v680_v2 = vld [vmem:[#allocation5 + $0xe78] sm:$0xff] }
 0x214   :  { %4913 = vmatpush1.bf16.msra.mxu1 %v4912_v9  ;;  %4691 = vmatprep.subr.bf16.mxu0 %v4690_v10  ;;  %v589_v9 = vld [vmem:[#allocation5 + $0xba0] sm:$0xff] }
 0x215   :  { %4915 = vmatprep.subr.bf16.mxu1 %v4914_v14  ;;  %v597_v10 = vld [vmem:[#allocation5 + $0xbe0] sm:$0xff]  ;;  %v606_v14 = vld [vmem:[#allocation5 + $0xc28] sm:$0xff] }
 0x216   :  { %v4712_v18 = vpack.c.bf16 %v597_v10, %v589_v9  ;;  %v4714_v20 = vpack.c.bf16 %v614_v15, %v606_v14  ;;  %v4954_v9 = vpack.c.bf16 %v680_v2, %v672_v1  ;;  %v679_v10 = vld [vmem:[#allocation5 + $0xe70] sm:$0xff]  ;;  %v696_v14 = vld [vmem:[#allocation5 + $0xef8] sm:$0xff] }
 0x217   :  { %4693 = vmatpush1.bf16.msra.mxu0 %v4692_v21  ;;  %v605_v21 = vld [vmem:[#allocation5 + $0xc20] sm:$0xff] }
 0x218   :  { %4917 = vmatpush1.bf16.msra.mxu1 %v4916_v22  ;;  %4695 = vmatprep.subr.bf16.mxu0 %v4694_v23  ;;  %v613_v22 = vld [vmem:[#allocation5 + $0xc60] sm:$0xff]  ;;  %v607_v23 = vld [vmem:[#allocation5 + $0xc30] sm:$0xff] }
 0x219   :  { %4919 = vmatprep.subr.bf16.mxu1 %v4918_v27  ;;  %v630_v27 = vld [vmem:[#allocation5 + $0xce8] sm:$0xff]  ;;  %v4716_v30 = vpack.c.bf16 %v613_v22, %v605_v21  ;;  %v4940_v31 = vpack.c.bf16 %v615_v25, %v607_v23  ;;  %v4958_v21 = vpack.c.bf16 %v696_v14, %v688_v13  ;;  %v695_v22 = vld [vmem:[#allocation5 + $0xef0] sm:$0xff]  ;;  %v704_v25 = vld [vmem:[#allocation5 + $0xf38] sm:$0xff] }
 0x21a   :  { %v4718_v32 = vpack.c.bf16 %v630_v27, %v622_v26  ;;  %v702_v23 = vld [vmem:[#allocation5 + $0xf28] sm:$0xff]  ;;  %v712_v26 = vld [vmem:[#allocation5 + $0xf78] sm:$0xff] }
 0x21b   :  { %4697 = vmatpush1.bf16.msra.mxu0 %v4696_v33  ;;  %v621_v33 = vld [vmem:[#allocation5 + $0xca0] sm:$0xff] }
 0x21c   :  { %4921 = vmatpush1.bf16.msra.mxu1 %v4920_v34  ;;  %4699 = vmatprep.subr.bf16.mxu0 %v4698_v35  ;;  %v629_v34 = vld [vmem:[#allocation5 + $0xce0] sm:$0xff]  ;;  %v623_v35 = vld [vmem:[#allocation5 + $0xcb0] sm:$0xff] }
 0x21d   :  { %4923 = vmatprep.subr.bf16.mxu1 %v4922_v39  ;;  %v646_v39 = vld [vmem:[#allocation5 + $0xd68] sm:$0xff]  ;;  %v4720_v43 = vpack.c.bf16 %v629_v34, %v621_v33  ;;  %v4944_v44 = vpack.c.bf16 %v631_v37, %v623_v35  ;;  %v4962_v33 = vpack.c.bf16 %v712_v26, %v704_v25  ;;  %v711_v34 = vld [vmem:[#allocation5 + $0xf70] sm:$0xff]  ;;  %v720_v37 = vld [vmem:[#allocation5 + $0xfb8] sm:$0xff] }
 0x21e   :  { %v4722_v45 = vpack.c.bf16 %v646_v39, %v638_v38  ;;  %v718_v35 = vld [vmem:[#allocation5 + $0xfa8] sm:$0xff]  ;;  %v728_v38 = vld [vmem:[#allocation5 + $0xff8] sm:$0xff] }
 0x21f   :  { %4701 = vmatpush1.bf16.msra.mxu0 %v4700_v46  ;;  %v637_v46 = vld [vmem:[#allocation5 + $0xd20] sm:$0xff]  ;;  %v792_v25 = vld [vmem:[#allocation5 + $0x11f8] sm:$0xff] }
 0x220   :  { %4925 = vmatpush1.bf16.msra.mxu1 %v4924_v47  ;;  %4703 = vmatprep.subr.bf16.mxu0 %v4702_v48  ;;  %v645_v47 = vld [vmem:[#allocation5 + $0xd60] sm:$0xff]  ;;  %v639_v48 = vld [vmem:[#allocation5 + $0xd30] sm:$0xff] }
 0x221   :  { %4927 = vmatprep.subr.bf16.mxu1 %v4926_v52  ;;  %v662_v52 = vld [vmem:[#allocation5 + $0xde8] sm:$0xff]  ;;  %v4724_v55 = vpack.c.bf16 %v645_v47, %v637_v46  ;;  %v4948_v56 = vpack.c.bf16 %v647_v50, %v639_v48  ;;  %v4966_v46 = vpack.c.bf16 %v728_v38, %v720_v37  ;;  %v727_v47 = vld [vmem:[#allocation5 + $0xff0] sm:$0xff]  ;;  %v736_v50 = vld [vmem:[#allocation5 + $0x1038] sm:$0xff] }
 0x222   :  { %v4726_v57 = vpack.c.bf16 %v662_v52, %v654_v51  ;;  %v734_v48 = vld [vmem:[#allocation5 + $0x1028] sm:$0xff]  ;;  %v744_v51 = vld [vmem:[#allocation5 + $0x1078] sm:$0xff] }
 0x223   :  { %4705 = vmatpush1.bf16.msra.mxu0 %v4704_v58  ;;  %v653_v58 = vld [vmem:[#allocation5 + $0xda0] sm:$0xff]  ;;  %v808_v37 = vld [vmem:[#allocation5 + $0x1278] sm:$0xff] }
 0x224   :  { %4929 = vmatpush1.bf16.msra.mxu1 %v4928_v59  ;;  %4707 = vmatprep.subr.bf16.mxu0 %v4706_v60  ;;  %v661_v59 = vld [vmem:[#allocation5 + $0xde0] sm:$0xff]  ;;  %v655_v60 = vld [vmem:[#allocation5 + $0xdb0] sm:$0xff] }
 0x225   :  { %4931 = vmatprep.subr.bf16.mxu1 %v4930_v0  ;;  %v678_v0 = vld [vmem:[#allocation5 + $0xe68] sm:$0xff]  ;;  %v4728_v3 = vpack.c.bf16 %v661_v59, %v653_v58  ;;  %v4952_v4 = vpack.c.bf16 %v663_v62, %v655_v60  ;;  %v4970_v58 = vpack.c.bf16 %v744_v51, %v736_v50  ;;  %v743_v59 = vld [vmem:[#allocation5 + $0x1070] sm:$0xff]  ;;  %v752_v62 = vld [vmem:[#allocation5 + $0x10b8] sm:$0xff] }
 0x226   :  { %v4730_v5 = vpack.c.bf16 %v678_v0, %v670_v63  ;;  %v750_v60 = vld [vmem:[#allocation5 + $0x10a8] sm:$0xff]  ;;  %v760_v63 = vld [vmem:[#allocation5 + $0x10f8] sm:$0xff] }
 0x227   :  { %4709 = vmatpush1.bf16.msra.mxu0 %v4708_v6  ;;  %v669_v6 = vld [vmem:[#allocation5 + $0xe20] sm:$0xff]  ;;  %v824_v50 = vld [vmem:[#allocation5 + $0x12f8] sm:$0xff] }
 0x228   :  { %4933 = vmatpush1.bf16.msra.mxu1 %v4932_v7  ;;  %4711 = vmatprep.subr.bf16.mxu0 %v4710_v8  ;;  %v677_v7 = vld [vmem:[#allocation5 + $0xe60] sm:$0xff]  ;;  %v671_v8 = vld [vmem:[#allocation5 + $0xe30] sm:$0xff] }
 0x229   :  { %4935 = vmatprep.subr.bf16.mxu1 %v4934_v12  ;;  %v694_v12 = vld [vmem:[#allocation5 + $0xee8] sm:$0xff]  ;;  %v4732_v15 = vpack.c.bf16 %v677_v7, %v669_v6  ;;  %v4956_v16 = vpack.c.bf16 %v679_v10, %v671_v8  ;;  %v4974_v6 = vpack.c.bf16 %v760_v63, %v752_v62  ;;  %v759_v7 = vld [vmem:[#allocation5 + $0x10f0] sm:$0xff]  ;;  %v5945_v10 = vld [vmem:[#allocation2 + $0x10] sm:$0xff] }
 0x22a   :  { %v4734_v17 = vpack.c.bf16 %v694_v12, %v686_v11  ;;  %v766_v8 = vld [vmem:[#allocation5 + $0x1128] sm:$0xff]  ;;  %v768_v11 = vld [vmem:[#allocation5 + $0x1138] sm:$0xff] }
 0x22b   :  { %4713 = vmatpush1.bf16.msra.mxu0 %v4712_v18  ;;  %v685_v18 = vld [vmem:[#allocation5 + $0xea0] sm:$0xff]  ;;  %v776_v12 = vld [vmem:[#allocation5 + $0x1178] sm:$0xff] }
 0x22c   :  { %4937 = vmatpush1.bf16.msra.mxu1 %v4936_v19  ;;  %4715 = vmatprep.subr.bf16.mxu0 %v4714_v20  ;;  %v693_v19 = vld [vmem:[#allocation5 + $0xee0] sm:$0xff]  ;;  %v687_v20 = vld [vmem:[#allocation5 + $0xeb0] sm:$0xff]  ;;  %v840_v62 = vld [vmem:[#allocation5 + $0x1378] sm:$0xff] }
 0x22d   :  { %4939 = vmatprep.subr.bf16.mxu1 %v4938_v24  ;;  %v710_v24 = vld [vmem:[#allocation5 + $0xf68] sm:$0xff]  ;;  %v4736_v27 = vpack.c.bf16 %v693_v19, %v685_v18  ;;  %v4960_v28 = vpack.c.bf16 %v695_v22, %v687_v20  ;;  %v767_v18 = vld [vmem:[#allocation5 + $0x1130] sm:$0xff]  ;;  %v4978_v19 = vpack.c.bf16 %v776_v12, %v768_v11 }
 0x22e   :  { %v4738_v29 = vpack.c.bf16 %v710_v24, %v702_v23  ;;  %v775_v20 = vld [vmem:[#allocation5 + $0x1170] sm:$0xff]  ;;  %v790_v22 = vld [vmem:[#allocation5 + $0x11e8] sm:$0xff]  ;;  %v784_v24 = vld [vmem:[#allocation5 + $0x11b8] sm:$0xff] }
 0x22f   :  { %4717 = vmatpush1.bf16.msra.mxu0 %v4716_v30  ;;  %v701_v30 = vld [vmem:[#allocation5 + $0xf20] sm:$0xff]  ;;  %v5946_v23 = vld [vmem:[#allocation2 + $0x28] sm:$0xff] }
 0x230   :  { %4941 = vmatpush1.bf16.msra.mxu1 %v4940_v31  ;;  %4719 = vmatprep.subr.bf16.mxu0 %v4718_v32  ;;  %v709_v31 = vld [vmem:[#allocation5 + $0xf60] sm:$0xff]  ;;  %v703_v32 = vld [vmem:[#allocation5 + $0xf30] sm:$0xff] }
 0x231   :  { %4943 = vmatprep.subr.bf16.mxu1 %v4942_v36  ;;  %v726_v36 = vld [vmem:[#allocation5 + $0xfe8] sm:$0xff]  ;;  %v4740_v39 = vpack.c.bf16 %v709_v31, %v701_v30  ;;  %v4964_v40 = vpack.c.bf16 %v711_v34, %v703_v32  ;;  %v789_v30 = vld [vmem:[#allocation5 + $0x11e0] sm:$0xff]  ;;  %v783_v31 = vld [vmem:[#allocation5 + $0x11b0] sm:$0xff]  ;;  %v4982_v32 = vpack.c.bf16 %v792_v25, %v784_v24 }
 0x232   :  { %v4742_v41 = vpack.c.bf16 %v726_v36, %v718_v35  ;;  %v798_v34 = vld [vmem:[#allocation5 + $0x1228] sm:$0xff]  ;;  %v800_v36 = vld [vmem:[#allocation5 + $0x1238] sm:$0xff] }
 0x233   :  { %4721 = vmatpush1.bf16.msra.mxu0 %v4720_v43  ;;  %v717_v43 = vld [vmem:[#allocation5 + $0xfa0] sm:$0xff]  ;;  %v806_v35 = vld [vmem:[#allocation5 + $0x1268] sm:$0xff] }
 0x234   :  { %4945 = vmatpush1.bf16.msra.mxu1 %v4944_v44  ;;  %4723 = vmatprep.subr.bf16.mxu0 %v4722_v45  ;;  %v725_v44 = vld [vmem:[#allocation5 + $0xfe0] sm:$0xff]  ;;  %v719_v45 = vld [vmem:[#allocation5 + $0xfb0] sm:$0xff] }
 0x235   :  { %4947 = vmatprep.subr.bf16.mxu1 %v4946_v49  ;;  %v742_v49 = vld [vmem:[#allocation5 + $0x1068] sm:$0xff]  ;;  %v4744_v52 = vpack.c.bf16 %v725_v44, %v717_v43  ;;  %v4968_v53 = vpack.c.bf16 %v727_v47, %v719_v45  ;;  %v805_v43 = vld [vmem:[#allocation5 + $0x1260] sm:$0xff]  ;;  %v799_v44 = vld [vmem:[#allocation5 + $0x1230] sm:$0xff]  ;;  %v4986_v45 = vpack.c.bf16 %v808_v37, %v800_v36 }
 0x236   :  { %v4746_v54 = vpack.c.bf16 %v742_v49, %v734_v48  ;;  %v814_v47 = vld [vmem:[#allocation5 + $0x12a8] sm:$0xff]  ;;  %v816_v49 = vld [vmem:[#allocation5 + $0x12b8] sm:$0xff] }
 0x237   :  { %4725 = vmatpush1.bf16.msra.mxu0 %v4724_v55  ;;  %v733_v55 = vld [vmem:[#allocation5 + $0x1020] sm:$0xff]  ;;  %v822_v48 = vld [vmem:[#allocation5 + $0x12e8] sm:$0xff] }
 0x238   :  { %4949 = vmatpush1.bf16.msra.mxu1 %v4948_v56  ;;  %4727 = vmatprep.subr.bf16.mxu0 %v4726_v57  ;;  %v741_v56 = vld [vmem:[#allocation5 + $0x1060] sm:$0xff]  ;;  %v735_v57 = vld [vmem:[#allocation5 + $0x1030] sm:$0xff] }
 0x239   :  { %4951 = vmatprep.subr.bf16.mxu1 %v4950_v61  ;;  %v758_v61 = vld [vmem:[#allocation5 + $0x10e8] sm:$0xff]  ;;  %v4748_v0 = vpack.c.bf16 %v741_v56, %v733_v55  ;;  %v4972_v1 = vpack.c.bf16 %v743_v59, %v735_v57  ;;  %v821_v55 = vld [vmem:[#allocation5 + $0x12e0] sm:$0xff]  ;;  %v815_v56 = vld [vmem:[#allocation5 + $0x12b0] sm:$0xff]  ;;  %v4990_v57 = vpack.c.bf16 %v824_v50, %v816_v49 }
 0x23a   :  { %v4750_v2 = vpack.c.bf16 %v758_v61, %v750_v60  ;;  %v830_v59 = vld [vmem:[#allocation5 + $0x1328] sm:$0xff]  ;;  %v832_v61 = vld [vmem:[#allocation5 + $0x1338] sm:$0xff] }
 0x23b   :  { %4729 = vmatpush1.bf16.msra.mxu0 %v4728_v3  ;;  %v749_v3 = vld [vmem:[#allocation5 + $0x10a0] sm:$0xff]  ;;  %v838_v60 = vld [vmem:[#allocation5 + $0x1368] sm:$0xff] }
 0x23c   :  { %4953 = vmatpush1.bf16.msra.mxu1 %v4952_v4  ;;  %4731 = vmatprep.subr.bf16.mxu0 %v4730_v5  ;;  %v757_v4 = vld [vmem:[#allocation5 + $0x10e0] sm:$0xff]  ;;  %v751_v5 = vld [vmem:[#allocation5 + $0x10b0] sm:$0xff] }
 0x23d   :  { %4955 = vmatprep.subr.bf16.mxu1 %v4954_v9  ;;  %v774_v9 = vld [vmem:[#allocation5 + $0x1168] sm:$0xff]  ;;  %v4752_v13 = vpack.c.bf16 %v757_v4, %v749_v3  ;;  %v4976_v14 = vpack.c.bf16 %v759_v7, %v751_v5  ;;  %v837_v3 = vld [vmem:[#allocation5 + $0x1360] sm:$0xff]  ;;  %v831_v4 = vld [vmem:[#allocation5 + $0x1330] sm:$0xff]  ;;  %v4994_v5 = vpack.c.bf16 %v840_v62, %v832_v61 }
 0x23e   :  { %v846_v7 = vld [vmem:[#allocation5 + $0x13a8] sm:$0xff] }
 0x23f   :  { %4733 = vmatpush1.bf16.msra.mxu0 %v4732_v15  ;;  %v4754_v15 = vpack.c.bf16 %v774_v9, %v766_v8  ;;  %v854_v8 = vld [vmem:[#allocation5 + $0x13e8] sm:$0xff]  ;;  %v848_v9 = vld [vmem:[#allocation5 + $0x13b8] sm:$0xff] }
 0x240   :  { %4957 = vmatpush1.bf16.msra.mxu1 %v4956_v16  ;;  %4735 = vmatprep.subr.bf16.mxu0 %v4734_v17  ;;  %v765_v16 = vld [vmem:[#allocation5 + $0x1120] sm:$0xff] }
 0x241   :  { %4959 = vmatprep.subr.bf16.mxu1 %v4958_v21  ;;  %v773_v17 = vld [vmem:[#allocation5 + $0x1160] sm:$0xff]  ;;  %v782_v21 = vld [vmem:[#allocation5 + $0x11a8] sm:$0xff] }
 0x242   :  { %v4756_v26 = vpack.c.bf16 %v773_v17, %v765_v16  ;;  %v847_v16 = vld [vmem:[#allocation5 + $0x13b0] sm:$0xff] }
 0x243   :  { %4737 = vmatpush1.bf16.msra.mxu0 %v4736_v27  ;;  %v4980_v27 = vpack.c.bf16 %v775_v20, %v767_v18  ;;  %v855_v18 = vld [vmem:[#allocation5 + $0x13f0] sm:$0xff]  ;;  %v870_v20 = vld [vmem:[#allocation5 + $0x1468] sm:$0xff] }
 0x244   :  { %4961 = vmatpush1.bf16.msra.mxu1 %v4960_v28  ;;  %4739 = vmatprep.subr.bf16.mxu0 %v4738_v29  ;;  %v4758_v28 = vpack.c.bf16 %v790_v22, %v782_v21  ;;  %v781_v29 = vld [vmem:[#allocation5 + $0x11a0] sm:$0xff]  ;;  %v864_v21 = vld [vmem:[#allocation5 + $0x1438] sm:$0xff]  ;;  %v5000_v24 = vpack.c.bf16 %v855_v18, %v847_v16  ;;  %v942_v16 = vld [vmem:[#allocation5 + $0x16a8] sm:$0xff] }
 0x245   :  { %4963 = vmatprep.subr.bf16.mxu1 %v4962_v33  ;;  %v791_v33 = vld [vmem:[#allocation5 + $0x11f0] sm:$0xff]  ;;  %v4760_v38 = vpack.c.bf16 %v789_v30, %v781_v29  ;;  %v872_v22 = vld [vmem:[#allocation5 + $0x1478] sm:$0xff] }
 0x246   :  { %v5002_v29 = vpack.c.bf16 %v872_v22, %v864_v21  ;;  %v871_v30 = vld [vmem:[#allocation5 + $0x1470] sm:$0xff]  ;;  %v944_v18 = vld [vmem:[#allocation5 + $0x16b8] sm:$0xff] }
 0x247   :  { %4741 = vmatpush1.bf16.msra.mxu0 %v4740_v39  ;;  %v4984_v39 = vpack.c.bf16 %v791_v33, %v783_v31  ;;  %v878_v31 = vld [vmem:[#allocation5 + $0x14a8] sm:$0xff]  ;;  %v880_v33 = vld [vmem:[#allocation5 + $0x14b8] sm:$0xff] }
 0x248   :  { %4965 = vmatpush1.bf16.msra.mxu1 %v4964_v40  ;;  %4743 = vmatprep.subr.bf16.mxu0 %v4742_v41  ;;  %v4762_v40 = vpack.c.bf16 %v806_v35, %v798_v34  ;;  %v797_v41 = vld [vmem:[#allocation5 + $0x1220] sm:$0xff]  ;;  %v888_v34 = vld [vmem:[#allocation5 + $0x14f8] sm:$0xff] }
 0x249   :  { %4967 = vmatprep.subr.bf16.mxu1 %v4966_v46  ;;  %v807_v46 = vld [vmem:[#allocation5 + $0x1270] sm:$0xff]  ;;  %v4764_v51 = vpack.c.bf16 %v805_v43, %v797_v41  ;;  %v5006_v41 = vpack.c.bf16 %v888_v34, %v880_v33 }
 0x24a   :  { %v887_v43 = vld [vmem:[#allocation5 + $0x14f0] sm:$0xff] }
 0x24b   :  { %4745 = vmatpush1.bf16.msra.mxu0 %v4744_v52  ;;  %v4988_v52 = vpack.c.bf16 %v807_v46, %v799_v44  ;;  %v894_v44 = vld [vmem:[#allocation5 + $0x1528] sm:$0xff]  ;;  %v896_v46 = vld [vmem:[#allocation5 + $0x1538] sm:$0xff] }
 0x24c   :  { %4969 = vmatpush1.bf16.msra.mxu1 %v4968_v53  ;;  %4747 = vmatprep.subr.bf16.mxu0 %v4746_v54  ;;  %v4766_v53 = vpack.c.bf16 %v822_v48, %v814_v47  ;;  %v813_v54 = vld [vmem:[#allocation5 + $0x12a0] sm:$0xff]  ;;  %v904_v47 = vld [vmem:[#allocation5 + $0x1578] sm:$0xff] }
 0x24d   :  { %4971 = vmatprep.subr.bf16.mxu1 %v4970_v58  ;;  %v823_v58 = vld [vmem:[#allocation5 + $0x12f0] sm:$0xff]  ;;  %v4768_v63 = vpack.c.bf16 %v821_v55, %v813_v54  ;;  %v5010_v54 = vpack.c.bf16 %v904_v47, %v896_v46 }
 0x24e   :  { %1859 = vmatmul.mubr.f32.vlgmr.msra.gmra.mrb[2].mxu0 %v5945_v10  ;;  %v903_v55 = vld [vmem:[#allocation5 + $0x1570] sm:$0xff] }
 0x24f   :  { %4749 = vmatpush1.bf16.msra.mxu0 %v4748_v0  ;;  %2143 = vmatmul.mubr.f32.vlgmr.msra.gmra.mrb[2].mxu1 %v5945_v10  ;;  %v4992_v0 = vpack.c.bf16 %v823_v58, %v815_v56  ;;  %v856_v10 = vld [vmem:[#allocation5 + $0x13f8] sm:$0xff]  ;;  %v910_v56 = vld [vmem:[#allocation5 + $0x15a8] sm:$0xff] }
 0x250   :  { %4973 = vmatpush1.bf16.msra.mxu1 %v4972_v1  ;;  %4751 = vmatprep.subr.bf16.mxu0 %v4750_v2  ;;  %v4770_v1 = vpack.c.bf16 %v838_v60, %v830_v59  ;;  %v829_v2 = vld [vmem:[#allocation5 + $0x1320] sm:$0xff]  ;;  %v4998_v17 = vpack.c.bf16 %v856_v10, %v848_v9  ;;  %v912_v58 = vld [vmem:[#allocation5 + $0x15b8] sm:$0xff] }
 0x251   :  { %4975 = vmatprep.subr.bf16.mxu1 %v4974_v6  ;;  %1929 = vmatprep.mubr.f32.mxu0 %v5946_v23  ;;  %v839_v6 = vld [vmem:[#allocation5 + $0x1370] sm:$0xff]  ;;  %v4772_v11 = vpack.c.bf16 %v837_v3, %v829_v2  ;;  %v920_v59 = vld [vmem:[#allocation5 + $0x15f8] sm:$0xff] }
 0x252   :  { %2213 = vmatprep.mubr.f32.mxu1 %v5946_v23  ;;  %v4996_v12 = vpack.c.bf16 %v839_v6, %v831_v4  ;;  %v5014_v2 = vpack.c.bf16 %v920_v59, %v912_v58  ;;  %v919_v3 = vld [vmem:[#allocation5 + $0x15f0] sm:$0xff]  ;;  %v926_v4 = vld [vmem:[#allocation5 + $0x1628] sm:$0xff]  ;;  %v928_v6 = vld [vmem:[#allocation5 + $0x1638] sm:$0xff] }
 0x253   :  { %4753 = vmatpush1.bf16.msra.mxu0 %v4752_v13  ;;  %v4774_v13 = vpack.c.bf16 %v854_v8, %v846_v7  ;;  %v936_v7 = vld [vmem:[#allocation5 + $0x1678] sm:$0xff] }
 0x254   :  { %4977 = vmatpush1.bf16.msra.mxu1 %v4976_v14  ;;  %4755 = vmatprep.subr.bf16.mxu0 %v4754_v15  ;;  %v845_v14 = vld [vmem:[#allocation5 + $0x13a0] sm:$0xff] }
 0x255   :  { %4979 = vmatprep.subr.bf16.mxu1 %v4978_v19  ;;  %v853_v15 = vld [vmem:[#allocation5 + $0x13e0] sm:$0xff]  ;;  %v862_v19 = vld [vmem:[#allocation5 + $0x1428] sm:$0xff] }
 0x256   :  { %v4776_v23 = vpack.c.bf16 %v853_v15, %v845_v14  ;;  %v4778_v25 = vpack.c.bf16 %v870_v20, %v862_v19  ;;  %v5018_v14 = vpack.c.bf16 %v936_v7, %v928_v6  ;;  %v935_v15 = vld [vmem:[#allocation5 + $0x1670] sm:$0xff]  ;;  %v952_v19 = vld [vmem:[#allocation5 + $0x16f8] sm:$0xff] }
 0x257   :  { %4757 = vmatpush1.bf16.msra.mxu0 %v4756_v26  ;;  %v861_v26 = vld [vmem:[#allocation5 + $0x1420] sm:$0xff] }
 0x258   :  { %4981 = vmatpush1.bf16.msra.mxu1 %v4980_v27  ;;  %4759 = vmatprep.subr.bf16.mxu0 %v4758_v28  ;;  %v869_v27 = vld [vmem:[#allocation5 + $0x1460] sm:$0xff]  ;;  %v863_v28 = vld [vmem:[#allocation5 + $0x1430] sm:$0xff] }
 0x259   :  { %4983 = vmatprep.subr.bf16.mxu1 %v4982_v32  ;;  %v886_v32 = vld [vmem:[#allocation5 + $0x14e8] sm:$0xff]  ;;  %v4780_v35 = vpack.c.bf16 %v869_v27, %v861_v26  ;;  %v5004_v36 = vpack.c.bf16 %v871_v30, %v863_v28  ;;  %v5022_v26 = vpack.c.bf16 %v952_v19, %v944_v18  ;;  %v951_v27 = vld [vmem:[#allocation5 + $0x16f0] sm:$0xff]  ;;  %v960_v30 = vld [vmem:[#allocation5 + $0x1738] sm:$0xff] }
 0x25a   :  { %v4782_v37 = vpack.c.bf16 %v886_v32, %v878_v31  ;;  %v958_v28 = vld [vmem:[#allocation5 + $0x1728] sm:$0xff]  ;;  %v968_v31 = vld [vmem:[#allocation5 + $0x1778] sm:$0xff] }
 0x25b   :  { %4761 = vmatpush1.bf16.msra.mxu0 %v4760_v38  ;;  %v877_v38 = vld [vmem:[#allocation5 + $0x14a0] sm:$0xff] }
 0x25c   :  { %4985 = vmatpush1.bf16.msra.mxu1 %v4984_v39  ;;  %4763 = vmatprep.subr.bf16.mxu0 %v4762_v40  ;;  %v885_v39 = vld [vmem:[#allocation5 + $0x14e0] sm:$0xff]  ;;  %v879_v40 = vld [vmem:[#allocation5 + $0x14b0] sm:$0xff] }
 0x25d   :  { %4987 = vmatprep.subr.bf16.mxu1 %v4986_v45  ;;  %v902_v45 = vld [vmem:[#allocation5 + $0x1568] sm:$0xff]  ;;  %v4784_v48 = vpack.c.bf16 %v885_v39, %v877_v38  ;;  %v5008_v49 = vpack.c.bf16 %v887_v43, %v879_v40  ;;  %v5026_v38 = vpack.c.bf16 %v968_v31, %v960_v30  ;;  %v967_v39 = vld [vmem:[#allocation5 + $0x1770] sm:$0xff]  ;;  %v976_v43 = vld [vmem:[#allocation5 + $0x17b8] sm:$0xff] }
 0x25e   :  { %v4786_v50 = vpack.c.bf16 %v902_v45, %v894_v44  ;;  %v974_v40 = vld [vmem:[#allocation5 + $0x17a8] sm:$0xff]  ;;  %v984_v44 = vld [vmem:[#allocation5 + $0x17f8] sm:$0xff] }
 0x25f   :  { %4765 = vmatpush1.bf16.msra.mxu0 %v4764_v51  ;;  %v893_v51 = vld [vmem:[#allocation5 + $0x1520] sm:$0xff] }
 0x260   :  { %4989 = vmatpush1.bf16.msra.mxu1 %v4988_v52  ;;  %4767 = vmatprep.subr.bf16.mxu0 %v4766_v53  ;;  %v901_v52 = vld [vmem:[#allocation5 + $0x1560] sm:$0xff]  ;;  %v895_v53 = vld [vmem:[#allocation5 + $0x1530] sm:$0xff] }
 0x261   :  { %4991 = vmatprep.subr.bf16.mxu1 %v4990_v57  ;;  %v918_v57 = vld [vmem:[#allocation5 + $0x15e8] sm:$0xff]  ;;  %v4788_v60 = vpack.c.bf16 %v901_v52, %v893_v51  ;;  %v5012_v61 = vpack.c.bf16 %v903_v55, %v895_v53  ;;  %v5030_v51 = vpack.c.bf16 %v984_v44, %v976_v43  ;;  %v983_v52 = vld [vmem:[#allocation5 + $0x17f0] sm:$0xff]  ;;  %v992_v55 = vld [vmem:[#allocation5 + $0x1838] sm:$0xff] }
 0x262   :  { %v4790_v62 = vpack.c.bf16 %v918_v57, %v910_v56  ;;  %v990_v53 = vld [vmem:[#allocation5 + $0x1828] sm:$0xff]  ;;  %v1000_v56 = vld [vmem:[#allocation5 + $0x1878] sm:$0xff] }
 0x263   :  { %4769 = vmatpush1.bf16.msra.mxu0 %v4768_v63  ;;  %v909_v63 = vld [vmem:[#allocation5 + $0x15a0] sm:$0xff] }
 0x264   :  { %4993 = vmatpush1.bf16.msra.mxu1 %v4992_v0  ;;  %4771 = vmatprep.subr.bf16.mxu0 %v4770_v1  ;;  %v917_v0 = vld [vmem:[#allocation5 + $0x15e0] sm:$0xff]  ;;  %v911_v1 = vld [vmem:[#allocation5 + $0x15b0] sm:$0xff] }
 0x265   :  { %4995 = vmatprep.subr.bf16.mxu1 %v4994_v5  ;;  %v934_v5 = vld [vmem:[#allocation5 + $0x1668] sm:$0xff]  ;;  %v4792_v8 = vpack.c.bf16 %v917_v0, %v909_v63  ;;  %v5016_v9 = vpack.c.bf16 %v919_v3, %v911_v1  ;;  %v5034_v63 = vpack.c.bf16 %v1000_v56, %v992_v55  ;;  %v999_v0 = vld [vmem:[#allocation5 + $0x1870] sm:$0xff]  ;;  %v1008_v3 = vld [vmem:[#allocation5 + $0x18b8] sm:$0xff] }
 0x266   :  { %v4794_v10 = vpack.c.bf16 %v934_v5, %v926_v4  ;;  %v1006_v1 = vld [vmem:[#allocation5 + $0x18a8] sm:$0xff]  ;;  %v1016_v4 = vld [vmem:[#allocation5 + $0x18f8] sm:$0xff] }
 0x267   :  { %4773 = vmatpush1.bf16.msra.mxu0 %v4772_v11  ;;  %v925_v11 = vld [vmem:[#allocation5 + $0x1620] sm:$0xff] }
 0x268   :  { %4997 = vmatpush1.bf16.msra.mxu1 %v4996_v12  ;;  %4775 = vmatprep.subr.bf16.mxu0 %v4774_v13  ;;  %v933_v12 = vld [vmem:[#allocation5 + $0x1660] sm:$0xff]  ;;  %v927_v13 = vld [vmem:[#allocation5 + $0x1630] sm:$0xff] }
 0x269   :  { %4999 = vmatprep.subr.bf16.mxu1 %v4998_v17  ;;  %v950_v17 = vld [vmem:[#allocation5 + $0x16e8] sm:$0xff]  ;;  %v4796_v20 = vpack.c.bf16 %v933_v12, %v925_v11  ;;  %v5020_v21 = vpack.c.bf16 %v935_v15, %v927_v13  ;;  %v5038_v11 = vpack.c.bf16 %v1016_v4, %v1008_v3  ;;  %v1015_v12 = vld [vmem:[#allocation5 + $0x18f0] sm:$0xff]  ;;  %v1096_v3 = vld [vmem:[#allocation5 + $0x1b78] sm:$0xff] }
 0x26a   :  { %v4798_v22 = vpack.c.bf16 %v950_v17, %v942_v16  ;;  %v1022_v13 = vld [vmem:[#allocation5 + $0x1928] sm:$0xff]  ;;  %v1024_v16 = vld [vmem:[#allocation5 + $0x1938] sm:$0xff] }
 0x26b   :  { %4777 = vmatpush1.bf16.msra.mxu0 %v4776_v23  ;;  %v941_v23 = vld [vmem:[#allocation5 + $0x16a0] sm:$0xff]  ;;  %v5947_v15 = vld [vmem:[#allocation2 + $0x20] sm:$0xff]  ;;  %v1032_v17 = vld [vmem:[#allocation5 + $0x1978] sm:$0xff] }
 0x26c   :  { %5001 = vmatpush1.bf16.msra.mxu1 %v5000_v24  ;;  %4779 = vmatprep.subr.bf16.mxu0 %v4778_v25  ;;  %v949_v24 = vld [vmem:[#allocation5 + $0x16e0] sm:$0xff]  ;;  %v943_v25 = vld [vmem:[#allocation5 + $0x16b0] sm:$0xff] }
 0x26d   :  { %5003 = vmatprep.subr.bf16.mxu1 %v5002_v29  ;;  %v966_v29 = vld [vmem:[#allocation5 + $0x1768] sm:$0xff]  ;;  %v4800_v32 = vpack.c.bf16 %v949_v24, %v941_v23  ;;  %v5024_v33 = vpack.c.bf16 %v951_v27, %v943_v25  ;;  %v1023_v23 = vld [vmem:[#allocation5 + $0x1930] sm:$0xff]  ;;  %v5042_v24 = vpack.c.bf16 %v1032_v17, %v1024_v16 }
 0x26e   :  { %v4802_v34 = vpack.c.bf16 %v966_v29, %v958_v28  ;;  %v1031_v25 = vld [vmem:[#allocation5 + $0x1970] sm:$0xff]  ;;  %v1046_v27 = vld [vmem:[#allocation5 + $0x19e8] sm:$0xff]  ;;  %v1040_v28 = vld [vmem:[#allocation5 + $0x19b8] sm:$0xff] }
 0x26f   :  { %4781 = vmatpush1.bf16.msra.mxu0 %v4780_v35  ;;  %v957_v35 = vld [vmem:[#allocation5 + $0x1720] sm:$0xff]  ;;  %v1048_v29 = vld [vmem:[#allocation5 + $0x19f8] sm:$0xff]  ;;  %v5044_v31 = vpack.c.bf16 %v1031_v25, %v1023_v23 }
 0x270   :  { %5005 = vmatpush1.bf16.msra.mxu1 %v5004_v36  ;;  %4783 = vmatprep.subr.bf16.mxu0 %v4782_v37  ;;  %v965_v36 = vld [vmem:[#allocation5 + $0x1760] sm:$0xff]  ;;  %v959_v37 = vld [vmem:[#allocation5 + $0x1730] sm:$0xff] }
 0x271   :  { %5007 = vmatprep.subr.bf16.mxu1 %v5006_v41  ;;  %v982_v41 = vld [vmem:[#allocation5 + $0x17e8] sm:$0xff]  ;;  %v4804_v45 = vpack.c.bf16 %v965_v36, %v957_v35  ;;  %v5028_v46 = vpack.c.bf16 %v967_v39, %v959_v37  ;;  %v1039_v35 = vld [vmem:[#allocation5 + $0x19b0] sm:$0xff]  ;;  %v5046_v36 = vpack.c.bf16 %v1048_v29, %v1040_v28  ;;  %v1101_v25 = vld [vmem:[#allocation5 + $0x1ba0] sm:$0xff] }
 0x272   :  { %v4806_v47 = vpack.c.bf16 %v982_v41, %v974_v40  ;;  %v1047_v37 = vld [vmem:[#allocation5 + $0x19f0] sm:$0xff]  ;;  %v1062_v39 = vld [vmem:[#allocation5 + $0x1a68] sm:$0xff]  ;;  %v1056_v40 = vld [vmem:[#allocation5 + $0x1a38] sm:$0xff] }
 0x273   :  { %4785 = vmatpush1.bf16.msra.mxu0 %v4784_v48  ;;  %v973_v48 = vld [vmem:[#allocation5 + $0x17a0] sm:$0xff]  ;;  %v1064_v41 = vld [vmem:[#allocation5 + $0x1a78] sm:$0xff]  ;;  %v1111_v29 = vld [vmem:[#allocation5 + $0x1bf0] sm:$0xff] }
 0x274   :  { %5009 = vmatpush1.bf16.msra.mxu1 %v5008_v49  ;;  %4787 = vmatprep.subr.bf16.mxu0 %v4786_v50  ;;  %v981_v49 = vld [vmem:[#allocation5 + $0x17e0] sm:$0xff]  ;;  %v975_v50 = vld [vmem:[#allocation5 + $0x17b0] sm:$0xff] }
 0x275   :  { %5011 = vmatprep.subr.bf16.mxu1 %v5010_v54  ;;  %v998_v54 = vld [vmem:[#allocation5 + $0x1868] sm:$0xff]  ;;  %v4808_v57 = vpack.c.bf16 %v981_v49, %v973_v48  ;;  %v5032_v58 = vpack.c.bf16 %v983_v52, %v975_v50  ;;  %v5050_v48 = vpack.c.bf16 %v1064_v41, %v1056_v40  ;;  %v1063_v49 = vld [vmem:[#allocation5 + $0x1a70] sm:$0xff]  ;;  %v1115_v52 = vlaneseq  ;;  %v2301_v41 = vld [vmem:[#allocation8 + $0x10] sm:$0xff] }
 0x276   :  { %v4810_v59 = vpack.c.bf16 %v998_v54, %v990_v53  ;;  %v1070_v50 = vld [vmem:[#allocation5 + $0x1aa8] sm:$0xff]  ;;  %v1072_v53 = vld [vmem:[#allocation5 + $0x1ab8] sm:$0xff] }
 0x277   :  { %4789 = vmatpush1.bf16.msra.mxu0 %v4788_v60  ;;  %v989_v60 = vld [vmem:[#allocation5 + $0x1820] sm:$0xff]  ;;  %v1080_v54 = vld [vmem:[#allocation5 + $0x1af8] sm:$0xff] }
 0x278   :  { %5013 = vmatpush1.bf16.msra.mxu1 %v5012_v61  ;;  %4791 = vmatprep.subr.bf16.mxu0 %v4790_v62  ;;  %v997_v61 = vld [vmem:[#allocation5 + $0x1860] sm:$0xff]  ;;  %v991_v62 = vld [vmem:[#allocation5 + $0x1830] sm:$0xff] }
 0x279   :  { %5015 = vmatprep.subr.bf16.mxu1 %v5014_v2  ;;  %v1014_v2 = vld [vmem:[#allocation5 + $0x18e8] sm:$0xff]  ;;  %v4812_v5 = vpack.c.bf16 %v997_v61, %v989_v60  ;;  %v5036_v6 = vpack.c.bf16 %v999_v0, %v991_v62  ;;  %v1071_v60 = vld [vmem:[#allocation5 + $0x1ab0] sm:$0xff]  ;;  %v5054_v61 = vpack.c.bf16 %v1080_v54, %v1072_v53  ;;  %v2313_v54 = vld [vmem:[#allocation8 + $0x70] sm:$0xff] }
 0x27a   :  { %v4814_v7 = vpack.c.bf16 %v1014_v2, %v1006_v1  ;;  %v1079_v62 = vld [vmem:[#allocation5 + $0x1af0] sm:$0xff]  ;;  %v1094_v0 = vld [vmem:[#allocation5 + $0x1b68] sm:$0xff]  ;;  %v6567_v1 = vshrl.u32 %v1115_v52, 7  ;;  %v1088_v2 = vld [vmem:[#allocation5 + $0x1b38] sm:$0xff] }
 0x27b   :  { %4793 = vmatpush1.bf16.msra.mxu0 %v4792_v8  ;;  %v1005_v8 = vld [vmem:[#allocation5 + $0x18a0] sm:$0xff]  ;;  %v2309_v52 = vld [vmem:[#allocation8 + $0x50] sm:$0xff] }
 0x27c   :  { %5017 = vmatpush1.bf16.msra.mxu1 %v5016_v9  ;;  %4795 = vmatprep.subr.bf16.mxu0 %v4794_v10  ;;  %v1013_v9 = vld [vmem:[#allocation5 + $0x18e0] sm:$0xff]  ;;  %v1007_v10 = vld [vmem:[#allocation5 + $0x18b0] sm:$0xff]  ;;  %v6574_v16 = vsub.s32 1, %v6567_v1 }
 0x27d   :  { %5019 = vmatprep.subr.bf16.mxu1 %v5018_v14  ;;  %v1030_v14 = vld [vmem:[#allocation5 + $0x1968] sm:$0xff]  ;;  %v4816_v18 = vpack.c.bf16 %v1013_v9, %v1005_v8  ;;  %v5040_v19 = vpack.c.bf16 %v1015_v12, %v1007_v10  ;;  %v1093_v8 = vld [vmem:[#allocation5 + $0x1b60] sm:$0xff]  ;;  %v1087_v9 = vld [vmem:[#allocation5 + $0x1b30] sm:$0xff] }
 0x27e   :  { %v1095_v12 = vld [vmem:[#allocation5 + $0x1b70] sm:$0xff] }
 0x27f   :  { %4797 = vmatpush1.bf16.msra.mxu0 %v4796_v20  ;;  %v4818_v20 = vpack.c.bf16 %v1030_v14, %v1022_v13  ;;  %v1102_v13 = vld [vmem:[#allocation5 + $0x1ba8] sm:$0xff]  ;;  %v5060_v23 = vpack.c.bf16 %v1095_v12, %v1087_v9  ;;  %v2326_v9 = vld [vmem:[#allocation8 + $0xd8] sm:$0xff] }
 0x280   :  { %5021 = vmatpush1.bf16.msra.mxu1 %v5020_v21  ;;  %4799 = vmatprep.subr.bf16.mxu0 %v4798_v22  ;;  %v1021_v21 = vld [vmem:[#allocation5 + $0x1920] sm:$0xff]  ;;  %v1110_v14 = vld [vmem:[#allocation5 + $0x1be8] sm:$0xff] }
 0x281   :  { %5023 = vmatprep.subr.bf16.mxu1 %v5022_v26  ;;  %v1029_v22 = vld [vmem:[#allocation5 + $0x1960] sm:$0xff]  ;;  %v1038_v26 = vld [vmem:[#allocation5 + $0x19a8] sm:$0xff] }
 0x282   :  { %v4820_v30 = vpack.c.bf16 %v1029_v22, %v1021_v21 }
 0x283   :  { %4801 = vmatpush1.bf16.msra.mxu0 %v4800_v32  ;;  %v4822_v32 = vpack.c.bf16 %v1046_v27, %v1038_v26  ;;  %v1109_v26 = vld [vmem:[#allocation5 + $0x1be0] sm:$0xff]  ;;  %v1103_v27 = vld [vmem:[#allocation5 + $0x1bb0] sm:$0xff] }
 0x284   :  { %5025 = vmatpush1.bf16.msra.mxu1 %v5024_v33  ;;  %4803 = vmatprep.subr.bf16.mxu0 %v4802_v34  ;;  %v1037_v33 = vld [vmem:[#allocation5 + $0x19a0] sm:$0xff] }
 0x285   :  { %5027 = vmatprep.subr.bf16.mxu1 %v5026_v38  ;;  %v1045_v34 = vld [vmem:[#allocation5 + $0x19e0] sm:$0xff]  ;;  %v1054_v38 = vld [vmem:[#allocation5 + $0x1a28] sm:$0xff] }
 0x286   :  { %v4824_v43 = vpack.c.bf16 %v1045_v34, %v1037_v33  ;;  %v4826_v44 = vpack.c.bf16 %v1062_v39, %v1054_v38  ;;  %v2302_v33 = vld [vmem:[#allocation8 + $0x18] sm:$0xff]  ;;  %v2299_v38 = vld [vmem:[#allocation8] sm:$0xff] }
 0x287   :  { %4805 = vmatpush1.bf16.msra.mxu0 %v4804_v45  ;;  %v1053_v45 = vld [vmem:[#allocation5 + $0x1a20] sm:$0xff]  ;;  %v2303_v39 = vld [vmem:[#allocation8 + $0x20] sm:$0xff] }
 0x288   :  { %5029 = vmatpush1.bf16.msra.mxu1 %v5028_v46  ;;  %4807 = vmatprep.subr.bf16.mxu0 %v4806_v47  ;;  %v1061_v46 = vld [vmem:[#allocation5 + $0x1a60] sm:$0xff]  ;;  %v1055_v47 = vld [vmem:[#allocation5 + $0x1a30] sm:$0xff] }
 0x289   :  { %5031 = vmatprep.subr.bf16.mxu1 %v5030_v51  ;;  %v1078_v51 = vld [vmem:[#allocation5 + $0x1ae8] sm:$0xff]  ;;  %v4828_v55 = vpack.c.bf16 %v1061_v46, %v1053_v45  ;;  %v5052_v56 = vpack.c.bf16 %v1063_v49, %v1055_v47  ;;  %v2306_v34 = vld [vmem:[#allocation8 + $0x38] sm:$0xff]  ;;  %v2312_v45 = vld [vmem:[#allocation8 + $0x68] sm:$0xff]  ;;  %v5068_v46 = vpack.c.bf16 %v2303_v39, %v2299_v38 }
 0x28a   :  { %v5322_v40 = vpack.c.bf16 %v2306_v34, %v2302_v33  ;;  %v2310_v47 = vld [vmem:[#allocation8 + $0x58] sm:$0xff]  ;;  %v2333_v33 = vld [vmem:[#allocation8 + $0x110] sm:$0xff] }
 0x28b   :  { %4809 = vmatpush1.bf16.msra.mxu0 %v4808_v57  ;;  %v4830_v57 = vpack.c.bf16 %v1078_v51, %v1070_v50  ;;  %v2307_v50 = vld [vmem:[#allocation8 + $0x40] sm:$0xff]  ;;  %v2342_v38 = vld [vmem:[#allocation8 + $0x158] sm:$0xff] }
 0x28c   :  { %5033 = vmatpush1.bf16.msra.mxu1 %v5032_v58  ;;  %4811 = vmatprep.subr.bf16.mxu0 %v4810_v59  ;;  %v1069_v58 = vld [vmem:[#allocation5 + $0x1aa0] sm:$0xff]  ;;  %v2311_v51 = vld [vmem:[#allocation8 + $0x60] sm:$0xff] }
 0x28d   :  { %5035 = vmatprep.subr.bf16.mxu1 %v5034_v63  ;;  %v1077_v59 = vld [vmem:[#allocation5 + $0x1ae0] sm:$0xff]  ;;  %v1086_v63 = vld [vmem:[#allocation5 + $0x1b28] sm:$0xff] }
 0x28e   :  { %1930 = vmatmul.mubr.f32.vlgmr.msra.gmra.mrb[2].mxu0 %v5947_v15  ;;  %v4832_v4 = vpack.c.bf16 %v1077_v59, %v1069_v58  ;;  %v5948_v58 = vld [vmem:[#allocation2 + $0x30] sm:$0xff]  ;;  %v2346_v39 = vld [vmem:[#allocation8 + $0x178] sm:$0xff] }
 0x28f   :  { %4813 = vmatpush1.bf16.msra.mxu0 %v4812_v5  ;;  %2214 = vmatmul.mubr.f32.vlgmr.msra.gmra.mrb[2].mxu1 %v5947_v15  ;;  %v5056_v5 = vpack.c.bf16 %v1079_v62, %v1071_v60  ;;  %v2318_v60 = vld [vmem:[#allocation8 + $0x98] sm:$0xff]  ;;  %v5072_v62 = vpack.c.bf16 %v2311_v51, %v2307_v50 }
 0x290   :  { %5037 = vmatpush1.bf16.msra.mxu1 %v5036_v6  ;;  %4815 = vmatprep.subr.bf16.mxu0 %v4814_v7  ;;  %v4834_v6 = vpack.c.bf16 %v1094_v0, %v1086_v63  ;;  %v1085_v7 = vld [vmem:[#allocation5 + $0x1b20] sm:$0xff]  ;;  %v5328_v63 = vpack.c.bf16 %v2313_v54, %v2309_v52 }
 0x291   :  { %5039 = vmatprep.subr.bf16.mxu1 %v5038_v11  ;;  %2000 = vmatprep.mubr.f32.mxu0 %v6320_v42  ;;  %v5058_v11 = vpack.c.bf16 %v1096_v3, %v1088_v2  ;;  %v4836_v22 = vpack.c.bf16 %v1093_v8, %v1085_v7  ;;  %v2315_v2 = vld [vmem:[#allocation8 + $0x80] sm:$0xff]  ;;  %v2324_v7 = vld [vmem:[#allocation8 + $0xc8] sm:$0xff]  ;;  %v2350_v50 = vld [vmem:[#allocation8 + $0x198] sm:$0xff] }
 0x292   :  { %2284 = vmatprep.mubr.f32.mxu1 %v6320_v42  ;;  %v5048_v42 = vpack.c.bf16 %v1047_v37, %v1039_v35  ;;  %v4840_v35 = vpack.c.bf16 %v1109_v26, %v1101_v25  ;;  %v2319_v3 = vld [vmem:[#allocation8 + $0xa0] sm:$0xff]  ;;  %v2328_v8 = vld [vmem:[#allocation8 + $0xe8] sm:$0xff]  ;;  %v2334_v26 = vld [vmem:[#allocation8 + $0x118] sm:$0xff] }
 0x293   :  { %4817 = vmatpush1.bf16.msra.mxu0 %v4816_v18  ;;  %v1104_v18 = vld [vmem:[#allocation5 + $0x1bb8] sm:$0xff]  ;;  %v5076_v12 = vpack.c.bf16 %v2319_v3, %v2315_v2  ;;  %v2336_v25 = vld [vmem:[#allocation8 + $0x128] sm:$0xff]  ;;  %v2354_v51 = vld [vmem:[#allocation8 + $0x1b8] sm:$0xff] }
 0x294   :  { %5041 = vmatpush1.bf16.msra.mxu1 %v5040_v19  ;;  %4819 = vmatprep.subr.bf16.mxu0 %v4818_v20  ;;  %v1112_v19 = vld [vmem:[#allocation5 + $0x1bf8] sm:$0xff]  ;;  %v6576_v20 = vld [vmem:[#allocation7] sm:$0xff] }
 0x295   :  { %5043 = vmatprep.subr.bf16.mxu1 %v5042_v24  ;;  %v4838_v24 = vpack.c.bf16 %v1110_v14, %v1102_v13  ;;  %v5062_v28 = vpack.c.bf16 %v1112_v19, %v1104_v18  ;;  %v5078_v14 = vpack.c.bf16 %v2328_v8, %v2324_v7  ;;  %v2327_v18 = vld [vmem:[#allocation8 + $0xe0] sm:$0xff]  ;;  %v2325_v19 = vld [vmem:[#allocation8 + $0xd0] sm:$0xff] }
 0x296   :  { %v2361_v8 = vld [vmem:[#allocation8 + $0x1f0] sm:$0xff] }
 0x297   :  { %4821 = vmatpush1.bf16.msra.mxu0 %v4820_v30  ;;  %v2300_v30 = vld [vmem:[#allocation8 + $0x8] sm:$0xff] }
 0x298   :  { %5045 = vmatpush1.bf16.msra.mxu1 %v5044_v31  ;;  %4823 = vmatprep.subr.bf16.mxu0 %v4822_v32  ;;  %v2304_v31 = vld [vmem:[#allocation8 + $0x28] sm:$0xff]  ;;  %v1122_v32 = vrot.slane %v6576_v20, %v6574_v16 }
 0x299   :  { %5047 = vmatprep.subr.bf16.mxu1 %v5046_v36  ;;  %v5064_v36 = vpack.c.bf16 %v1111_v29, %v1103_v27  ;;  %v5066_v37 = vpack.c.bf16 %v2304_v31, %v2300_v30  ;;  %v2338_v27 = vld [vmem:[#allocation8 + $0x138] sm:$0xff]  ;;  %v2331_v31 = vld [vmem:[#allocation8 + $0x100] sm:$0xff] }
 0x29a   :  { %v5338_v34 = vpack.c.bf16 %v2338_v27, %v2334_v26  ;;  %v2372_v26 = vld [vmem:[#allocation8 + $0x248] sm:$0xff] }
 0x29b   :  { %4825 = vmatpush1.bf16.msra.mxu0 %v4824_v43  ;;  %v2305_v43 = vld [vmem:[#allocation8 + $0x30] sm:$0xff]  ;;  %v2376_v27 = vld [vmem:[#allocation8 + $0x268] sm:$0xff] }
 0x29c   :  { %5049 = vmatpush1.bf16.msra.mxu1 %v5048_v42  ;;  %4827 = vmatprep.subr.bf16.mxu0 %v4826_v44  ;;  %v2308_v44 = vld [vmem:[#allocation8 + $0x48] sm:$0xff]  ;;  %v5324_v49 = vpack.c.bf16 %v2305_v43, %v2301_v41 }
 0x29d   :  { %5051 = vmatprep.subr.bf16.mxu1 %v5050_v48  ;;  %v2314_v48 = vld [vmem:[#allocation8 + $0x78] sm:$0xff]  ;;  %v5070_v53 = vpack.c.bf16 %v2312_v45, %v2308_v44  ;;  %v2343_v44 = vld [vmem:[#allocation8 + $0x160] sm:$0xff]  ;;  %v2341_v45 = vld [vmem:[#allocation8 + $0x150] sm:$0xff] }
 0x29e   :  { %v5326_v59 = vpack.c.bf16 %v2314_v48, %v2310_v47  ;;  %v2345_v47 = vld [vmem:[#allocation8 + $0x170] sm:$0xff]  ;;  %v2348_v48 = vld [vmem:[#allocation8 + $0x188] sm:$0xff] }
 0x29f   :  { %4829 = vmatpush1.bf16.msra.mxu0 %v4828_v55  ;;  %v2316_v55 = vld [vmem:[#allocation8 + $0x88] sm:$0xff] }
 0x2a0   :  { %5053 = vmatpush1.bf16.msra.mxu1 %v5052_v56  ;;  %4831 = vmatprep.subr.bf16.mxu0 %v4830_v57  ;;  %v2320_v56 = vld [vmem:[#allocation8 + $0xa8] sm:$0xff] }
 0x2a1   :  { %v6569_v10 = vpop.f32.mrb[0].mxu0  ;;  %5055 = vmatprep.subr.bf16.mxu1 %v5054_v61  ;;  %v2322_v61 = vld [vmem:[#allocation8 + $0xb8] sm:$0xff]  ;;  %v5074_v0 = vpack.c.bf16 %v2320_v56, %v2316_v55  ;;  %v2347_v55 = vld [vmem:[#allocation8 + $0x180] sm:$0xff] }
 0x2a2   :  { %v6571_v15 = vpop.f32.mrb[0].mxu1  ;;  %v1436_v17 = vpop.f32.mrb[1].mxu0  ;;  %v2351_v56 = vld [vmem:[#allocation8 + $0x1a0] sm:$0xff] }
 0x2a3   :  { %v6578_v21 = vpop.f32.mrb[1].mxu1  ;;  %4833 = vmatpush1.bf16.msra.mxu0 %v4832_v4  ;;  %v5867_v42 = vadd.f32 %v1436_v17, %v1122_v32  ;;  %v2317_v4 = vld [vmem:[#allocation8 + $0x90] sm:$0xff]  ;;  %v2323_v17 = vld [vmem:[#allocation8 + $0xc0] sm:$0xff] }
 0x2a4   :  { %5057 = vmatpush1.bf16.msra.mxu1 %v5056_v5  ;;  %4835 = vmatprep.subr.bf16.mxu0 %v4834_v6  ;;  %v5330_v5 = vpack.c.bf16 %v2322_v61, %v2318_v60  ;;  %v2321_v6 = vld [vmem:[#allocation8 + $0xb0] sm:$0xff]  ;;  %v2335_v32 = vld [vmem:[#allocation8 + $0x120] sm:$0xff]  ;;  %v2356_v60 = vld [vmem:[#allocation8 + $0x1c8] sm:$0xff] }
 0x2a5   :  { %5059 = vmatprep.subr.bf16.mxu1 %v5058_v11  ;;  %v2292_v57 = vmax.f32 %v5867_v42, 0.0  ;;  %v2330_v11 = vld [vmem:[#allocation8 + $0xf8] sm:$0xff]  ;;  %v5332_v13 = vpack.c.bf16 %v2321_v6, %v2317_v4  ;;  %v2339_v42 = vld [vmem:[#allocation8 + $0x140] sm:$0xff]  ;;  %v2360_v61 = vld [vmem:[#allocation8 + $0x1e8] sm:$0xff] }
 0x2a6   :  { %v5088_v52 = vpack.c.bf16 %v2343_v44, %v2339_v42  ;;  %v5094_v3 = vpack.c.bf16 %v2360_v61, %v2356_v60  ;;  %v2355_v4 = vld [vmem:[#allocation8 + $0x1c0] sm:$0xff]  ;;  %v2357_v6 = vld [vmem:[#allocation8 + $0x1d0] sm:$0xff] }
 0x2a7   :  { %4837 = vmatpush1.bf16.msra.mxu0 %v4836_v22  ;;  %v5334_v22 = vpack.c.bf16 %v2330_v11, %v2326_v9  ;;  %v2364_v9 = vld [vmem:[#allocation8 + $0x208] sm:$0xff]  ;;  %v2393_v61 = vld [vmem:[#allocation8 + $0x2f0] sm:$0xff] }
 0x2a8   :  { %5061 = vmatpush1.bf16.msra.mxu1 %v5060_v23  ;;  %4839 = vmatprep.subr.bf16.mxu0 %v4838_v24  ;;  %v2329_v23 = vld [vmem:[#allocation8 + $0xf0] sm:$0xff]  ;;  %v2332_v24 = vld [vmem:[#allocation8 + $0x108] sm:$0xff] }
 0x2a9   :  { %5063 = vmatprep.subr.bf16.mxu1 %v5062_v28  ;;  %v5080_v28 = vpack.c.bf16 %v2327_v18, %v2323_v17  ;;  %v5336_v29 = vpack.c.bf16 %v2329_v23, %v2325_v19  ;;  %v5082_v30 = vpack.c.bf16 %v2336_v25, %v2332_v24  ;;  %v2368_v11 = vld [vmem:[#allocation8 + $0x228] sm:$0xff]  ;;  %v5352_v17 = vpack.c.bf16 %v2361_v8, %v2357_v6  ;;  %v2363_v19 = vld [vmem:[#allocation8 + $0x200] sm:$0xff]  ;;  %v2365_v23 = vld [vmem:[#allocation8 + $0x210] sm:$0xff] }
 0x2aa   :  { %v5098_v18 = vpack.c.bf16 %v2368_v11, %v2364_v9  ;;  %v2369_v25 = vld [vmem:[#allocation8 + $0x230] sm:$0xff]  ;;  %v2395_v6 = vld [vmem:[#allocation8 + $0x300] sm:$0xff] }
 0x2ab   :  { %4841 = vmatpush1.bf16.msra.mxu0 %v4840_v35  ;;  %v2337_v35 = vld [vmem:[#allocation8 + $0x130] sm:$0xff] }
 0x2ac   :  { %5065 = vmatpush1.bf16.msra.mxu1 %v5064_v36  ;;  %5067 = vmatprep.subr.bf16.mxu0 %v5066_v37  ;;  %v2340_v36 = vld [vmem:[#allocation8 + $0x148] sm:$0xff]  ;;  %v5340_v41 = vpack.c.bf16 %v2337_v35, %v2333_v33  ;;  %v2371_v33 = vld [vmem:[#allocation8 + $0x240] sm:$0xff]  ;;  %v2373_v35 = vld [vmem:[#allocation8 + $0x250] sm:$0xff] }
 0x2ad   :  { %5323 = vmatprep.subr.bf16.mxu1 %v5322_v40  ;;  %v2344_v37 = vld [vmem:[#allocation8 + $0x168] sm:$0xff]  ;;  %v5084_v40 = vpack.c.bf16 %v2335_v32, %v2331_v31  ;;  %v5356_v31 = vpack.c.bf16 %v2369_v25, %v2365_v23  ;;  %v5102_v32 = vpack.c.bf16 %v2376_v27, %v2372_v26  ;;  %v2397_v8 = vld [vmem:[#allocation8 + $0x310] sm:$0xff]  ;;  %v2403_v23 = vld [vmem:[#allocation8 + $0x340] sm:$0xff] }
 0x2ae   :  { %2001 = vmatmul.mubr.f32.vlgmr.msra.gmra.mrb[2].mxu0 %v5948_v58  ;;  %v5086_v43 = vpack.c.bf16 %v2344_v37, %v2340_v36  ;;  %v2377_v37 = vld [vmem:[#allocation8 + $0x270] sm:$0xff] }
 0x2af   :  { %2285 = vmatmul.mubr.f32.vlgmr.msra.gmra.mrb[2].mxu1 %v5948_v58  ;;  %5069 = vmatpush1.bf16.msra.mxu0 %v5068_v46  ;;  %v5342_v46 = vpack.c.bf16 %v2346_v39, %v2342_v38  ;;  %v5346_v58 = vpack.c.bf16 %v2354_v51, %v2350_v50  ;;  %v2380_v38 = vld [vmem:[#allocation8 + $0x288] sm:$0xff]  ;;  %v5360_v42 = vpack.c.bf16 %v2377_v37, %v2373_v35  ;;  %v2401_v11 = vld [vmem:[#allocation8 + $0x330] sm:$0xff]  ;;  %v2415_v37 = vld [vmem:[#allocation8 + $0x3a0] sm:$0xff] }
 0x2b0   :  { %2897 = vmatprep.mubr.f32.mxu0 %v2292_v57  ;;  %5325 = vmatpush1.bf16.msra.mxu1 %v5324_v49  ;;  %v2352_v49 = vld [vmem:[#allocation8 + $0x1a8] sm:$0xff]  ;;  %v2405_v25 = vld [vmem:[#allocation8 + $0x350] sm:$0xff] }
 0x2b1   :  { %3181 = vmatprep.mubr.f32.mxu1 %v2292_v57  ;;  %5071 = vmatprep.subr.bf16.mxu0 %v5070_v53  ;;  %v5344_v53 = vpack.c.bf16 %v2345_v47, %v2341_v45  ;;  %v5090_v54 = vpack.c.bf16 %v2352_v49, %v2348_v48  ;;  %v2349_v57 = vld [vmem:[#allocation8 + $0x190] sm:$0xff]  ;;  %v2384_v39 = vld [vmem:[#allocation8 + $0x2a8] sm:$0xff]  ;;  %v2379_v45 = vld [vmem:[#allocation8 + $0x280] sm:$0xff] }
 0x2b2   :  { %5327 = vmatprep.subr.bf16.mxu1 %v5326_v59  ;;  %v2353_v59 = vld [vmem:[#allocation8 + $0x1b0] sm:$0xff]  ;;  %v5106_v44 = vpack.c.bf16 %v2384_v39, %v2380_v38  ;;  %v2388_v50 = vld [vmem:[#allocation8 + $0x2c8] sm:$0xff] }
 0x2b3   :  { %5073 = vmatpush1.bf16.msra.mxu0 %v5072_v62  ;;  %v2358_v62 = vld [vmem:[#allocation8 + $0x1d8] sm:$0xff]  ;;  %v5348_v2 = vpack.c.bf16 %v2353_v59, %v2349_v57  ;;  %v2381_v47 = vld [vmem:[#allocation8 + $0x290] sm:$0xff]  ;;  %v2392_v51 = vld [vmem:[#allocation8 + $0x2e8] sm:$0xff] }
 0x2b4   :  { %5329 = vmatpush1.bf16.msra.mxu1 %v5328_v63  ;;  %5075 = vmatprep.subr.bf16.mxu0 %v5074_v0  ;;  %v2362_v63 = vld [vmem:[#allocation8 + $0x1f8] sm:$0xff]  ;;  %v5092_v0 = vpack.c.bf16 %v2351_v56, %v2347_v55  ;;  %v2385_v49 = vld [vmem:[#allocation8 + $0x2b0] sm:$0xff]  ;;  %v5110_v56 = vpack.c.bf16 %v2392_v51, %v2388_v50  ;;  %v2387_v57 = vld [vmem:[#allocation8 + $0x2c0] sm:$0xff] }
 0x2b5   :  { %5331 = vmatprep.subr.bf16.mxu1 %v5330_v5  ;;  %v2359_v5 = vld [vmem:[#allocation8 + $0x1e0] sm:$0xff]  ;;  %v5350_v7 = vpack.c.bf16 %v2362_v63, %v2358_v62  ;;  %v5364_v55 = vpack.c.bf16 %v2385_v49, %v2381_v47  ;;  %v2389_v59 = vld [vmem:[#allocation8 + $0x2d0] sm:$0xff]  ;;  %v2396_v62 = vld [vmem:[#allocation8 + $0x308] sm:$0xff] }
 0x2b6   :  { %v2400_v63 = vld [vmem:[#allocation8 + $0x328] sm:$0xff]  ;;  %v2409_v27 = vld [vmem:[#allocation8 + $0x370] sm:$0xff]  ;;  %v2419_v50 = vld [vmem:[#allocation8 + $0x3c0] sm:$0xff] }
 0x2b7   :  { %5077 = vmatpush1.bf16.msra.mxu0 %v5076_v12  ;;  %v2366_v12 = vld [vmem:[#allocation8 + $0x218] sm:$0xff]  ;;  %v2413_v38 = vld [vmem:[#allocation8 + $0x390] sm:$0xff]  ;;  %v2423_v51 = vld [vmem:[#allocation8 + $0x3e0] sm:$0xff] }
 0x2b8   :  { %5333 = vmatpush1.bf16.msra.mxu1 %v5332_v13  ;;  %5079 = vmatprep.subr.bf16.mxu0 %v5078_v14  ;;  %v2370_v13 = vld [vmem:[#allocation8 + $0x238] sm:$0xff]  ;;  %v5096_v14 = vpack.c.bf16 %v2359_v5, %v2355_v4  ;;  %v5368_v4 = vpack.c.bf16 %v2393_v61, %v2389_v59  ;;  %v5114_v5 = vpack.c.bf16 %v2400_v63, %v2396_v62 }
 0x2b9   :  { %5335 = vmatprep.subr.bf16.mxu1 %v5334_v22  ;;  %v2367_v22 = vld [vmem:[#allocation8 + $0x220] sm:$0xff]  ;;  %v5354_v24 = vpack.c.bf16 %v2370_v13, %v2366_v12  ;;  %v2404_v12 = vld [vmem:[#allocation8 + $0x348] sm:$0xff]  ;;  %v2434_v59 = vld [vmem:[#allocation8 + $0x438] sm:$0xff] }
 0x2ba   :  { %v2408_v13 = vld [vmem:[#allocation8 + $0x368] sm:$0xff] }
 0x2bb   :  { %5081 = vmatpush1.bf16.msra.mxu0 %v5080_v28  ;;  %v2374_v28 = vld [vmem:[#allocation8 + $0x258] sm:$0xff] }
 0x2bc   :  { %5337 = vmatpush1.bf16.msra.mxu1 %v5336_v29  ;;  %5083 = vmatprep.subr.bf16.mxu0 %v5082_v30  ;;  %v2378_v29 = vld [vmem:[#allocation8 + $0x278] sm:$0xff]  ;;  %v5100_v30 = vpack.c.bf16 %v2367_v22, %v2363_v19  ;;  %v5372_v19 = vpack.c.bf16 %v2401_v11, %v2397_v8  ;;  %v5118_v22 = vpack.c.bf16 %v2408_v13, %v2404_v12  ;;  %v2435_v13 = vld [vmem:[#allocation8 + $0x440] sm:$0xff] }
 0x2bd   :  { %5339 = vmatprep.subr.bf16.mxu1 %v5338_v34  ;;  %v2375_v34 = vld [vmem:[#allocation8 + $0x260] sm:$0xff]  ;;  %v5358_v36 = vpack.c.bf16 %v2378_v29, %v2374_v28  ;;  %v2412_v28 = vld [vmem:[#allocation8 + $0x388] sm:$0xff]  ;;  %v2442_v11 = vld [vmem:[#allocation8 + $0x478] sm:$0xff] }
 0x2be   :  { %v2416_v29 = vld [vmem:[#allocation8 + $0x3a8] sm:$0xff] }
 0x2bf   :  { %5085 = vmatpush1.bf16.msra.mxu0 %v5084_v40  ;;  %v2382_v40 = vld [vmem:[#allocation8 + $0x298] sm:$0xff]  ;;  %v5122_v35 = vpack.c.bf16 %v2416_v29, %v2412_v28 }
 0x2c0   :  { %5341 = vmatpush1.bf16.msra.mxu1 %v5340_v41  ;;  %5087 = vmatprep.subr.bf16.mxu0 %v5086_v43  ;;  %v2386_v41 = vld [vmem:[#allocation8 + $0x2b8] sm:$0xff]  ;;  %v5104_v43 = vpack.c.bf16 %v2375_v34, %v2371_v33  ;;  %v6583_v33 = vsub.s32 0, %v6567_v1  ;;  %v5376_v34 = vpack.c.bf16 %v2409_v27, %v2405_v25 }
 0x2c1   :  { %5343 = vmatprep.subr.bf16.mxu1 %v5342_v46  ;;  %v2383_v46 = vld [vmem:[#allocation8 + $0x2a0] sm:$0xff]  ;;  %v5362_v48 = vpack.c.bf16 %v2386_v41, %v2382_v40  ;;  %v2417_v40 = vld [vmem:[#allocation8 + $0x3b0] sm:$0xff]  ;;  %v2420_v41 = vld [vmem:[#allocation8 + $0x3c8] sm:$0xff] }
 0x2c2   :  { %v1118_v47 = vrot.slane %v6576_v20, %v6583_v33  ;;  %v2446_v25 = vld [vmem:[#allocation8 + $0x498] sm:$0xff] }
 0x2c3   :  { %5089 = vmatpush1.bf16.msra.mxu0 %v5088_v52  ;;  %v2390_v52 = vld [vmem:[#allocation8 + $0x2d8] sm:$0xff] }
 0x2c4   :  { %5345 = vmatpush1.bf16.msra.mxu1 %v5344_v53  ;;  %5091 = vmatprep.subr.bf16.mxu0 %v5090_v54  ;;  %v2394_v53 = vld [vmem:[#allocation8 + $0x2f8] sm:$0xff]  ;;  %v5108_v54 = vpack.c.bf16 %v2383_v46, %v2379_v45  ;;  %v5866_v61 = vadd.f32 %v6569_v10, %v1118_v47 }
 0x2c5   :  { %5347 = vmatprep.subr.bf16.mxu1 %v5346_v58  ;;  %v2391_v58 = vld [vmem:[#allocation8 + $0x2e0] sm:$0xff]  ;;  %v5366_v60 = vpack.c.bf16 %v2394_v53, %v2390_v52  ;;  %v2426_v45 = vld [vmem:[#allocation8 + $0x3f8] sm:$0xff]  ;;  %v2421_v52 = vld [vmem:[#allocation8 + $0x3d0] sm:$0xff] }
 0x2c6   :  { %v2291_v12 = vmax.f32 %v5866_v61, 0.0  ;;  %v2468_v61 = vld [vmem:[#allocation8 + $0x548] sm:$0xff] }
 0x2c7   :  { %5093 = vmatpush1.bf16.msra.mxu0 %v5092_v0  ;;  %v2398_v0 = vld [vmem:[#allocation8 + $0x318] sm:$0xff] }
 0x2c8   :  { %5349 = vmatpush1.bf16.msra.mxu1 %v5348_v2  ;;  %5095 = vmatprep.subr.bf16.mxu0 %v5094_v3  ;;  %v2402_v2 = vld [vmem:[#allocation8 + $0x338] sm:$0xff]  ;;  %v5112_v3 = vpack.c.bf16 %v2391_v58, %v2387_v57 }
 0x2c9   :  { %5351 = vmatprep.subr.bf16.mxu1 %v5350_v7  ;;  %v2399_v7 = vld [vmem:[#allocation8 + $0x320] sm:$0xff]  ;;  %v5370_v9 = vpack.c.bf16 %v2402_v2, %v2398_v0  ;;  %v2430_v58 = vld [vmem:[#allocation8 + $0x418] sm:$0xff] }
 0x2ca   :  { %v2427_v0 = vld [vmem:[#allocation8 + $0x400] sm:$0xff] }
 0x2cb   :  { %5097 = vmatpush1.bf16.msra.mxu0 %v5096_v14  ;;  %v2406_v14 = vld [vmem:[#allocation8 + $0x358] sm:$0xff]  ;;  %v2431_v2 = vld [vmem:[#allocation8 + $0x420] sm:$0xff] }
 0x2cc   :  { %5353 = vmatpush1.bf16.msra.mxu1 %v5352_v17  ;;  %5099 = vmatprep.subr.bf16.mxu0 %v5098_v18  ;;  %v2410_v17 = vld [vmem:[#allocation8 + $0x378] sm:$0xff]  ;;  %v5116_v18 = vpack.c.bf16 %v2399_v7, %v2395_v6  ;;  %v2436_v7 = vld [vmem:[#allocation8 + $0x448] sm:$0xff]  ;;  %v5132_v8 = vpack.c.bf16 %v2431_v2, %v2427_v0 }
 0x2cd   :  { %5355 = vmatprep.subr.bf16.mxu1 %v5354_v24  ;;  %v2407_v24 = vld [vmem:[#allocation8 + $0x360] sm:$0xff]  ;;  %v5374_v26 = vpack.c.bf16 %v2410_v17, %v2406_v14  ;;  %v2437_v17 = vld [vmem:[#allocation8 + $0x450] sm:$0xff]  ;;  %v2474_v0 = vld [vmem:[#allocation8 + $0x578] sm:$0xff] }
 0x2ce   :  { %v2439_v14 = vld [vmem:[#allocation8 + $0x460] sm:$0xff] }
 0x2cf   :  { %5101 = vmatpush1.bf16.msra.mxu0 %v5100_v30  ;;  %v2414_v30 = vld [vmem:[#allocation8 + $0x398] sm:$0xff]  ;;  %v5136_v27 = vpack.c.bf16 %v2439_v14, %v2435_v13 }
 0x2d0   :  { %5357 = vmatpush1.bf16.msra.mxu1 %v5356_v31  ;;  %5103 = vmatprep.subr.bf16.mxu0 %v5102_v32  ;;  %v2418_v31 = vld [vmem:[#allocation8 + $0x3b8] sm:$0xff]  ;;  %v5120_v32 = vpack.c.bf16 %v2407_v24, %v2403_v23  ;;  %v2448_v23 = vld [vmem:[#allocation8 + $0x4a8] sm:$0xff] }
 0x2d1   :  { %5359 = vmatprep.subr.bf16.mxu1 %v5358_v36  ;;  %v2411_v36 = vld [vmem:[#allocation8 + $0x380] sm:$0xff]  ;;  %v5378_v39 = vpack.c.bf16 %v2418_v31, %v2414_v30 }
 0x2d2   :  { %v5124_v46 = vpack.c.bf16 %v2415_v37, %v2411_v36  ;;  %v2443_v30 = vld [vmem:[#allocation8 + $0x480] sm:$0xff]  ;;  %v2452_v36 = vld [vmem:[#allocation8 + $0x4c8] sm:$0xff] }
 0x2d3   :  { %5105 = vmatpush1.bf16.msra.mxu0 %v5104_v43  ;;  %v2424_v43 = vld [vmem:[#allocation8 + $0x3e8] sm:$0xff]  ;;  %v2447_v31 = vld [vmem:[#allocation8 + $0x4a0] sm:$0xff] }
 0x2d4   :  { %5361 = vmatpush1.bf16.msra.mxu1 %v5360_v42  ;;  %5107 = vmatprep.subr.bf16.mxu0 %v5106_v44  ;;  %v1129_v42 = vsub.s32 3, %v6567_v1  ;;  %v2422_v44 = vld [vmem:[#allocation8 + $0x3d8] sm:$0xff]  ;;  %v5126_v49 = vpack.c.bf16 %v2424_v43, %v2420_v41  ;;  %v2456_v37 = vld [vmem:[#allocation8 + $0x4e8] sm:$0xff] }
 0x2d5   :  { %5363 = vmatprep.subr.bf16.mxu1 %v5362_v48  ;;  %v5380_v48 = vpack.c.bf16 %v2417_v40, %v2413_v38  ;;  %v5382_v53 = vpack.c.bf16 %v2426_v45, %v2422_v44  ;;  %v2454_v38 = vld [vmem:[#allocation8 + $0x4d8] sm:$0xff]  ;;  %v5140_v40 = vpack.c.bf16 %v2447_v31, %v2443_v30  ;;  %v5142_v43 = vpack.c.bf16 %v2456_v37, %v2452_v36  ;;  %v2451_v44 = vld [vmem:[#allocation8 + $0x4c0] sm:$0xff]  ;;  %v2489_v36 = vld [vmem:[#allocation8 + $0x5f0] sm:$0xff] }
 0x2d6   :  { %v1130_v57 = vrot.slane %v6576_v20, %v1129_v42  ;;  %v2440_v20 = vld [vmem:[#allocation8 + $0x468] sm:$0xff]  ;;  %v2455_v45 = vld [vmem:[#allocation8 + $0x4e0] sm:$0xff] }
 0x2d7   :  { %5109 = vmatpush1.bf16.msra.mxu0 %v5108_v54  ;;  %v2425_v54 = vld [vmem:[#allocation8 + $0x3f0] sm:$0xff]  ;;  %v2483_v31 = vld [vmem:[#allocation8 + $0x5c0] sm:$0xff]  ;;  %v2492_v37 = vld [vmem:[#allocation8 + $0x608] sm:$0xff] }
 0x2d8   :  { %5365 = vmatpush1.bf16.msra.mxu1 %v5364_v55  ;;  %5111 = vmatprep.subr.bf16.mxu0 %v5110_v56  ;;  %v2428_v55 = vld [vmem:[#allocation8 + $0x408] sm:$0xff]  ;;  %v5384_v62 = vpack.c.bf16 %v2425_v54, %v2421_v52  ;;  %v5869_v6 = vadd.f32 %v6578_v21, %v1130_v57  ;;  %v2466_v52 = vld [vmem:[#allocation8 + $0x538] sm:$0xff]  ;;  %v2463_v57 = vld [vmem:[#allocation8 + $0x520] sm:$0xff] }
 0x2d9   :  { %5367 = vmatprep.subr.bf16.mxu1 %v5366_v60  ;;  %v2432_v56 = vld [vmem:[#allocation8 + $0x428] sm:$0xff]  ;;  %v5128_v60 = vpack.c.bf16 %v2423_v51, %v2419_v50  ;;  %v2462_v51 = vld [vmem:[#allocation8 + $0x518] sm:$0xff] }
 0x2da   :  { %v5130_v63 = vpack.c.bf16 %v2432_v56, %v2428_v55  ;;  %v2294_v24 = vmax.f32 %v5869_v6, 0.0  ;;  %v2464_v50 = vld [vmem:[#allocation8 + $0x528] sm:$0xff]  ;;  %v2459_v56 = vld [vmem:[#allocation8 + $0x500] sm:$0xff] }
 0x2db   :  { %5113 = vmatpush1.bf16.msra.mxu0 %v5112_v3  ;;  %v5386_v3 = vpack.c.bf16 %v2434_v59, %v2430_v58  ;;  %v2461_v58 = vld [vmem:[#allocation8 + $0x510] sm:$0xff]  ;;  %v5402_v59 = vpack.c.bf16 %v2466_v52, %v2462_v51  ;;  %v5148_v2 = vpack.c.bf16 %v2463_v57, %v2459_v56  ;;  %v2471_v6 = vld [vmem:[#allocation8 + $0x560] sm:$0xff]  ;;  %v2504_v51 = vld [vmem:[#allocation8 + $0x668] sm:$0xff] }
 0x2dc   :  { %5369 = vmatpush1.bf16.msra.mxu1 %v5368_v4  ;;  %5115 = vmatprep.subr.bf16.mxu0 %v5114_v5  ;;  %v2429_v4 = vld [vmem:[#allocation8 + $0x410] sm:$0xff]  ;;  %v2502_v52 = vld [vmem:[#allocation8 + $0x658] sm:$0xff]  ;;  %v2499_v57 = vld [vmem:[#allocation8 + $0x640] sm:$0xff] }
 0x2dd   :  { %5371 = vmatprep.subr.bf16.mxu1 %v5370_v9  ;;  %v2433_v5 = vld [vmem:[#allocation8 + $0x430] sm:$0xff]  ;;  %v2438_v9 = vld [vmem:[#allocation8 + $0x458] sm:$0xff] }
 0x2de   :  { %v5388_v10 = vpack.c.bf16 %v2433_v5, %v2429_v4  ;;  %v5390_v21 = vpack.c.bf16 %v2442_v11, %v2438_v9  ;;  %v2467_v5 = vld [vmem:[#allocation8 + $0x540] sm:$0xff]  ;;  %v2476_v9 = vld [vmem:[#allocation8 + $0x588] sm:$0xff] }
 0x2df   :  { %5117 = vmatpush1.bf16.msra.mxu0 %v5116_v18  ;;  %v5134_v18 = vpack.c.bf16 %v2440_v20, %v2436_v7  ;;  %v2469_v7 = vld [vmem:[#allocation8 + $0x550] sm:$0xff]  ;;  %v2480_v11 = vld [vmem:[#allocation8 + $0x5a8] sm:$0xff]  ;;  %v5152_v13 = vpack.c.bf16 %v2471_v6, %v2467_v5  ;;  %v2507_v6 = vld [vmem:[#allocation8 + $0x680] sm:$0xff] }
 0x2e0   :  { %5373 = vmatpush1.bf16.msra.mxu1 %v5372_v19  ;;  %5119 = vmatprep.subr.bf16.mxu0 %v5118_v22  ;;  %v2441_v19 = vld [vmem:[#allocation8 + $0x470] sm:$0xff]  ;;  %v2444_v22 = vld [vmem:[#allocation8 + $0x488] sm:$0xff] }
 0x2e1   :  { %5375 = vmatprep.subr.bf16.mxu1 %v5374_v26  ;;  %v2450_v26 = vld [vmem:[#allocation8 + $0x4b8] sm:$0xff]  ;;  %v5392_v28 = vpack.c.bf16 %v2441_v19, %v2437_v17  ;;  %v5138_v29 = vpack.c.bf16 %v2448_v23, %v2444_v22  ;;  %v5154_v17 = vpack.c.bf16 %v2480_v11, %v2476_v9  ;;  %v2479_v19 = vld [vmem:[#allocation8 + $0x5a0] sm:$0xff]  ;;  %v2477_v22 = vld [vmem:[#allocation8 + $0x590] sm:$0xff] }
 0x2e2   :  { %v2513_v9 = vld [vmem:[#allocation8 + $0x6b0] sm:$0xff]  ;;  %v2516_v11 = vld [vmem:[#allocation8 + $0x6c8] sm:$0xff] }
 0x2e3   :  { %5121 = vmatpush1.bf16.msra.mxu0 %v5120_v32  ;;  %v2445_v32 = vld [vmem:[#allocation8 + $0x490] sm:$0xff] }
 0x2e4   :  { %5377 = vmatpush1.bf16.msra.mxu1 %v5376_v34  ;;  %5123 = vmatprep.subr.bf16.mxu0 %v5122_v35  ;;  %v5394_v34 = vpack.c.bf16 %v2450_v26, %v2446_v25  ;;  %v2449_v35 = vld [vmem:[#allocation8 + $0x4b0] sm:$0xff]  ;;  %v2488_v25 = vld [vmem:[#allocation8 + $0x5e8] sm:$0xff]  ;;  %v2486_v26 = vld [vmem:[#allocation8 + $0x5d8] sm:$0xff] }
 0x2e5   :  { %5379 = vmatprep.subr.bf16.mxu1 %v5378_v39  ;;  %v2458_v39 = vld [vmem:[#allocation8 + $0x4f8] sm:$0xff]  ;;  %v5396_v41 = vpack.c.bf16 %v2449_v35, %v2445_v32  ;;  %v2487_v32 = vld [vmem:[#allocation8 + $0x5e0] sm:$0xff] }
 0x2e6   :  { %v5398_v47 = vpack.c.bf16 %v2458_v39, %v2454_v38  ;;  %v2496_v38 = vld [vmem:[#allocation8 + $0x628] sm:$0xff]  ;;  %v2494_v39 = vld [vmem:[#allocation8 + $0x618] sm:$0xff] }
 0x2e7   :  { %5125 = vmatpush1.bf16.msra.mxu0 %v5124_v46  ;;  %v2453_v46 = vld [vmem:[#allocation8 + $0x4d0] sm:$0xff] }
 0x2e8   :  { %5381 = vmatpush1.bf16.msra.mxu1 %v5380_v48  ;;  %5127 = vmatprep.subr.bf16.mxu0 %v5126_v49  ;;  %v2457_v48 = vld [vmem:[#allocation8 + $0x4f0] sm:$0xff]  ;;  %v2460_v49 = vld [vmem:[#allocation8 + $0x508] sm:$0xff] }
 0x2e9   :  { %5383 = vmatprep.subr.bf16.mxu1 %v5382_v53  ;;  %v5144_v53 = vpack.c.bf16 %v2455_v45, %v2451_v44  ;;  %v5400_v54 = vpack.c.bf16 %v2457_v48, %v2453_v46  ;;  %v5146_v55 = vpack.c.bf16 %v2464_v50, %v2460_v49  ;;  %v5162_v44 = vpack.c.bf16 %v2496_v38, %v2492_v37  ;;  %v2491_v45 = vld [vmem:[#allocation8 + $0x600] sm:$0xff]  ;;  %v2497_v49 = vld [vmem:[#allocation8 + $0x630] sm:$0xff]  ;;  %v2500_v50 = vld [vmem:[#allocation8 + $0x648] sm:$0xff] }
 0x2ea   :  { %v2495_v46 = vld [vmem:[#allocation8 + $0x620] sm:$0xff]  ;;  %v5166_v56 = vpack.c.bf16 %v2504_v51, %v2500_v50  ;;  %v2529_v37 = vld [vmem:[#allocation8 + $0x730] sm:$0xff]  ;;  %v2532_v38 = vld [vmem:[#allocation8 + $0x748] sm:$0xff] }
 0x2eb   :  { %5129 = vmatpush1.bf16.msra.mxu0 %v5128_v60  ;;  %v2465_v60 = vld [vmem:[#allocation8 + $0x530] sm:$0xff]  ;;  %v2540_v51 = vld [vmem:[#allocation8 + $0x788] sm:$0xff] }
 0x2ec   :  { %5385 = vmatpush1.bf16.msra.mxu1 %v5384_v62  ;;  %5131 = vmatprep.subr.bf16.mxu0 %v5130_v63  ;;  %v2472_v62 = vld [vmem:[#allocation8 + $0x568] sm:$0xff]  ;;  %v2470_v63 = vld [vmem:[#allocation8 + $0x558] sm:$0xff]  ;;  %v2537_v50 = vld [vmem:[#allocation8 + $0x770] sm:$0xff] }
 0x2ed   :  { %5387 = vmatprep.subr.bf16.mxu1 %v5386_v3  ;;  %v5404_v3 = vpack.c.bf16 %v2465_v60, %v2461_v58  ;;  %v5150_v4 = vpack.c.bf16 %v2472_v62, %v2468_v61  ;;  %v5406_v20 = vpack.c.bf16 %v2474_v0, %v2470_v63  ;;  %v2503_v58 = vld [vmem:[#allocation8 + $0x660] sm:$0xff]  ;;  %v2505_v61 = vld [vmem:[#allocation8 + $0x670] sm:$0xff]  ;;  %v2508_v62 = vld [vmem:[#allocation8 + $0x688] sm:$0xff] }
 0x2ee   :  { %2898 = vmatmul.mubr.f32.vlgmr.msra.gmra.mrb[4].mxu0 %v2291_v12  ;;  %v2512_v63 = vld [vmem:[#allocation8 + $0x6a8] sm:$0xff]  ;;  %v2510_v0 = vld [vmem:[#allocation8 + $0x698] sm:$0xff] }
 0x2ef   :  { %3182 = vmatmul.mubr.f32.vlgmr.msra.gmra.mrb[4].mxu1 %v2291_v12  ;;  %5133 = vmatpush1.bf16.msra.mxu0 %v5132_v8  ;;  %v2473_v8 = vld [vmem:[#allocation8 + $0x570] sm:$0xff]  ;;  %v2478_v12 = vld [vmem:[#allocation8 + $0x598] sm:$0xff]  ;;  %v5170_v5 = vpack.c.bf16 %v2512_v63, %v2508_v62 }
 0x2f0   :  { %2968 = vmatprep.mubr.f32.mxu0 %v2294_v24  ;;  %5389 = vmatpush1.bf16.msra.mxu1 %v5388_v10  ;;  %v2482_v10 = vld [vmem:[#allocation8 + $0x5b8] sm:$0xff]  ;;  %v5408_v14 = vpack.c.bf16 %v2473_v8, %v2469_v7  ;;  %v2511_v7 = vld [vmem:[#allocation8 + $0x6a0] sm:$0xff]  ;;  %v2545_v63 = vld [vmem:[#allocation8 + $0x7b0] sm:$0xff] }
 0x2f1   :  { %3252 = vmatprep.mubr.f32.mxu1 %v2294_v24  ;;  %5135 = vmatprep.subr.bf16.mxu0 %v5134_v18  ;;  %v2475_v18 = vld [vmem:[#allocation8 + $0x580] sm:$0xff]  ;;  %v5410_v23 = vpack.c.bf16 %v2482_v10, %v2478_v12  ;;  %v2481_v24 = vld [vmem:[#allocation8 + $0x5b0] sm:$0xff]  ;;  %v2520_v12 = vld [vmem:[#allocation8 + $0x6e8] sm:$0xff] }
 0x2f2   :  { %5391 = vmatprep.subr.bf16.mxu1 %v5390_v21  ;;  %v2484_v21 = vld [vmem:[#allocation8 + $0x5c8] sm:$0xff]  ;;  %v2518_v10 = vld [vmem:[#allocation8 + $0x6d8] sm:$0xff] }
 0x2f3   :  { %5137 = vmatpush1.bf16.msra.mxu0 %v5136_v27  ;;  %v2490_v27 = vld [vmem:[#allocation8 + $0x5f8] sm:$0xff]  ;;  %v5158_v30 = vpack.c.bf16 %v2488_v25, %v2484_v21  ;;  %v2521_v21 = vld [vmem:[#allocation8 + $0x6f0] sm:$0xff]  ;;  %v2524_v25 = vld [vmem:[#allocation8 + $0x708] sm:$0xff] }
 0x2f4   :  { %5393 = vmatpush1.bf16.msra.mxu1 %v5392_v28  ;;  %5139 = vmatprep.subr.bf16.mxu0 %v5138_v29  ;;  %v5156_v28 = vpack.c.bf16 %v2479_v19, %v2475_v18  ;;  %v5412_v29 = vpack.c.bf16 %v2481_v24, %v2477_v22  ;;  %v5414_v35 = vpack.c.bf16 %v2490_v27, %v2486_v26  ;;  %v2515_v19 = vld [vmem:[#allocation8 + $0x6c0] sm:$0xff]  ;;  %v2528_v26 = vld [vmem:[#allocation8 + $0x728] sm:$0xff]  ;;  %v2526_v27 = vld [vmem:[#allocation8 + $0x718] sm:$0xff] }
 0x2f5   :  { %5395 = vmatprep.subr.bf16.mxu1 %v5394_v34  ;;  %v2485_v34 = vld [vmem:[#allocation8 + $0x5d0] sm:$0xff]  ;;  %v5174_v18 = vpack.c.bf16 %v2520_v12, %v2516_v11  ;;  %v2519_v22 = vld [vmem:[#allocation8 + $0x6e0] sm:$0xff] }
 0x2f6   :  { %v2551_v11 = vld [vmem:[#allocation8 + $0x7e0] sm:$0xff]  ;;  %v2549_v12 = vld [vmem:[#allocation8 + $0x7d0] sm:$0xff] }
 0x2f7   :  { %5141 = vmatpush1.bf16.msra.mxu0 %v5140_v40  ;;  %v2498_v40 = vld [vmem:[#allocation8 + $0x638] sm:$0xff] }
 0x2f8   :  { %5397 = vmatpush1.bf16.msra.mxu1 %v5396_v41  ;;  %5143 = vmatprep.subr.bf16.mxu0 %v5142_v43  ;;  %v5160_v41 = vpack.c.bf16 %v2487_v32, %v2483_v31  ;;  %v5416_v43 = vpack.c.bf16 %v2489_v36, %v2485_v34  ;;  %v5418_v48 = vpack.c.bf16 %v2498_v40, %v2494_v39  ;;  %v2523_v32 = vld [vmem:[#allocation8 + $0x700] sm:$0xff]  ;;  %v2536_v39 = vld [vmem:[#allocation8 + $0x768] sm:$0xff]  ;;  %v2534_v40 = vld [vmem:[#allocation8 + $0x758] sm:$0xff] }
 0x2f9   :  { %5399 = vmatprep.subr.bf16.mxu1 %v5398_v47  ;;  %v2493_v47 = vld [vmem:[#allocation8 + $0x610] sm:$0xff]  ;;  %v5178_v31 = vpack.c.bf16 %v2528_v26, %v2524_v25  ;;  %v2527_v34 = vld [vmem:[#allocation8 + $0x720] sm:$0xff] }
 0x2fa   :  { %v2555_v25 = vld [vmem:[#allocation8 + $0x800] sm:$0xff] }
 0x2fb   :  { %5145 = vmatpush1.bf16.msra.mxu0 %v5144_v53  ;;  %v2506_v53 = vld [vmem:[#allocation8 + $0x678] sm:$0xff]  ;;  %v2559_v26 = vld [vmem:[#allocation8 + $0x820] sm:$0xff] }
 0x2fc   :  { %5401 = vmatpush1.bf16.msra.mxu1 %v5400_v54  ;;  %5147 = vmatprep.subr.bf16.mxu0 %v5146_v55  ;;  %v5164_v54 = vpack.c.bf16 %v2495_v46, %v2491_v45  ;;  %v5420_v55 = vpack.c.bf16 %v2497_v49, %v2493_v47  ;;  %v5422_v60 = vpack.c.bf16 %v2506_v53, %v2502_v52  ;;  %v2531_v46 = vld [vmem:[#allocation8 + $0x740] sm:$0xff]  ;;  %v2544_v52 = vld [vmem:[#allocation8 + $0x7a8] sm:$0xff]  ;;  %v2542_v53 = vld [vmem:[#allocation8 + $0x798] sm:$0xff] }
 0x2fd   :  { %5403 = vmatprep.subr.bf16.mxu1 %v5402_v59  ;;  %v2501_v59 = vld [vmem:[#allocation8 + $0x650] sm:$0xff]  ;;  %v5182_v45 = vpack.c.bf16 %v2536_v39, %v2532_v38  ;;  %v2535_v47 = vld [vmem:[#allocation8 + $0x760] sm:$0xff] }
 0x2fe   :  { %v2563_v38 = vld [vmem:[#allocation8 + $0x840] sm:$0xff] }
 0x2ff   :  { %5149 = vmatpush1.bf16.msra.mxu0 %v5148_v2  ;;  %v2514_v2 = vld [vmem:[#allocation8 + $0x6b8] sm:$0xff]  ;;  %v2567_v39 = vld [vmem:[#allocation8 + $0x860] sm:$0xff] }
 0x300   :  { %5405 = vmatpush1.bf16.msra.mxu1 %v5404_v3  ;;  %5151 = vmatprep.subr.bf16.mxu0 %v5150_v4  ;;  %v5168_v3 = vpack.c.bf16 %v2503_v58, %v2499_v57  ;;  %v5424_v4 = vpack.c.bf16 %v2505_v61, %v2501_v59  ;;  %v5426_v8 = vpack.c.bf16 %v2514_v2, %v2510_v0  ;;  %v2539_v59 = vld [vmem:[#allocation8 + $0x780] sm:$0xff]  ;;  %v2541_v61 = vld [vmem:[#allocation8 + $0x790] sm:$0xff]  ;;  %v2548_v0 = vld [vmem:[#allocation8 + $0x7c8] sm:$0xff] }
 0x301   :  { %5407 = vmatprep.subr.bf16.mxu1 %v5406_v20  ;;  %v2509_v20 = vld [vmem:[#allocation8 + $0x690] sm:$0xff]  ;;  %v5186_v58 = vpack.c.bf16 %v2544_v52, %v2540_v51  ;;  %v2552_v2 = vld [vmem:[#allocation8 + $0x7e8] sm:$0xff]  ;;  %v2571_v51 = vld [vmem:[#allocation8 + $0x880] sm:$0xff] }
 0x302   :  { %v2575_v52 = vld [vmem:[#allocation8 + $0x8a0] sm:$0xff] }
 0x303   :  { %5153 = vmatpush1.bf16.msra.mxu0 %v5152_v13  ;;  %v2522_v13 = vld [vmem:[#allocation8 + $0x6f8] sm:$0xff] }
 0x304   :  { %5409 = vmatpush1.bf16.msra.mxu1 %v5408_v14  ;;  %5155 = vmatprep.subr.bf16.mxu0 %v5154_v17  ;;  %v5172_v14 = vpack.c.bf16 %v2511_v7, %v2507_v6  ;;  %v5428_v17 = vpack.c.bf16 %v2513_v9, %v2509_v20  ;;  %v5430_v24 = vpack.c.bf16 %v2522_v13, %v2518_v10  ;;  %v6594_v6 = vld [vmem:[#allocation7] sm:$0xff]  ;;  %v2547_v9 = vld [vmem:[#allocation8 + $0x7c0] sm:$0xff]  ;;  %v2553_v13 = vld [vmem:[#allocation8 + $0x7f0] sm:$0xff] }
 0x305   :  { %5411 = vmatprep.subr.bf16.mxu1 %v5410_v23  ;;  %v2517_v23 = vld [vmem:[#allocation8 + $0x6d0] sm:$0xff]  ;;  %v5444_v20 = vpack.c.bf16 %v2545_v63, %v2541_v61  ;;  %v5204_v61 = vpack.c.bf16 %v2575_v52, %v2571_v51 }
 0x307   :  { %5157 = vmatpush1.bf16.msra.mxu0 %v5156_v28  ;;  %v2530_v28 = vld [vmem:[#allocation8 + $0x738] sm:$0xff] }
 0x308   :  { %5413 = vmatpush1.bf16.msra.mxu1 %v5412_v29  ;;  %5159 = vmatprep.subr.bf16.mxu0 %v5158_v30  ;;  %v5176_v29 = vpack.c.bf16 %v2519_v22, %v2515_v19  ;;  %v5432_v30 = vpack.c.bf16 %v2521_v21, %v2517_v23  ;;  %v5434_v36 = vpack.c.bf16 %v2530_v28, %v2526_v27  ;;  %v2562_v19 = vld [vmem:[#allocation8 + $0x838] sm:$0xff]  ;;  %v2557_v27 = vld [vmem:[#allocation8 + $0x810] sm:$0xff] }
 0x309   :  { %5415 = vmatprep.subr.bf16.mxu1 %v5414_v35  ;;  %v2525_v35 = vld [vmem:[#allocation8 + $0x710] sm:$0xff]  ;;  %v5192_v22 = vpack.c.bf16 %v2551_v11, %v2547_v9  ;;  %v2594_v9 = vld [vmem:[#allocation8 + $0x938] sm:$0xff] }
 0x30b   :  { %5161 = vmatpush1.bf16.msra.mxu0 %v5160_v41  ;;  %v2538_v41 = vld [vmem:[#allocation8 + $0x778] sm:$0xff] }
 0x30c   :  { %5417 = vmatpush1.bf16.msra.mxu1 %v5416_v43  ;;  %5163 = vmatprep.subr.bf16.mxu0 %v5162_v44  ;;  %v5180_v43 = vpack.c.bf16 %v2527_v34, %v2523_v32  ;;  %v5436_v44 = vpack.c.bf16 %v2529_v37, %v2525_v35  ;;  %v5438_v49 = vpack.c.bf16 %v2538_v41, %v2534_v40  ;;  %v2566_v32 = vld [vmem:[#allocation8 + $0x858] sm:$0xff]  ;;  %v2565_v40 = vld [vmem:[#allocation8 + $0x850] sm:$0xff] }
 0x30d   :  { %5419 = vmatprep.subr.bf16.mxu1 %v5418_v48  ;;  %v2533_v48 = vld [vmem:[#allocation8 + $0x750] sm:$0xff]  ;;  %v2570_v34 = vld [vmem:[#allocation8 + $0x878] sm:$0xff]  ;;  %v5196_v35 = vpack.c.bf16 %v2559_v26, %v2555_v25 }
 0x30e   :  { %v5440_v57 = vpack.c.bf16 %v2537_v50, %v2533_v48  ;;  %v5454_v41 = vpack.c.bf16 %v2570_v34, %v2566_v32  ;;  %v5200_v48 = vpack.c.bf16 %v2567_v39, %v2563_v38  ;;  %v2601_v32 = vld [vmem:[#allocation8 + $0x970] sm:$0xff]  ;;  %v2604_v34 = vld [vmem:[#allocation8 + $0x988] sm:$0xff] }
 0x30f   :  { %5165 = vmatpush1.bf16.msra.mxu0 %v5164_v54  ;;  %v2546_v54 = vld [vmem:[#allocation8 + $0x7b8] sm:$0xff] }
 0x310   :  { %5421 = vmatpush1.bf16.msra.mxu1 %v5420_v55  ;;  %5167 = vmatprep.subr.bf16.mxu0 %v5166_v56  ;;  %v5184_v55 = vpack.c.bf16 %v2535_v47, %v2531_v46  ;;  %v1125_v56 = vsub.s32 2, %v6567_v1  ;;  %v5442_v62 = vpack.c.bf16 %v2546_v54, %v2542_v53  ;;  %v2574_v46 = vld [vmem:[#allocation8 + $0x898] sm:$0xff]  ;;  %v2573_v53 = vld [vmem:[#allocation8 + $0x890] sm:$0xff] }
 0x311   :  { %5423 = vmatprep.subr.bf16.mxu1 %v5422_v60  ;;  %v2543_v60 = vld [vmem:[#allocation8 + $0x7a0] sm:$0xff]  ;;  %v2578_v47 = vld [vmem:[#allocation8 + $0x8b8] sm:$0xff] }
 0x312   :  { %v1126_v7 = vrot.slane %v6594_v6, %v1125_v56  ;;  %v5458_v54 = vpack.c.bf16 %v2578_v47, %v2574_v46  ;;  %v2612_v46 = vld [vmem:[#allocation8 + $0x9c8] sm:$0xff] }
 0x313   :  { %5169 = vmatpush1.bf16.msra.mxu0 %v5168_v3  ;;  %v2550_v3 = vld [vmem:[#allocation8 + $0x7d8] sm:$0xff]  ;;  %v2616_v47 = vld [vmem:[#allocation8 + $0x9e8] sm:$0xff] }
 0x314   :  { %5425 = vmatpush1.bf16.msra.mxu1 %v5424_v4  ;;  %5171 = vmatprep.subr.bf16.mxu0 %v5170_v5  ;;  %v2554_v4 = vld [vmem:[#allocation8 + $0x7f8] sm:$0xff]  ;;  %v5188_v5 = vpack.c.bf16 %v2543_v60, %v2539_v59  ;;  %v5868_v23 = vadd.f32 %v6571_v15, %v1126_v7  ;;  %v2588_v7 = vld [vmem:[#allocation8 + $0x908] sm:$0xff]  ;;  %v5222_v52 = vpack.c.bf16 %v2616_v47, %v2612_v46  ;;  %v2649_v47 = vld [vmem:[#allocation8 + $0xaf0] sm:$0xff] }
 0x315   :  { %5427 = vmatprep.subr.bf16.mxu1 %v5426_v8  ;;  %v5190_v8 = vpack.c.bf16 %v2552_v2, %v2548_v0  ;;  %v5446_v10 = vpack.c.bf16 %v2554_v4, %v2550_v3  ;;  %v2582_v59 = vld [vmem:[#allocation8 + $0x8d8] sm:$0xff]  ;;  %v2579_v0 = vld [vmem:[#allocation8 + $0x8c0] sm:$0xff]  ;;  %v2581_v3 = vld [vmem:[#allocation8 + $0x8d0] sm:$0xff] }
 0x316   :  { %v2586_v60 = vld [vmem:[#allocation8 + $0x8f8] sm:$0xff]  ;;  %v2583_v2 = vld [vmem:[#allocation8 + $0x8e0] sm:$0xff] }
 0x317   :  { %5173 = vmatpush1.bf16.msra.mxu0 %v5172_v14  ;;  %v2556_v14 = vld [vmem:[#allocation8 + $0x808] sm:$0xff]  ;;  %v5462_v4 = vpack.c.bf16 %v2586_v60, %v2582_v59  ;;  %v5208_v11 = vpack.c.bf16 %v2583_v2, %v2579_v0 }
 0x318   :  { %5429 = vmatpush1.bf16.msra.mxu1 %v5428_v17  ;;  %5175 = vmatprep.subr.bf16.mxu0 %v5174_v18  ;;  %v2560_v17 = vld [vmem:[#allocation8 + $0x828] sm:$0xff]  ;;  %v2558_v18 = vld [vmem:[#allocation8 + $0x818] sm:$0xff] }
 0x319   :  { %5431 = vmatprep.subr.bf16.mxu1 %v5430_v24  ;;  %v5448_v24 = vpack.c.bf16 %v2553_v13, %v2549_v12  ;;  %v5194_v21 = vpack.c.bf16 %v2560_v17, %v2556_v14  ;;  %v5450_v28 = vpack.c.bf16 %v2562_v19, %v2558_v18  ;;  %v2587_v13 = vld [vmem:[#allocation8 + $0x900] sm:$0xff]  ;;  %v2589_v17 = vld [vmem:[#allocation8 + $0x910] sm:$0xff]  ;;  %v2620_v59 = vld [vmem:[#allocation8 + $0xa08] sm:$0xff] }
 0x31a   :  { %v2591_v14 = vld [vmem:[#allocation8 + $0x920] sm:$0xff]  ;;  %v2593_v19 = vld [vmem:[#allocation8 + $0x930] sm:$0xff]  ;;  %v2624_v60 = vld [vmem:[#allocation8 + $0xa28] sm:$0xff] }
 0x31b   :  { %5177 = vmatpush1.bf16.msra.mxu0 %v5176_v29  ;;  %v2561_v29 = vld [vmem:[#allocation8 + $0x830] sm:$0xff]  ;;  %v5212_v25 = vpack.c.bf16 %v2591_v14, %v2587_v13  ;;  %v5468_v26 = vpack.c.bf16 %v2593_v19, %v2589_v17  ;;  %v5226_v2 = vpack.c.bf16 %v2624_v60, %v2620_v59  ;;  %v2627_v17 = vld [vmem:[#allocation8 + $0xa40] sm:$0xff] }
 0x31c   :  { %5433 = vmatpush1.bf16.msra.mxu1 %v5432_v30  ;;  %5179 = vmatprep.subr.bf16.mxu0 %v5178_v31  ;;  %v2564_v30 = vld [vmem:[#allocation8 + $0x848] sm:$0xff]  ;;  %v5452_v15 = vpack.c.bf16 %v2561_v29, %v2557_v27  ;;  %v2599_v29 = vld [vmem:[#allocation8 + $0x960] sm:$0xff]  ;;  %v2629_v19 = vld [vmem:[#allocation8 + $0xa50] sm:$0xff] }
 0x31d   :  { %5435 = vmatprep.subr.bf16.mxu1 %v5434_v36  ;;  %v2568_v31 = vld [vmem:[#allocation8 + $0x868] sm:$0xff]  ;;  %v2293_v36 = vmax.f32 %v5868_v23, 0.0  ;;  %v2657_v60 = vld [vmem:[#allocation8 + $0xb30] sm:$0xff] }
 0x31e   :  { %v5198_v37 = vpack.c.bf16 %v2568_v31, %v2564_v30  ;;  %v2600_v23 = vld [vmem:[#allocation8 + $0x968] sm:$0xff]  ;;  %v2597_v30 = vld [vmem:[#allocation8 + $0x950] sm:$0xff] }
 0x31f   :  { %5181 = vmatpush1.bf16.msra.mxu0 %v5180_v43  ;;  %v2569_v43 = vld [vmem:[#allocation8 + $0x870] sm:$0xff]  ;;  %v5472_v38 = vpack.c.bf16 %v2601_v32, %v2597_v30  ;;  %v2635_v30 = vld [vmem:[#allocation8 + $0xa80] sm:$0xff] }
 0x320   :  { %5437 = vmatpush1.bf16.msra.mxu1 %v5436_v44  ;;  %5183 = vmatprep.subr.bf16.mxu0 %v5182_v45  ;;  %v2572_v44 = vld [vmem:[#allocation8 + $0x888] sm:$0xff]  ;;  %v2637_v32 = vld [vmem:[#allocation8 + $0xa90] sm:$0xff] }
 0x321   :  { %5439 = vmatprep.subr.bf16.mxu1 %v5438_v49  ;;  %v2576_v45 = vld [vmem:[#allocation8 + $0x8a8] sm:$0xff]  ;;  %v5456_v49 = vpack.c.bf16 %v2569_v43, %v2565_v40  ;;  %v2603_v40 = vld [vmem:[#allocation8 + $0x980] sm:$0xff]  ;;  %v2605_v43 = vld [vmem:[#allocation8 + $0x990] sm:$0xff] }
 0x322   :  { %v5202_v50 = vpack.c.bf16 %v2576_v45, %v2572_v44  ;;  %v2609_v45 = vld [vmem:[#allocation8 + $0x9b0] sm:$0xff] }
 0x323   :  { %5185 = vmatpush1.bf16.msra.mxu0 %v5184_v55  ;;  %v2577_v55 = vld [vmem:[#allocation8 + $0x8b0] sm:$0xff]  ;;  %v5476_v51 = vpack.c.bf16 %v2609_v45, %v2605_v43  ;;  %v2643_v43 = vld [vmem:[#allocation8 + $0xac0] sm:$0xff] }
 0x324   :  { %5441 = vmatpush1.bf16.msra.mxu1 %v5440_v57  ;;  %5187 = vmatprep.subr.bf16.mxu0 %v5186_v58  ;;  %v2580_v57 = vld [vmem:[#allocation8 + $0x8c8] sm:$0xff]  ;;  %v2645_v45 = vld [vmem:[#allocation8 + $0xad0] sm:$0xff] }
 0x325   :  { %5443 = vmatprep.subr.bf16.mxu1 %v5442_v62  ;;  %v2584_v58 = vld [vmem:[#allocation8 + $0x8e8] sm:$0xff]  ;;  %v5460_v62 = vpack.c.bf16 %v2577_v55, %v2573_v53  ;;  %v2611_v53 = vld [vmem:[#allocation8 + $0x9c0] sm:$0xff]  ;;  %v2613_v55 = vld [vmem:[#allocation8 + $0x9d0] sm:$0xff] }
 0x326   :  { %v5206_v63 = vpack.c.bf16 %v2584_v58, %v2580_v57  ;;  %v2617_v58 = vld [vmem:[#allocation8 + $0x9f0] sm:$0xff] }
 0x327   :  { %5189 = vmatpush1.bf16.msra.mxu0 %v5188_v5  ;;  %v2585_v5 = vld [vmem:[#allocation8 + $0x8f0] sm:$0xff]  ;;  %v5480_v0 = vpack.c.bf16 %v2617_v58, %v2613_v55  ;;  %v2651_v55 = vld [vmem:[#allocation8 + $0xb00] sm:$0xff] }
 0x328   :  { %5445 = vmatpush1.bf16.msra.mxu1 %v5444_v20  ;;  %5191 = vmatprep.subr.bf16.mxu0 %v5190_v8  ;;  %v2592_v20 = vld [vmem:[#allocation8 + $0x928] sm:$0xff]  ;;  %v2590_v8 = vld [vmem:[#allocation8 + $0x918] sm:$0xff]  ;;  %v5464_v12 = vpack.c.bf16 %v2585_v5, %v2581_v3  ;;  %v2619_v3 = vld [vmem:[#allocation8 + $0xa00] sm:$0xff] }
 0x329   :  { %5447 = vmatprep.subr.bf16.mxu1 %v5446_v10  ;;  %v5210_v10 = vpack.c.bf16 %v2592_v20, %v2588_v7  ;;  %v5466_v18 = vpack.c.bf16 %v2594_v9, %v2590_v8  ;;  %v2621_v5 = vld [vmem:[#allocation8 + $0xa10] sm:$0xff]  ;;  %v2628_v8 = vld [vmem:[#allocation8 + $0xa48] sm:$0xff] }
 0x32a   :  { %v2625_v20 = vld [vmem:[#allocation8 + $0xa30] sm:$0xff]  ;;  %v2632_v9 = vld [vmem:[#allocation8 + $0xa68] sm:$0xff] }
 0x32b   :  { %5193 = vmatpush1.bf16.msra.mxu0 %v5192_v22  ;;  %v2596_v22 = vld [vmem:[#allocation8 + $0x948] sm:$0xff]  ;;  %v5484_v13 = vpack.c.bf16 %v2625_v20, %v2621_v5  ;;  %v5230_v14 = vpack.c.bf16 %v2632_v9, %v2628_v8  ;;  %v2653_v58 = vld [vmem:[#allocation8 + $0xb10] sm:$0xff]  ;;  %v2659_v5 = vld [vmem:[#allocation8 + $0xb40] sm:$0xff] }
 0x32c   :  { %5449 = vmatpush1.bf16.msra.mxu1 %v5448_v24  ;;  %5195 = vmatprep.subr.bf16.mxu0 %v5194_v21  ;;  %v2598_v24 = vld [vmem:[#allocation8 + $0x958] sm:$0xff]  ;;  %v5214_v27 = vpack.c.bf16 %v2600_v23, %v2596_v22  ;;  %v2633_v23 = vld [vmem:[#allocation8 + $0xa70] sm:$0xff] }
 0x32d   :  { %5451 = vmatprep.subr.bf16.mxu1 %v5450_v28  ;;  %v2602_v21 = vld [vmem:[#allocation8 + $0x978] sm:$0xff]  ;;  %v2595_v28 = vld [vmem:[#allocation8 + $0x940] sm:$0xff]  ;;  %v2661_v20 = vld [vmem:[#allocation8 + $0xb50] sm:$0xff] }
 0x32e   :  { %2969 = vmatmul.mubr.f32.vlgmr.msra.gmra.mrb[4].mxu0 %v2293_v36  ;;  %v5470_v31 = vpack.c.bf16 %v2602_v21, %v2598_v24  ;;  %v2636_v24 = vld [vmem:[#allocation8 + $0xa88] sm:$0xff]  ;;  %v2665_v9 = vld [vmem:[#allocation8 + $0xb70] sm:$0xff] }
 0x32f   :  { %3253 = vmatmul.mubr.f32.vlgmr.msra.gmra.mrb[4].mxu1 %v2293_v36  ;;  %5197 = vmatpush1.bf16.msra.mxu0 %v5196_v35  ;;  %v2608_v35 = vld [vmem:[#allocation8 + $0x9a8] sm:$0xff]  ;;  %v2606_v36 = vld [vmem:[#allocation8 + $0x998] sm:$0xff] }
 0x330   :  { %5453 = vmatpush1.bf16.msra.mxu1 %v5452_v15  ;;  %5199 = vmatprep.subr.bf16.mxu0 %v5198_v37  ;;  %v2610_v15 = vld [vmem:[#allocation8 + $0x9b8] sm:$0xff]  ;;  %v5216_v37 = vpack.c.bf16 %v2599_v29, %v2595_v28  ;;  %v5218_v39 = vpack.c.bf16 %v2608_v35, %v2604_v34  ;;  %v2640_v21 = vld [vmem:[#allocation8 + $0xaa8] sm:$0xff]  ;;  %v5488_v28 = vpack.c.bf16 %v2633_v23, %v2629_v19  ;;  %v2641_v35 = vld [vmem:[#allocation8 + $0xab0] sm:$0xff] }
 0x331   :  { %5455 = vmatprep.subr.bf16.mxu1 %v5454_v41  ;;  %v2607_v41 = vld [vmem:[#allocation8 + $0x9a0] sm:$0xff]  ;;  %v5474_v44 = vpack.c.bf16 %v2610_v15, %v2606_v36  ;;  %v5234_v29 = vpack.c.bf16 %v2640_v21, %v2636_v24  ;;  %v2644_v36 = vld [vmem:[#allocation8 + $0xac8] sm:$0xff]  ;;  %v2669_v23 = vld [vmem:[#allocation8 + $0xb90] sm:$0xff] }
 0x332   :  { %v2648_v15 = vld [vmem:[#allocation8 + $0xae8] sm:$0xff]  ;;  %v2667_v19 = vld [vmem:[#allocation8 + $0xb80] sm:$0xff]  ;;  %v2673_v21 = vld [vmem:[#allocation8 + $0xbb0] sm:$0xff] }
 0x333   :  { %5201 = vmatpush1.bf16.msra.mxu0 %v5200_v48  ;;  %v2614_v48 = vld [vmem:[#allocation8 + $0x9d8] sm:$0xff] }
 0x334   :  { %5457 = vmatpush1.bf16.msra.mxu1 %v5456_v49  ;;  %5203 = vmatprep.subr.bf16.mxu0 %v5202_v50  ;;  %v2618_v49 = vld [vmem:[#allocation8 + $0x9f8] sm:$0xff]  ;;  %v5220_v50 = vpack.c.bf16 %v2607_v41, %v2603_v40  ;;  %v5492_v40 = vpack.c.bf16 %v2641_v35, %v2637_v32  ;;  %v5238_v41 = vpack.c.bf16 %v2648_v15, %v2644_v36  ;;  %v2675_v32 = vld [vmem:[#allocation8 + $0xbc0] sm:$0xff]  ;;  %v2677_v35 = vld [vmem:[#allocation8 + $0xbd0] sm:$0xff] }
 0x335   :  { %5459 = vmatprep.subr.bf16.mxu1 %v5458_v54  ;;  %v2615_v54 = vld [vmem:[#allocation8 + $0x9e0] sm:$0xff]  ;;  %v5478_v57 = vpack.c.bf16 %v2618_v49, %v2614_v48  ;;  %v2652_v48 = vld [vmem:[#allocation8 + $0xb08] sm:$0xff]  ;;  %v2681_v15 = vld [vmem:[#allocation8 + $0xbf0] sm:$0xff] }
 0x336   :  { %v2656_v49 = vld [vmem:[#allocation8 + $0xb28] sm:$0xff] }
 0x337   :  { %5205 = vmatpush1.bf16.msra.mxu0 %v5204_v61  ;;  %v2622_v61 = vld [vmem:[#allocation8 + $0xa18] sm:$0xff] }
 0x338   :  { %5461 = vmatpush1.bf16.msra.mxu1 %v5460_v62  ;;  %5207 = vmatprep.subr.bf16.mxu0 %v5206_v63  ;;  %v2626_v62 = vld [vmem:[#allocation8 + $0xa38] sm:$0xff]  ;;  %v5224_v63 = vpack.c.bf16 %v2615_v54, %v2611_v53  ;;  %v5496_v53 = vpack.c.bf16 %v2649_v47, %v2645_v45  ;;  %v5242_v54 = vpack.c.bf16 %v2656_v49, %v2652_v48  ;;  %v1137_v47 = vsub.s32 5, %v6567_v1 }
 0x339   :  { %5463 = vmatprep.subr.bf16.mxu1 %v5462_v4  ;;  %v2623_v4 = vld [vmem:[#allocation8 + $0xa20] sm:$0xff]  ;;  %v5482_v7 = vpack.c.bf16 %v2626_v62, %v2622_v61  ;;  %v2660_v61 = vld [vmem:[#allocation8 + $0xb48] sm:$0xff]  ;;  %v1145_v48 = vsub.s32 7, %v6567_v1 }
 0x33a   :  { %v2664_v62 = vld [vmem:[#allocation8 + $0xb68] sm:$0xff] }
 0x33b   :  { %5209 = vmatpush1.bf16.msra.mxu0 %v5208_v11  ;;  %v2630_v11 = vld [vmem:[#allocation8 + $0xa58] sm:$0xff] }
 0x33c   :  { %5465 = vmatpush1.bf16.msra.mxu1 %v5464_v12  ;;  %5211 = vmatprep.subr.bf16.mxu0 %v5210_v10  ;;  %v2634_v12 = vld [vmem:[#allocation8 + $0xa78] sm:$0xff]  ;;  %v5228_v10 = vpack.c.bf16 %v2623_v4, %v2619_v3  ;;  %v5500_v3 = vpack.c.bf16 %v2657_v60, %v2653_v58  ;;  %v5246_v4 = vpack.c.bf16 %v2664_v62, %v2660_v61  ;;  %v2687_v58 = vld [vmem:[#allocation8 + $0xc20] sm:$0xff]  ;;  %v2689_v60 = vld [vmem:[#allocation8 + $0xc30] sm:$0xff] }
 0x33d   :  { %5467 = vmatprep.subr.bf16.mxu1 %v5466_v18  ;;  %v2631_v18 = vld [vmem:[#allocation8 + $0xa60] sm:$0xff]  ;;  %v5486_v22 = vpack.c.bf16 %v2634_v12, %v2630_v11  ;;  %v2668_v11 = vld [vmem:[#allocation8 + $0xb88] sm:$0xff] }
 0x33e   :  { %v2672_v12 = vld [vmem:[#allocation8 + $0xba8] sm:$0xff] }
 0x33f   :  { %5213 = vmatpush1.bf16.msra.mxu0 %v5212_v25  ;;  %v2638_v25 = vld [vmem:[#allocation8 + $0xa98] sm:$0xff] }
 0x340   :  { %5469 = vmatpush1.bf16.msra.mxu1 %v5468_v26  ;;  %5215 = vmatprep.subr.bf16.mxu0 %v5214_v27  ;;  %v2642_v26 = vld [vmem:[#allocation8 + $0xab8] sm:$0xff]  ;;  %v5232_v27 = vpack.c.bf16 %v2631_v18, %v2627_v17  ;;  %v5504_v17 = vpack.c.bf16 %v2665_v9, %v2661_v20  ;;  %v5250_v18 = vpack.c.bf16 %v2672_v12, %v2668_v11  ;;  %v2693_v11 = vld [vmem:[#allocation8 + $0xc50] sm:$0xff] }
 0x341   :  { %5471 = vmatprep.subr.bf16.mxu1 %v5470_v31  ;;  %v2639_v31 = vld [vmem:[#allocation8 + $0xaa0] sm:$0xff]  ;;  %v5490_v34 = vpack.c.bf16 %v2642_v26, %v2638_v25  ;;  %v2676_v25 = vld [vmem:[#allocation8 + $0xbc8] sm:$0xff]  ;;  %v2697_v12 = vld [vmem:[#allocation8 + $0xc70] sm:$0xff] }
 0x342   :  { %v2680_v26 = vld [vmem:[#allocation8 + $0xbe8] sm:$0xff] }
 0x343   :  { %5217 = vmatpush1.bf16.msra.mxu0 %v5216_v37  ;;  %v2646_v37 = vld [vmem:[#allocation8 + $0xad8] sm:$0xff] }
 0x344   :  { %5473 = vmatpush1.bf16.msra.mxu1 %v5472_v38  ;;  %5219 = vmatprep.subr.bf16.mxu0 %v5218_v39  ;;  %v2650_v38 = vld [vmem:[#allocation8 + $0xaf8] sm:$0xff]  ;;  %v5236_v39 = vpack.c.bf16 %v2639_v31, %v2635_v30  ;;  %v5508_v30 = vpack.c.bf16 %v2673_v21, %v2669_v23  ;;  %v5254_v31 = vpack.c.bf16 %v2680_v26, %v2676_v25  ;;  %v2699_v21 = vld [vmem:[#allocation8 + $0xc80] sm:$0xff] }
 0x345   :  { %5475 = vmatprep.subr.bf16.mxu1 %v5474_v44  ;;  %v2647_v44 = vld [vmem:[#allocation8 + $0xae0] sm:$0xff]  ;;  %v5494_v46 = vpack.c.bf16 %v2650_v38, %v2646_v37  ;;  %v2684_v37 = vld [vmem:[#allocation8 + $0xc08] sm:$0xff] }
 0x346   :  { %v2688_v38 = vld [vmem:[#allocation8 + $0xc28] sm:$0xff]  ;;  %v2703_v25 = vld [vmem:[#allocation8 + $0xca0] sm:$0xff] }
 0x347   :  { %5221 = vmatpush1.bf16.msra.mxu0 %v5220_v50  ;;  %v2654_v50 = vld [vmem:[#allocation8 + $0xb18] sm:$0xff] }
 0x348   :  { %5477 = vmatpush1.bf16.msra.mxu1 %v5476_v51  ;;  %5223 = vmatprep.subr.bf16.mxu0 %v5222_v52  ;;  %v2658_v51 = vld [vmem:[#allocation8 + $0xb38] sm:$0xff]  ;;  %v5240_v52 = vpack.c.bf16 %v2647_v44, %v2643_v43  ;;  %v5512_v43 = vpack.c.bf16 %v2681_v15, %v2677_v35  ;;  %v5258_v44 = vpack.c.bf16 %v2688_v38, %v2684_v37  ;;  %v2707_v15 = vld [vmem:[#allocation8 + $0xcc0] sm:$0xff] }
 0x349   :  { %5479 = vmatprep.subr.bf16.mxu1 %v5478_v57  ;;  %v2655_v57 = vld [vmem:[#allocation8 + $0xb20] sm:$0xff]  ;;  %v5498_v59 = vpack.c.bf16 %v2658_v51, %v2654_v50  ;;  %v1138_v50 = vrot.slane %v6594_v6, %v1137_v47  ;;  %v1146_v51 = vrot.slane %v6594_v6, %v1145_v48  ;;  %v5268_v35 = vpack.c.bf16 %v2703_v25, %v2699_v21 }
 0x34a   :  { %v2711_v37 = vld [vmem:[#allocation8 + $0xce0] sm:$0xff] }
 0x34b   :  { %5225 = vmatpush1.bf16.msra.mxu0 %v5224_v63  ;;  %v2662_v63 = vld [vmem:[#allocation8 + $0xb58] sm:$0xff]  ;;  %v5272_v47 = vpack.c.bf16 %v2711_v37, %v2707_v15 }
 0x34c   :  { %5481 = vmatpush1.bf16.msra.mxu1 %v5480_v0  ;;  %5227 = vmatprep.subr.bf16.mxu0 %v5226_v2  ;;  %v2666_v0 = vld [vmem:[#allocation8 + $0xb78] sm:$0xff]  ;;  %v5244_v2 = vpack.c.bf16 %v2655_v57, %v2651_v55 }
 0x34d   :  { %5483 = vmatprep.subr.bf16.mxu1 %v5482_v7  ;;  %v2663_v7 = vld [vmem:[#allocation8 + $0xb60] sm:$0xff]  ;;  %v5502_v8 = vpack.c.bf16 %v2666_v0, %v2662_v63  ;;  %v2692_v63 = vld [vmem:[#allocation8 + $0xc48] sm:$0xff] }
 0x34f   :  { %5229 = vmatpush1.bf16.msra.mxu0 %v5228_v10  ;;  %v2670_v10 = vld [vmem:[#allocation8 + $0xb98] sm:$0xff] }
 0x350   :  { %5485 = vmatpush1.bf16.msra.mxu1 %v5484_v13  ;;  %5231 = vmatprep.subr.bf16.mxu0 %v5230_v14  ;;  %v2674_v13 = vld [vmem:[#allocation8 + $0xbb8] sm:$0xff]  ;;  %v5248_v14 = vpack.c.bf16 %v2663_v7, %v2659_v5 }
 0x351   :  { %5487 = vmatprep.subr.bf16.mxu1 %v5486_v22  ;;  %v2671_v22 = vld [vmem:[#allocation8 + $0xba0] sm:$0xff]  ;;  %v5506_v24 = vpack.c.bf16 %v2674_v13, %v2670_v10  ;;  %v2700_v10 = vld [vmem:[#allocation8 + $0xc88] sm:$0xff] }
 0x353   :  { %5233 = vmatpush1.bf16.msra.mxu0 %v5232_v27  ;;  %v2678_v27 = vld [vmem:[#allocation8 + $0xbd8] sm:$0xff] }
 0x354   :  { %5489 = vmatpush1.bf16.msra.mxu1 %v5488_v28  ;;  %5235 = vmatprep.subr.bf16.mxu0 %v5234_v29  ;;  %v2682_v28 = vld [vmem:[#allocation8 + $0xbf8] sm:$0xff]  ;;  %v5252_v29 = vpack.c.bf16 %v2671_v22, %v2667_v19 }
 0x355   :  { %5491 = vmatprep.subr.bf16.mxu1 %v5490_v34  ;;  %v2679_v34 = vld [vmem:[#allocation8 + $0xbe0] sm:$0xff]  ;;  %v5510_v36 = vpack.c.bf16 %v2682_v28, %v2678_v27  ;;  %v2706_v19 = vld [vmem:[#allocation8 + $0xcb8] sm:$0xff]  ;;  %v2701_v28 = vld [vmem:[#allocation8 + $0xc90] sm:$0xff] }
 0x357   :  { %5237 = vmatpush1.bf16.msra.mxu0 %v5236_v39  ;;  %v2686_v39 = vld [vmem:[#allocation8 + $0xc18] sm:$0xff] }
 0x358   :  { %5493 = vmatpush1.bf16.msra.mxu1 %v5492_v40  ;;  %5239 = vmatprep.subr.bf16.mxu0 %v5238_v41  ;;  %v2690_v40 = vld [vmem:[#allocation8 + $0xc38] sm:$0xff]  ;;  %v5256_v41 = vpack.c.bf16 %v2679_v34, %v2675_v32 }
 0x359   :  { %5495 = vmatprep.subr.bf16.mxu1 %v5494_v46  ;;  %v5514_v45 = vpack.c.bf16 %v2690_v40, %v2686_v39  ;;  %v1133_v46 = vsub.s32 4, %v6567_v1  ;;  %v2710_v32 = vld [vmem:[#allocation8 + $0xcd8] sm:$0xff]  ;;  %v2709_v40 = vld [vmem:[#allocation8 + $0xcd0] sm:$0xff] }
 0x35a   :  { %v2714_v34 = vld [vmem:[#allocation8 + $0xcf8] sm:$0xff] }
 0x35b   :  { %5241 = vmatpush1.bf16.msra.mxu0 %v5240_v52  ;;  %v1134_v49 = vrot.slane %v6594_v6, %v1133_v46  ;;  %v2691_v6 = vld [vmem:[#allocation8 + $0xc40] sm:$0xff]  ;;  %v5526_v39 = vpack.c.bf16 %v2714_v34, %v2710_v32  ;;  %v2722_v46 = vld [vmem:[#allocation8 + $0xd38] sm:$0xff]  ;;  %v2748_v32 = vld [vmem:[#allocation8 + $0xe08] sm:$0xff] }
 0x35c   :  { %5497 = vmatpush1.bf16.msra.mxu1 %v5496_v53  ;;  %5243 = vmatprep.subr.bf16.mxu0 %v5242_v54  ;;  %v2683_v53 = vld [vmem:[#allocation8 + $0xc00] sm:$0xff]  ;;  %v2752_v34 = vld [vmem:[#allocation8 + $0xe28] sm:$0xff] }
 0x35d   :  { %5499 = vmatprep.subr.bf16.mxu1 %v5498_v59  ;;  %v2685_v59 = vld [vmem:[#allocation8 + $0xc10] sm:$0xff]  ;;  %v5260_v7 = vpack.c.bf16 %v2687_v58, %v2683_v53  ;;  %v2728_v58 = vld [vmem:[#allocation8 + $0xd68] sm:$0xff] }
 0x35e   :  { %v5516_v20 = vpack.c.bf16 %v2689_v60, %v2685_v59  ;;  %v2717_v53 = vld [vmem:[#allocation8 + $0xd10] sm:$0xff]  ;;  %v2726_v59 = vld [vmem:[#allocation8 + $0xd58] sm:$0xff] }
 0x35f   :  { %5245 = vmatpush1.bf16.msra.mxu0 %v5244_v2  ;;  %v2696_v2 = vld [vmem:[#allocation8 + $0xc68] sm:$0xff]  ;;  %v2730_v60 = vld [vmem:[#allocation8 + $0xd78] sm:$0xff] }
 0x360   :  { %5501 = vmatpush1.bf16.msra.mxu1 %v5500_v3  ;;  %5247 = vmatprep.subr.bf16.mxu0 %v5246_v4  ;;  %v2694_v3 = vld [vmem:[#allocation8 + $0xc58] sm:$0xff]  ;;  %v5262_v13 = vpack.c.bf16 %v2696_v2, %v2692_v63  ;;  %v2723_v63 = vld [vmem:[#allocation8 + $0xd40] sm:$0xff] }
 0x361   :  { %5503 = vmatprep.subr.bf16.mxu1 %v5502_v8  ;;  %v2698_v4 = vld [vmem:[#allocation8 + $0xc78] sm:$0xff]  ;;  %v2695_v8 = vld [vmem:[#allocation8 + $0xc60] sm:$0xff] }
 0x362   :  { %v5264_v23 = vpack.c.bf16 %v2695_v8, %v2691_v6  ;;  %v2734_v6 = vld [vmem:[#allocation8 + $0xd98] sm:$0xff] }
 0x363   :  { %5249 = vmatpush1.bf16.msra.mxu0 %v5248_v14  ;;  %v5518_v14 = vpack.c.bf16 %v2698_v4, %v2694_v3  ;;  %v5534_v3 = vpack.c.bf16 %v2730_v60, %v2726_v59  ;;  %v2725_v4 = vld [vmem:[#allocation8 + $0xd50] sm:$0xff]  ;;  %v2738_v8 = vld [vmem:[#allocation8 + $0xdb8] sm:$0xff]  ;;  %v2764_v59 = vld [vmem:[#allocation8 + $0xe88] sm:$0xff] }
 0x364   :  { %5505 = vmatpush1.bf16.msra.mxu1 %v5504_v17  ;;  %5251 = vmatprep.subr.bf16.mxu0 %v5250_v18  ;;  %v2704_v17 = vld [vmem:[#allocation8 + $0xca8] sm:$0xff]  ;;  %v2702_v18 = vld [vmem:[#allocation8 + $0xc98] sm:$0xff] }
 0x365   :  { %5507 = vmatprep.subr.bf16.mxu1 %v5506_v24  ;;  %v5520_v24 = vpack.c.bf16 %v2697_v12, %v2693_v11  ;;  %v5266_v26 = vpack.c.bf16 %v2704_v17, %v2700_v10  ;;  %v5522_v27 = vpack.c.bf16 %v2706_v19, %v2702_v18  ;;  %v2731_v12 = vld [vmem:[#allocation8 + $0xd80] sm:$0xff]  ;;  %v2733_v17 = vld [vmem:[#allocation8 + $0xd90] sm:$0xff]  ;;  %v2740_v19 = vld [vmem:[#allocation8 + $0xdc8] sm:$0xff] }
 0x366   :  { %v2735_v10 = vld [vmem:[#allocation8 + $0xda0] sm:$0xff]  ;;  %v2737_v18 = vld [vmem:[#allocation8 + $0xdb0] sm:$0xff]  ;;  %v2768_v60 = vld [vmem:[#allocation8 + $0xea8] sm:$0xff] }
 0x367   :  { %5253 = vmatpush1.bf16.msra.mxu0 %v5252_v29  ;;  %v2705_v29 = vld [vmem:[#allocation8 + $0xcb0] sm:$0xff]  ;;  %v5284_v21 = vpack.c.bf16 %v2735_v10, %v2731_v12  ;;  %v5540_v25 = vpack.c.bf16 %v2737_v18, %v2733_v17 }
 0x368   :  { %5509 = vmatpush1.bf16.msra.mxu1 %v5508_v30  ;;  %5255 = vmatprep.subr.bf16.mxu0 %v5254_v31  ;;  %v2708_v30 = vld [vmem:[#allocation8 + $0xcc8] sm:$0xff] }
 0x369   :  { %5511 = vmatprep.subr.bf16.mxu1 %v5510_v36  ;;  %v2712_v31 = vld [vmem:[#allocation8 + $0xce8] sm:$0xff]  ;;  %v5524_v36 = vpack.c.bf16 %v2705_v29, %v2701_v28 }
 0x36a   :  { %v5270_v38 = vpack.c.bf16 %v2712_v31, %v2708_v30  ;;  %v2741_v30 = vld [vmem:[#allocation8 + $0xdd0] sm:$0xff] }
 0x36b   :  { %5257 = vmatpush1.bf16.msra.mxu0 %v5256_v41  ;;  %v2713_v41 = vld [vmem:[#allocation8 + $0xcf0] sm:$0xff] }
 0x36c   :  { %5513 = vmatpush1.bf16.msra.mxu1 %v5512_v43  ;;  %5259 = vmatprep.subr.bf16.mxu0 %v5258_v44  ;;  %v2716_v43 = vld [vmem:[#allocation8 + $0xd08] sm:$0xff]  ;;  %v5528_v48 = vpack.c.bf16 %v2713_v41, %v2709_v40  ;;  %v2745_v31 = vld [vmem:[#allocation8 + $0xdf0] sm:$0xff]  ;;  %v5290_v40 = vpack.c.bf16 %v2752_v34, %v2748_v32 }
 0x36d   :  { %5515 = vmatprep.subr.bf16.mxu1 %v5514_v45  ;;  %v2720_v44 = vld [vmem:[#allocation8 + $0xd28] sm:$0xff]  ;;  %v2718_v45 = vld [vmem:[#allocation8 + $0xd18] sm:$0xff]  ;;  %v5544_v37 = vpack.c.bf16 %v2745_v31, %v2741_v30  ;;  %v2781_v32 = vld [vmem:[#allocation8 + $0xf10] sm:$0xff] }
 0x36e   :  { %v2785_v34 = vld [vmem:[#allocation8 + $0xf30] sm:$0xff] }
 0x381   :  { %v2002_v52 = vpop.f32.mrb[2].mxu0 }
 0x382   :  { %v5870_v54 = vadd.f32 %v2002_v52, %v1134_v49  ;;  %v6606_v55 = vpop.f32.mrb[2].mxu1  ;;  %v2004_v57 = vpop.f32.mrb[3].mxu0  ;;  %v2715_v49 = vld [vmem:[#allocation8 + $0xd00] sm:$0xff]  ;;  %v5530_v52 = vpack.c.bf16 %v2722_v46, %v2718_v45  ;;  %v2756_v45 = vld [vmem:[#allocation8 + $0xe48] sm:$0xff] }
 0x383   :  { %v5871_v61 = vadd.f32 %v2004_v57, %v1138_v50  ;;  %v2288_v62 = vpop.f32.mrb[3].mxu1  ;;  %v2719_v50 = vld [vmem:[#allocation8 + $0xd20] sm:$0xff]  ;;  %v2724_v57 = vld [vmem:[#allocation8 + $0xd48] sm:$0xff] }
 0x384   :  { %v5873_v0 = vadd.f32 %v2288_v62, %v1146_v51  ;;  %v2295_v9 = vmax.f32 %v5870_v54, 0.0  ;;  %v5274_v51 = vpack.c.bf16 %v2720_v44, %v2716_v43  ;;  %v2721_v54 = vld [vmem:[#allocation8 + $0xd30] sm:$0xff]  ;;  %v5278_v2 = vpack.c.bf16 %v2728_v58, %v2724_v57  ;;  %v2760_v46 = vld [vmem:[#allocation8 + $0xe68] sm:$0xff] }
 0x385   :  { %v2296_v5 = vmax.f32 %v5871_v61, 0.0  ;;  %v5276_v61 = vpack.c.bf16 %v2719_v50, %v2715_v49  ;;  %v5532_v62 = vpack.c.bf16 %v2721_v54, %v2717_v53  ;;  %v2749_v43 = vld [vmem:[#allocation8 + $0xe10] sm:$0xff]  ;;  %v5294_v53 = vpack.c.bf16 %v2760_v46, %v2756_v45 }
 0x386   :  { %v2298_v22 = vmax.f32 %v5873_v0, 0.0  ;;  %v2727_v0 = vld [vmem:[#allocation8 + $0xd60] sm:$0xff]  ;;  %v2753_v44 = vld [vmem:[#allocation8 + $0xe30] sm:$0xff] }
 0x387   :  { %3039 = vmatprep.mubr.f32.mxu0 %v2296_v5  ;;  %3323 = vmatprep.mubr.f32.mxu1 %v2296_v5  ;;  %v2729_v5 = vld [vmem:[#allocation8 + $0xd70] sm:$0xff]  ;;  %v5548_v50 = vpack.c.bf16 %v2753_v44, %v2749_v43 }
 0x388   :  { %3040 = vmatmul.mubr.f32.vlgmr.msra.gmra.mrb[4].mxu0 %v2295_v9  ;;  %3324 = vmatmul.mubr.f32.vlgmr.msra.gmra.mrb[4].mxu1 %v2295_v9  ;;  %v5280_v9 = vpack.c.bf16 %v2727_v0, %v2723_v63  ;;  %v5536_v11 = vpack.c.bf16 %v2729_v5, %v2725_v4  ;;  %v2757_v57 = vld [vmem:[#allocation8 + $0xe50] sm:$0xff]  ;;  %v5298_v4 = vpack.c.bf16 %v2768_v60, %v2764_v59 }
 0x389   :  { %5261 = vmatpush1.bf16.msra.mxu0 %v5260_v7  ;;  %5517 = vmatpush1.bf16.msra.mxu1 %v5516_v20  ;;  %v2732_v7 = vld [vmem:[#allocation8 + $0xd88] sm:$0xff]  ;;  %v2761_v58 = vld [vmem:[#allocation8 + $0xe70] sm:$0xff] }
 0x38a   :  { %3110 = vmatprep.mubr.f32.mxu0 %v2298_v22  ;;  %3394 = vmatprep.mubr.f32.mxu1 %v2298_v22  ;;  %v2736_v20 = vld [vmem:[#allocation8 + $0xda8] sm:$0xff]  ;;  %v5552_v0 = vpack.c.bf16 %v2761_v58, %v2757_v57  ;;  %v2789_v45 = vld [vmem:[#allocation8 + $0xf50] sm:$0xff]  ;;  %v1141_v57 = vsub.s32 6, %v6567_v1  ;;  %v3752_v1 = vld [vmem:[#allocation14 + $0x1f8] sm:$0xff] }
 0x38b   :  { %5263 = vmatprep.subr.bf16.mxu0 %v5262_v13  ;;  %5519 = vmatprep.subr.bf16.mxu1 %v5518_v14  ;;  %v5282_v13 = vpack.c.bf16 %v2736_v20, %v2732_v7  ;;  %v5538_v14 = vpack.c.bf16 %v2738_v8, %v2734_v6  ;;  %v2744_v22 = vld [vmem:[#allocation8 + $0xde8] sm:$0xff]  ;;  %v2765_v7 = vld [vmem:[#allocation8 + $0xe90] sm:$0xff] }
 0x38c   :  { %v5286_v28 = vpack.c.bf16 %v2744_v22, %v2740_v19  ;;  %v2769_v20 = vld [vmem:[#allocation8 + $0xeb0] sm:$0xff]  ;;  %v2772_v6 = vld [vmem:[#allocation8 + $0xec8] sm:$0xff] }
 0x38d   :  { %5265 = vmatpush1.bf16.msra.mxu0 %v5264_v23  ;;  %5521 = vmatpush1.bf16.msra.mxu1 %v5520_v24  ;;  %v2742_v23 = vld [vmem:[#allocation8 + $0xdd8] sm:$0xff]  ;;  %v2776_v8 = vld [vmem:[#allocation8 + $0xee8] sm:$0xff]  ;;  %v5556_v10 = vpack.c.bf16 %v2769_v20, %v2765_v7  ;;  %v2773_v19 = vld [vmem:[#allocation8 + $0xed0] sm:$0xff] }
 0x38e   :  { %5267 = vmatprep.subr.bf16.mxu0 %v5266_v26  ;;  %5523 = vmatprep.subr.bf16.mxu1 %v5522_v27  ;;  %v2746_v24 = vld [vmem:[#allocation8 + $0xdf8] sm:$0xff]  ;;  %v2739_v26 = vld [vmem:[#allocation8 + $0xdc0] sm:$0xff]  ;;  %v5302_v17 = vpack.c.bf16 %v2776_v8, %v2772_v6  ;;  %v2777_v22 = vld [vmem:[#allocation8 + $0xef0] sm:$0xff] }
 0x38f   :  { %v2743_v27 = vld [vmem:[#allocation8 + $0xde0] sm:$0xff]  ;;  %v5542_v29 = vpack.c.bf16 %v2746_v24, %v2742_v23  ;;  %v2780_v23 = vld [vmem:[#allocation8 + $0xf08] sm:$0xff]  ;;  %v2793_v46 = vld [vmem:[#allocation8 + $0xf70] sm:$0xff] }
 0x390   :  { %v5288_v15 = vpack.c.bf16 %v2743_v27, %v2739_v26  ;;  %v2784_v24 = vld [vmem:[#allocation8 + $0xf28] sm:$0xff]  ;;  %v5560_v27 = vpack.c.bf16 %v2777_v22, %v2773_v19  ;;  %v2797_v60 = vld [vmem:[#allocation8 + $0xf90] sm:$0xff]  ;;  %v5950_v7 = vld [vmem:[#allocation7] sm:$0xff] }
 0x391   :  { %5269 = vmatpush1.bf16.msra.mxu0 %v5268_v35  ;;  %5525 = vmatpush1.bf16.msra.mxu1 %v5524_v36  ;;  %v2750_v35 = vld [vmem:[#allocation8 + $0xe18] sm:$0xff]  ;;  %v5306_v30 = vpack.c.bf16 %v2784_v24, %v2780_v23  ;;  %v1142_v20 = vrot.slane %v5950_v7, %v1141_v57  ;;  %v3405_v22 = vld [vmem:[#allocation11] sm:$0xff]  ;;  %v3410_v24 = vld [vmem:[#allocation11 + $0x28] sm:$0xff] }
 0x392   :  { %5271 = vmatprep.subr.bf16.mxu0 %v5270_v38  ;;  %5527 = vmatprep.subr.bf16.mxu1 %v5526_v39  ;;  %v2754_v36 = vld [vmem:[#allocation8 + $0xe38] sm:$0xff]  ;;  %v2747_v38 = vld [vmem:[#allocation8 + $0xe00] sm:$0xff] }
 0x393   :  { %v2751_v39 = vld [vmem:[#allocation8 + $0xe20] sm:$0xff]  ;;  %v5546_v41 = vpack.c.bf16 %v2754_v36, %v2750_v35  ;;  %v2788_v35 = vld [vmem:[#allocation8 + $0xf48] sm:$0xff]  ;;  %v3407_v23 = vld [vmem:[#allocation11 + $0x10] sm:$0xff] }
 0x394   :  { %v5292_v49 = vpack.c.bf16 %v2751_v39, %v2747_v38  ;;  %v2792_v36 = vld [vmem:[#allocation8 + $0xf68] sm:$0xff]  ;;  %v5564_v39 = vpack.c.bf16 %v2785_v34, %v2781_v32  ;;  %v3432_v57 = vld [vmem:[#allocation11 + $0xd8] sm:$0xff] }
 0x395   :  { %5273 = vmatpush1.bf16.msra.mxu0 %v5272_v47  ;;  %5529 = vmatpush1.bf16.msra.mxu1 %v5528_v48  ;;  %v2758_v47 = vld [vmem:[#allocation8 + $0xe58] sm:$0xff]  ;;  %v5310_v43 = vpack.c.bf16 %v2792_v36, %v2788_v35  ;;  %v3413_v34 = vld [vmem:[#allocation11 + $0x40] sm:$0xff]  ;;  %v3418_v36 = vld [vmem:[#allocation11 + $0x68] sm:$0xff] }
 0x396   :  { %5275 = vmatprep.subr.bf16.mxu0 %v5274_v51  ;;  %5531 = vmatprep.subr.bf16.mxu1 %v5530_v52  ;;  %v2762_v48 = vld [vmem:[#allocation8 + $0xe78] sm:$0xff]  ;;  %v2755_v51 = vld [vmem:[#allocation8 + $0xe40] sm:$0xff] }
 0x397   :  { %v2759_v52 = vld [vmem:[#allocation8 + $0xe60] sm:$0xff]  ;;  %v5550_v54 = vpack.c.bf16 %v2762_v48, %v2758_v47  ;;  %v2796_v47 = vld [vmem:[#allocation8 + $0xf88] sm:$0xff]  ;;  %v3415_v35 = vld [vmem:[#allocation11 + $0x50] sm:$0xff] }
 0x398   :  { %v5296_v63 = vpack.c.bf16 %v2759_v52, %v2755_v51  ;;  %v2800_v48 = vld [vmem:[#allocation8 + $0xfa8] sm:$0xff]  ;;  %v5568_v52 = vpack.c.bf16 %v2793_v46, %v2789_v45  ;;  %v3440_v7 = vld [vmem:[#allocation11 + $0x118] sm:$0xff] }
 0x399   :  { %5277 = vmatpush1.bf16.msra.mxu0 %v5276_v61  ;;  %5533 = vmatpush1.bf16.msra.mxu1 %v5532_v62  ;;  %v2766_v61 = vld [vmem:[#allocation8 + $0xe98] sm:$0xff]  ;;  %v5314_v58 = vpack.c.bf16 %v2800_v48, %v2796_v47  ;;  %v3421_v46 = vld [vmem:[#allocation11 + $0x80] sm:$0xff]  ;;  %v3426_v48 = vld [vmem:[#allocation11 + $0xa8] sm:$0xff] }
 0x39a   :  { %5279 = vmatprep.subr.bf16.mxu0 %v5278_v2  ;;  %5535 = vmatprep.subr.bf16.mxu1 %v5534_v3  ;;  %v2770_v62 = vld [vmem:[#allocation8 + $0xeb8] sm:$0xff]  ;;  %v2763_v2 = vld [vmem:[#allocation8 + $0xe80] sm:$0xff] }
 0x39b   :  { %v2767_v3 = vld [vmem:[#allocation8 + $0xea0] sm:$0xff]  ;;  %v5554_v5 = vpack.c.bf16 %v2770_v62, %v2766_v61  ;;  %v2801_v61 = vld [vmem:[#allocation8 + $0xfb0] sm:$0xff]  ;;  %v2804_v62 = vld [vmem:[#allocation8 + $0xfc8] sm:$0xff] }
 0x39c   :  { %v5300_v12 = vpack.c.bf16 %v2767_v3, %v2763_v2  ;;  %v2810_v2 = vld [vmem:[#allocation8 + $0xff8] sm:$0xff] }
 0x39d   :  { %5281 = vmatpush1.bf16.msra.mxu0 %v5280_v9  ;;  %5537 = vmatpush1.bf16.msra.mxu1 %v5536_v11  ;;  %v2774_v9 = vld [vmem:[#allocation8 + $0xed8] sm:$0xff] }
 0x39e   :  { %5283 = vmatprep.subr.bf16.mxu0 %v5282_v13  ;;  %5539 = vmatprep.subr.bf16.mxu1 %v5538_v14  ;;  %v2778_v11 = vld [vmem:[#allocation8 + $0xef8] sm:$0xff]  ;;  %v2771_v13 = vld [vmem:[#allocation8 + $0xec0] sm:$0xff] }
 0x39f   :  { %v2775_v14 = vld [vmem:[#allocation8 + $0xee0] sm:$0xff]  ;;  %v5558_v18 = vpack.c.bf16 %v2778_v11, %v2774_v9  ;;  %v2805_v11 = vld [vmem:[#allocation8 + $0xfd0] sm:$0xff] }
 0x3a0   :  { %v5304_v26 = vpack.c.bf16 %v2775_v14, %v2771_v13  ;;  %v2807_v9 = vld [vmem:[#allocation8 + $0xfe0] sm:$0xff]  ;;  %v3423_v47 = vld [vmem:[#allocation11 + $0x90] sm:$0xff] }
 0x3a1   :  { %5285 = vmatpush1.bf16.msra.mxu0 %v5284_v21  ;;  %5541 = vmatpush1.bf16.msra.mxu1 %v5540_v25  ;;  %v2782_v21 = vld [vmem:[#allocation8 + $0xf18] sm:$0xff] }
 0x3a2   :  { %5287 = vmatprep.subr.bf16.mxu0 %v5286_v28  ;;  %5543 = vmatprep.subr.bf16.mxu1 %v5542_v29  ;;  %v2786_v25 = vld [vmem:[#allocation8 + $0xf38] sm:$0xff]  ;;  %v2779_v28 = vld [vmem:[#allocation8 + $0xf00] sm:$0xff] }
 0x3a3   :  { %v2783_v29 = vld [vmem:[#allocation8 + $0xf20] sm:$0xff]  ;;  %v5562_v31 = vpack.c.bf16 %v2786_v25, %v2782_v21  ;;  %v5580_v25 = vpack.c.bf16 %v3407_v23, %v3405_v22 }
 0x3a4   :  { %v5308_v38 = vpack.c.bf16 %v2783_v29, %v2779_v28  ;;  %v3408_v13 = vld [vmem:[#allocation11 + $0x18] sm:$0xff]  ;;  %v3409_v28 = vld [vmem:[#allocation11 + $0x20] sm:$0xff]  ;;  %v3411_v29 = vld [vmem:[#allocation11 + $0x30] sm:$0xff] }
 0x3a5   :  { %5289 = vmatpush1.bf16.msra.mxu0 %v5288_v15  ;;  %5545 = vmatpush1.bf16.msra.mxu1 %v5544_v37  ;;  %v2790_v15 = vld [vmem:[#allocation8 + $0xf58] sm:$0xff] }
 0x3a6   :  { %5291 = vmatprep.subr.bf16.mxu0 %v5290_v40  ;;  %5547 = vmatprep.subr.bf16.mxu1 %v5546_v41  ;;  %v2794_v37 = vld [vmem:[#allocation8 + $0xf78] sm:$0xff]  ;;  %v2787_v40 = vld [vmem:[#allocation8 + $0xf40] sm:$0xff] }
 0x3a7   :  { %v2791_v41 = vld [vmem:[#allocation8 + $0xf60] sm:$0xff]  ;;  %v5566_v44 = vpack.c.bf16 %v2794_v37, %v2790_v15  ;;  %v5588_v37 = vpack.c.bf16 %v3415_v35, %v3413_v34 }
 0x3a8   :  { %v5312_v51 = vpack.c.bf16 %v2791_v41, %v2787_v40  ;;  %v3412_v21 = vld [vmem:[#allocation11 + $0x38] sm:$0xff]  ;;  %v3419_v40 = vld [vmem:[#allocation11 + $0x70] sm:$0xff]  ;;  %v3422_v41 = vld [vmem:[#allocation11 + $0x88] sm:$0xff] }
 0x3a9   :  { %5293 = vmatpush1.bf16.msra.mxu0 %v5292_v49  ;;  %5549 = vmatpush1.bf16.msra.mxu1 %v5548_v50  ;;  %v2798_v49 = vld [vmem:[#allocation8 + $0xf98] sm:$0xff]  ;;  %v3453_v35 = vld [vmem:[#allocation11 + $0x180] sm:$0xff] }
 0x3aa   :  { %5295 = vmatprep.subr.bf16.mxu0 %v5294_v53  ;;  %5551 = vmatprep.subr.bf16.mxu1 %v5550_v54  ;;  %v2802_v50 = vld [vmem:[#allocation8 + $0xfb8] sm:$0xff]  ;;  %v2795_v53 = vld [vmem:[#allocation8 + $0xf80] sm:$0xff] }
 0x3ab   :  { %v2799_v54 = vld [vmem:[#allocation8 + $0xfa0] sm:$0xff]  ;;  %v5570_v59 = vpack.c.bf16 %v2802_v50, %v2798_v49  ;;  %v5596_v50 = vpack.c.bf16 %v3423_v47, %v3421_v46 }
 0x3ac   :  { %v5316_v3 = vpack.c.bf16 %v2799_v54, %v2795_v53  ;;  %v3420_v15 = vld [vmem:[#allocation11 + $0x78] sm:$0xff]  ;;  %v3427_v53 = vld [vmem:[#allocation11 + $0xb0] sm:$0xff]  ;;  %v3430_v54 = vld [vmem:[#allocation11 + $0xc8] sm:$0xff] }
 0x3ad   :  { %5297 = vmatpush1.bf16.msra.mxu0 %v5296_v63  ;;  %5553 = vmatpush1.bf16.msra.mxu1 %v5552_v0  ;;  %v2808_v63 = vld [vmem:[#allocation8 + $0xfe8] sm:$0xff]  ;;  %v2806_v0 = vld [vmem:[#allocation8 + $0xfd8] sm:$0xff] }
 0x3ae   :  { %5299 = vmatprep.subr.bf16.mxu0 %v5298_v4  ;;  %5555 = vmatprep.subr.bf16.mxu1 %v5554_v5  ;;  %v5572_v4 = vpack.c.bf16 %v2801_v61, %v2797_v60  ;;  %v2803_v5 = vld [vmem:[#allocation8 + $0xfc0] sm:$0xff]  ;;  %v5318_v6 = vpack.c.bf16 %v2808_v63, %v2804_v62  ;;  %v5574_v8 = vpack.c.bf16 %v2810_v2, %v2806_v0  ;;  %v3431_v61 = vld [vmem:[#allocation11 + $0xd0] sm:$0xff]  ;;  %v3434_v62 = vld [vmem:[#allocation11 + $0xe8] sm:$0xff] }
 0x3af   :  { %v5320_v14 = vpack.c.bf16 %v2807_v9, %v2803_v5  ;;  %v3428_v49 = vld [vmem:[#allocation11 + $0xb8] sm:$0xff]  ;;  %v3429_v60 = vld [vmem:[#allocation11 + $0xc0] sm:$0xff]  ;;  %v3438_v5 = vld [vmem:[#allocation11 + $0x108] sm:$0xff] }
 0x3b0   :  { %v3436_v63 = vld [vmem:[#allocation11 + $0xf8] sm:$0xff]  ;;  %v5604_v0 = vpack.c.bf16 %v3431_v61, %v3429_v60  ;;  %v3439_v9 = vld [vmem:[#allocation11 + $0x110] sm:$0xff]  ;;  %v3461_v47 = vld [vmem:[#allocation11 + $0x1c0] sm:$0xff] }
 0x3b1   :  { %5301 = vmatpush1.bf16.msra.mxu0 %v5300_v12  ;;  %5557 = vmatpush1.bf16.msra.mxu1 %v5556_v10  ;;  %v2809_v12 = vld [vmem:[#allocation8 + $0xff0] sm:$0xff]  ;;  %v5606_v2 = vpack.c.bf16 %v3436_v63, %v3434_v62  ;;  %v3692_v62 = vld [vmem:[#allocation14 + $0x18] sm:$0xff]  ;;  %v3689_v63 = vld [vmem:[#allocation14] sm:$0xff] }
 0x3b2   :  { %5303 = vmatprep.subr.bf16.mxu0 %v5302_v17  ;;  %5559 = vmatprep.subr.bf16.mxu1 %v5558_v18  ;;  %v3406_v10 = vld [vmem:[#allocation11 + $0x8] sm:$0xff]  ;;  %v5576_v17 = vpack.c.bf16 %v2809_v12, %v2805_v11  ;;  %v5872_v18 = vadd.f32 %v6606_v55, %v1142_v20  ;;  %v5584_v55 = vpack.c.bf16 %v3411_v29, %v3409_v28  ;;  %v3444_v12 = vld [vmem:[#allocation11 + $0x138] sm:$0xff]  ;;  %v3449_v29 = vld [vmem:[#allocation11 + $0x160] sm:$0xff] }
 0x3b3   :  { %v5578_v19 = vpack.c.bf16 %v3408_v13, %v3406_v10  ;;  %v3442_v11 = vld [vmem:[#allocation11 + $0x128] sm:$0xff] }
 0x3b4   :  { %v5614_v13 = vpack.c.bf16 %v3444_v12, %v3442_v11  ;;  %v3690_v61 = vld [vmem:[#allocation14 + $0x8] sm:$0xff] }
 0x3b5   :  { %5305 = vmatpush1.bf16.msra.mxu0 %v5304_v26  ;;  %5561 = vmatpush1.bf16.msra.mxu1 %v5560_v27  ;;  %v2297_v26 = vmax.f32 %v5872_v18, 0.0  ;;  %v5582_v27 = vpack.c.bf16 %v3412_v21, %v3410_v24  ;;  %v3446_v18 = vld [vmem:[#allocation11 + $0x148] sm:$0xff]  ;;  %v3445_v24 = vld [vmem:[#allocation11 + $0x140] sm:$0xff]  ;;  %v3447_v21 = vld [vmem:[#allocation11 + $0x150] sm:$0xff] }
 0x3b6   :  { %5307 = vmatprep.subr.bf16.mxu0 %v5306_v30  ;;  %5563 = vmatprep.subr.bf16.mxu1 %v5562_v31  ;;  %v3414_v30 = vld [vmem:[#allocation11 + $0x48] sm:$0xff]  ;;  %v3416_v31 = vld [vmem:[#allocation11 + $0x58] sm:$0xff] }
 0x3b7   :  { %v5586_v32 = vpack.c.bf16 %v3416_v31, %v3414_v30  ;;  %v3451_v30 = vld [vmem:[#allocation11 + $0x170] sm:$0xff]  ;;  %v3454_v31 = vld [vmem:[#allocation11 + $0x188] sm:$0xff] }
 0x3b9   :  { %5309 = vmatpush1.bf16.msra.mxu0 %v5308_v38  ;;  %5565 = vmatpush1.bf16.msra.mxu1 %v5564_v39  ;;  %v5590_v38 = vpack.c.bf16 %v3420_v15, %v3418_v36  ;;  %v3417_v39 = vld [vmem:[#allocation11 + $0x60] sm:$0xff]  ;;  %v3455_v36 = vld [vmem:[#allocation11 + $0x190] sm:$0xff]  ;;  %v3458_v15 = vld [vmem:[#allocation11 + $0x1a8] sm:$0xff] }
 0x3ba   :  { %5311 = vmatprep.subr.bf16.mxu0 %v5310_v43  ;;  %5567 = vmatprep.subr.bf16.mxu1 %v5566_v44  ;;  %v3424_v43 = vld [vmem:[#allocation11 + $0x98] sm:$0xff]  ;;  %v5592_v44 = vpack.c.bf16 %v3419_v40, %v3417_v39  ;;  %v3457_v40 = vld [vmem:[#allocation11 + $0x1a0] sm:$0xff] }
 0x3bb   :  { %v5594_v45 = vpack.c.bf16 %v3424_v43, %v3422_v41  ;;  %v3459_v41 = vld [vmem:[#allocation11 + $0x1b0] sm:$0xff]  ;;  %v3462_v43 = vld [vmem:[#allocation11 + $0x1c8] sm:$0xff] }
 0x3bd   :  { %5313 = vmatpush1.bf16.msra.mxu0 %v5312_v51  ;;  %5569 = vmatpush1.bf16.msra.mxu1 %v5568_v52  ;;  %v5598_v51 = vpack.c.bf16 %v3428_v49, %v3426_v48  ;;  %v3425_v52 = vld [vmem:[#allocation11 + $0xa0] sm:$0xff]  ;;  %v3463_v48 = vld [vmem:[#allocation11 + $0x1d0] sm:$0xff] }
 0x3be   :  { %5315 = vmatprep.subr.bf16.mxu0 %v5314_v58  ;;  %5571 = vmatprep.subr.bf16.mxu1 %v5570_v59  ;;  %v5600_v58 = vpack.c.bf16 %v3427_v53, %v3425_v52  ;;  %v5602_v59 = vpack.c.bf16 %v3432_v57, %v3430_v54  ;;  %v5636_v49 = vpack.c.bf16 %v3463_v48, %v3461_v47  ;;  %v3465_v53 = vld [vmem:[#allocation11 + $0x1e0] sm:$0xff]  ;;  %v3467_v54 = vld [vmem:[#allocation11 + $0x1f0] sm:$0xff] }
 0x3bf   :  { %v5640_v57 = vpack.c.bf16 %v3467_v54, %v3465_v53  ;;  %v3722_v47 = vld [vmem:[#allocation14 + $0x108] sm:$0xff]  ;;  %v3724_v48 = vld [vmem:[#allocation14 + $0x118] sm:$0xff] }
 0x3c0   :  { %v3726_v53 = vld [vmem:[#allocation14 + $0x128] sm:$0xff]  ;;  %v3728_v54 = vld [vmem:[#allocation14 + $0x138] sm:$0xff] }
 0x3c1   :  { %5317 = vmatpush1.bf16.msra.mxu0 %v5316_v3  ;;  %5573 = vmatpush1.bf16.msra.mxu1 %v5572_v4  ;;  %v3433_v3 = vld [vmem:[#allocation11 + $0xe0] sm:$0xff]  ;;  %v3435_v4 = vld [vmem:[#allocation11 + $0xf0] sm:$0xff] }
 0x3c2   :  { %5319 = vmatprep.subr.bf16.mxu0 %v5318_v6  ;;  %5575 = vmatprep.subr.bf16.mxu1 %v5574_v8  ;;  %v5608_v20 = vpack.c.bf16 %v3435_v4, %v3433_v3  ;;  %v5610_v6 = vpack.c.bf16 %v3440_v7, %v3438_v5  ;;  %v3437_v8 = vld [vmem:[#allocation11 + $0x100] sm:$0xff]  ;;  %v3694_v3 = vld [vmem:[#allocation14 + $0x28] sm:$0xff] }
 0x3c3   :  { %v5612_v10 = vpack.c.bf16 %v3439_v9, %v3437_v8  ;;  %v3696_v4 = vld [vmem:[#allocation14 + $0x38] sm:$0xff]  ;;  %v3698_v8 = vld [vmem:[#allocation14 + $0x48] sm:$0xff] }
 0x3c4   :  { %v5710_v7 = vpack.c.bf16 %v3696_v4, %v3694_v3  ;;  %v3700_v9 = vld [vmem:[#allocation14 + $0x58] sm:$0xff]  ;;  %v3731_v3 = vld [vmem:[#allocation14 + $0x150] sm:$0xff]  ;;  %v3734_v4 = vld [vmem:[#allocation14 + $0x168] sm:$0xff] }
 0x3c5   :  { %5321 = vmatpush1.bf16.msra.mxu0 %v5320_v14  ;;  %5577 = vmatpush1.bf16.msra.mxu1 %v5576_v17  ;;  %v3441_v14 = vld [vmem:[#allocation11 + $0x120] sm:$0xff]  ;;  %v3443_v17 = vld [vmem:[#allocation11 + $0x130] sm:$0xff]  ;;  %v5714_v12 = vpack.c.bf16 %v3700_v9, %v3698_v8 }
 0x3c6   :  { %5579 = vmatprep.subr.bf16.mxu0 %v5578_v19  ;;  %v3448_v19 = vld [vmem:[#allocation11 + $0x158] sm:$0xff]  ;;  %v5616_v22 = vpack.c.bf16 %v3443_v17, %v3441_v14  ;;  %v3702_v14 = vld [vmem:[#allocation14 + $0x68] sm:$0xff] }
 0x3c7   :  { %v5618_v23 = vpack.c.bf16 %v3448_v19, %v3446_v18  ;;  %v3704_v17 = vld [vmem:[#allocation14 + $0x78] sm:$0xff]  ;;  %v3735_v8 = vld [vmem:[#allocation14 + $0x170] sm:$0xff]  ;;  %v3738_v9 = vld [vmem:[#allocation14 + $0x188] sm:$0xff] }
 0x3c8   :  { %3111 = vmatmul.mubr.f32.vlgmr.msra.gmra.mrb[4].mxu0 %v2297_v26  ;;  %3395 = vmatmul.mubr.f32.vlgmr.msra.gmra.mrb[4].mxu1 %v2297_v26  ;;  %v3452_v26 = vld [vmem:[#allocation11 + $0x178] sm:$0xff]  ;;  %v5718_v19 = vpack.c.bf16 %v3704_v17, %v3702_v14  ;;  %v3742_v17 = vld [vmem:[#allocation14 + $0x1a8] sm:$0xff] }
 0x3c9   :  { %5581 = vmatpush1.bf16.msra.mxu0 %v5580_v25  ;;  %v3450_v25 = vld [vmem:[#allocation11 + $0x168] sm:$0xff]  ;;  %v3739_v14 = vld [vmem:[#allocation14 + $0x190] sm:$0xff] }
 0x3ca   :  { %5583 = vmatprep.subr.bf16.mxu0 %v5582_v27  ;;  %v5620_v27 = vpack.c.bf16 %v3447_v21, %v3445_v24  ;;  %v5622_v28 = vpack.c.bf16 %v3452_v26, %v3450_v25  ;;  %v3706_v24 = vld [vmem:[#allocation14 + $0x88] sm:$0xff]  ;;  %v3708_v21 = vld [vmem:[#allocation14 + $0x98] sm:$0xff] }
 0x3cb   :  { %v5722_v26 = vpack.c.bf16 %v3708_v21, %v3706_v24  ;;  %v3743_v24 = vld [vmem:[#allocation14 + $0x1b0] sm:$0xff]  ;;  %v3746_v21 = vld [vmem:[#allocation14 + $0x1c8] sm:$0xff] }
 0x3cd   :  { %5585 = vmatpush1.bf16.msra.mxu0 %v5584_v55  ;;  %v3456_v55 = vld [vmem:[#allocation11 + $0x198] sm:$0xff] }
 0x3ce   :  { %5587 = vmatprep.subr.bf16.mxu0 %v5586_v32  ;;  %v5624_v32 = vpack.c.bf16 %v3451_v30, %v3449_v29  ;;  %v5626_v34 = vpack.c.bf16 %v3456_v55, %v3454_v31  ;;  %v3710_v29 = vld [vmem:[#allocation14 + $0xa8] sm:$0xff]  ;;  %v3712_v30 = vld [vmem:[#allocation14 + $0xb8] sm:$0xff] }
 0x3cf   :  { %v5726_v55 = vpack.c.bf16 %v3712_v30, %v3710_v29 }
 0x3d1   :  { %5589 = vmatpush1.bf16.msra.mxu0 %v5588_v37  ;;  %v3460_v37 = vld [vmem:[#allocation11 + $0x1b8] sm:$0xff] }
 0x3d2   :  { %5591 = vmatprep.subr.bf16.mxu0 %v5590_v38  ;;  %v5628_v38 = vpack.c.bf16 %v3455_v36, %v3453_v35  ;;  %v5630_v39 = vpack.c.bf16 %v3460_v37, %v3458_v15  ;;  %v3714_v35 = vld [vmem:[#allocation14 + $0xc8] sm:$0xff]  ;;  %v3716_v36 = vld [vmem:[#allocation14 + $0xd8] sm:$0xff] }
 0x3d3   :  { %v5730_v37 = vpack.c.bf16 %v3716_v36, %v3714_v35 }
 0x3d5   :  { %5593 = vmatpush1.bf16.msra.mxu0 %v5592_v44  ;;  %v3464_v44 = vld [vmem:[#allocation11 + $0x1d8] sm:$0xff] }
 0x3d6   :  { %5595 = vmatprep.subr.bf16.mxu0 %v5594_v45  ;;  %v5632_v45 = vpack.c.bf16 %v3459_v41, %v3457_v40  ;;  %v5634_v46 = vpack.c.bf16 %v3464_v44, %v3462_v43  ;;  %v3718_v40 = vld [vmem:[#allocation14 + $0xe8] sm:$0xff]  ;;  %v3720_v41 = vld [vmem:[#allocation14 + $0xf8] sm:$0xff] }
 0x3d7   :  { %v5734_v44 = vpack.c.bf16 %v3720_v41, %v3718_v40  ;;  %v3474_v40 = vld [vmem:[#allocation11 + $0x228] sm:$0xff]  ;;  %v3476_v41 = vld [vmem:[#allocation11 + $0x238] sm:$0xff] }
 0x3d9   :  { %5597 = vmatpush1.bf16.msra.mxu0 %v5596_v50  ;;  %v3466_v50 = vld [vmem:[#allocation11 + $0x1e8] sm:$0xff] }
 0x3da   :  { %5599 = vmatprep.subr.bf16.mxu0 %v5598_v51  ;;  %v3468_v51 = vld [vmem:[#allocation11 + $0x1f8] sm:$0xff] }
 0x3db   :  { %v5638_v52 = vpack.c.bf16 %v3468_v51, %v3466_v50  ;;  %v5738_v50 = vpack.c.bf16 %v3724_v48, %v3722_v47  ;;  %v3721_v51 = vld [vmem:[#allocation14 + $0x100] sm:$0xff] }
 0x3dc   :  { %v3473_v47 = vld [vmem:[#allocation11 + $0x220] sm:$0xff] }
 0x3dd   :  { %5601 = vmatpush1.bf16.msra.mxu0 %v5600_v58  ;;  %v3470_v58 = vld [vmem:[#allocation11 + $0x208] sm:$0xff] }
 0x3de   :  { %5603 = vmatprep.subr.bf16.mxu0 %v5602_v59  ;;  %v3472_v59 = vld [vmem:[#allocation11 + $0x218] sm:$0xff] }
 0x3df   :  { %v5642_v60 = vpack.c.bf16 %v3472_v59, %v3470_v58  ;;  %v5742_v58 = vpack.c.bf16 %v3728_v54, %v3726_v53  ;;  %v3725_v59 = vld [vmem:[#allocation14 + $0x120] sm:$0xff]  ;;  %v3479_v54 = vld [vmem:[#allocation11 + $0x250] sm:$0xff] }
 0x3e0   :  { %v3477_v53 = vld [vmem:[#allocation11 + $0x240] sm:$0xff] }
 0x3e1   :  { %5605 = vmatpush1.bf16.msra.mxu0 %v5604_v0  ;;  %v5706_v0 = vpack.c.bf16 %v3692_v62, %v3690_v61  ;;  %v3730_v61 = vld [vmem:[#allocation14 + $0x148] sm:$0xff]  ;;  %v3732_v62 = vld [vmem:[#allocation14 + $0x158] sm:$0xff] }
 0x3e2   :  { %5607 = vmatprep.subr.bf16.mxu0 %v5606_v2  ;;  %v3691_v2 = vld [vmem:[#allocation14 + $0x10] sm:$0xff] }
 0x3e3   :  { %v5708_v5 = vpack.c.bf16 %v3691_v2, %v3689_v63  ;;  %5707 = vmatprep.subr.bf16.mxu1 %v5706_v0  ;;  %v5746_v0 = vpack.c.bf16 %v3732_v62, %v3730_v61  ;;  %v3729_v2 = vld [vmem:[#allocation14 + $0x140] sm:$0xff]  ;;  %v3483_v62 = vld [vmem:[#allocation11 + $0x270] sm:$0xff] }
 0x3e4   :  { %v3481_v61 = vld [vmem:[#allocation11 + $0x260] sm:$0xff] }
 0x3e5   :  { %5609 = vmatpush1.bf16.msra.mxu0 %v5608_v20  ;;  %v3693_v20 = vld [vmem:[#allocation14 + $0x20] sm:$0xff]  ;;  %5709 = vmatpush1.bf16.msra.mxu1 %v5708_v5  ;;  %v3736_v5 = vld [vmem:[#allocation14 + $0x178] sm:$0xff] }
 0x3e6   :  { %5611 = vmatprep.subr.bf16.mxu0 %v5610_v6  ;;  %v3695_v6 = vld [vmem:[#allocation14 + $0x30] sm:$0xff]  ;;  %5711 = vmatprep.subr.bf16.mxu1 %v5710_v7  ;;  %v5748_v7 = vpack.c.bf16 %v3731_v3, %v3729_v2  ;;  %v5656_v2 = vpack.c.bf16 %v3483_v62, %v3481_v61 }
 0x3e7   :  { %v5712_v11 = vpack.c.bf16 %v3695_v6, %v3693_v20  ;;  %v5750_v20 = vpack.c.bf16 %v3736_v5, %v3734_v4  ;;  %v3733_v6 = vld [vmem:[#allocation14 + $0x160] sm:$0xff]  ;;  %v3487_v5 = vld [vmem:[#allocation11 + $0x290] sm:$0xff] }
 0x3e8   :  { %v3485_v4 = vld [vmem:[#allocation11 + $0x280] sm:$0xff] }
 0x3e9   :  { %5613 = vmatpush1.bf16.msra.mxu0 %v5612_v10  ;;  %v3697_v10 = vld [vmem:[#allocation14 + $0x40] sm:$0xff]  ;;  %5713 = vmatpush1.bf16.msra.mxu1 %v5712_v11  ;;  %v3740_v11 = vld [vmem:[#allocation14 + $0x198] sm:$0xff] }
 0x3ea   :  { %5615 = vmatprep.subr.bf16.mxu0 %v5614_v13  ;;  %v3699_v13 = vld [vmem:[#allocation14 + $0x50] sm:$0xff]  ;;  %5715 = vmatprep.subr.bf16.mxu1 %v5714_v12  ;;  %v5752_v12 = vpack.c.bf16 %v3735_v8, %v3733_v6  ;;  %v5660_v6 = vpack.c.bf16 %v3487_v5, %v3485_v4 }
 0x3eb   :  { %v5716_v18 = vpack.c.bf16 %v3699_v13, %v3697_v10  ;;  %v5754_v10 = vpack.c.bf16 %v3740_v11, %v3738_v9  ;;  %v3737_v13 = vld [vmem:[#allocation14 + $0x180] sm:$0xff]  ;;  %v3491_v11 = vld [vmem:[#allocation11 + $0x2b0] sm:$0xff] }
 0x3ec   :  { %v3489_v9 = vld [vmem:[#allocation11 + $0x2a0] sm:$0xff] }
 0x3ed   :  { %5617 = vmatpush1.bf16.msra.mxu0 %v5616_v22  ;;  %v3701_v22 = vld [vmem:[#allocation14 + $0x60] sm:$0xff]  ;;  %5717 = vmatpush1.bf16.msra.mxu1 %v5716_v18  ;;  %v3744_v18 = vld [vmem:[#allocation14 + $0x1b8] sm:$0xff] }
 0x3ee   :  { %5619 = vmatprep.subr.bf16.mxu0 %v5618_v23  ;;  %v3703_v23 = vld [vmem:[#allocation14 + $0x70] sm:$0xff]  ;;  %5719 = vmatprep.subr.bf16.mxu1 %v5718_v19  ;;  %v5756_v19 = vpack.c.bf16 %v3739_v14, %v3737_v13  ;;  %v5664_v13 = vpack.c.bf16 %v3491_v11, %v3489_v9 }
 0x3ef   :  { %v5720_v25 = vpack.c.bf16 %v3703_v23, %v3701_v22  ;;  %v5758_v22 = vpack.c.bf16 %v3744_v18, %v3742_v17  ;;  %v3741_v23 = vld [vmem:[#allocation14 + $0x1a0] sm:$0xff]  ;;  %v3495_v18 = vld [vmem:[#allocation11 + $0x2d0] sm:$0xff] }
 0x3f0   :  { %v3493_v17 = vld [vmem:[#allocation11 + $0x2c0] sm:$0xff] }
 0x3f1   :  { %5621 = vmatpush1.bf16.msra.mxu0 %v5620_v27  ;;  %v3705_v27 = vld [vmem:[#allocation14 + $0x80] sm:$0xff]  ;;  %5721 = vmatpush1.bf16.msra.mxu1 %v5720_v25  ;;  %v3748_v25 = vld [vmem:[#allocation14 + $0x1d8] sm:$0xff] }
 0x3f2   :  { %5623 = vmatprep.subr.bf16.mxu0 %v5622_v28  ;;  %v3707_v28 = vld [vmem:[#allocation14 + $0x90] sm:$0xff]  ;;  %5723 = vmatprep.subr.bf16.mxu1 %v5722_v26  ;;  %v6610_v26 = vld [vmem:[#allocation10] sm:$0xf] }
 0x3f3   :  { %v5724_v31 = vpack.c.bf16 %v3707_v28, %v3705_v27  ;;  %v5760_v27 = vpack.c.bf16 %v3743_v24, %v3741_v23  ;;  %v5762_v28 = vpack.c.bf16 %v3748_v25, %v3746_v21  ;;  %v2816_v29 = vrot.slane %v6610_v26, %v6583_v33  ;;  %v3497_v21 = vld [vmem:[#allocation11 + $0x2e0] sm:$0xff]  ;;  %v3499_v25 = vld [vmem:[#allocation11 + $0x2f0] sm:$0xff] }
 0x3f4   :  { %v2820_v30 = vrot.slane %v6610_v26, %v6574_v16  ;;  %v5668_v23 = vpack.c.bf16 %v3495_v18, %v3493_v17  ;;  %v2824_v11 = vrot.slane %v6610_v26, %v1125_v56  ;;  %v3749_v56 = vld [vmem:[#allocation14 + $0x1e0] sm:$0xff] }
 0x3f5   :  { %5625 = vmatpush1.bf16.msra.mxu0 %v5624_v32  ;;  %v3709_v32 = vld [vmem:[#allocation14 + $0xa0] sm:$0xff]  ;;  %5725 = vmatpush1.bf16.msra.mxu1 %v5724_v31  ;;  %v2828_v31 = vrot.slane %v6610_v26, %v1129_v42  ;;  %v3475_v42 = vld [vmem:[#allocation11 + $0x230] sm:$0xff] }
 0x3f6   :  { %5627 = vmatprep.subr.bf16.mxu0 %v5626_v34  ;;  %v3711_v34 = vld [vmem:[#allocation14 + $0xb0] sm:$0xff]  ;;  %5727 = vmatprep.subr.bf16.mxu1 %v5726_v55 }
 0x3f7   :  { %v5728_v15 = vpack.c.bf16 %v3711_v34, %v3709_v32  ;;  %v3751_v26 = vld [vmem:[#allocation14 + $0x1f0] sm:$0xff] }
 0x3f9   :  { %5629 = vmatpush1.bf16.msra.mxu0 %v5628_v38  ;;  %v3713_v38 = vld [vmem:[#allocation14 + $0xc0] sm:$0xff]  ;;  %5729 = vmatpush1.bf16.msra.mxu1 %v5728_v15 }
 0x3fa   :  { %5631 = vmatprep.subr.bf16.mxu0 %v5630_v39  ;;  %v3715_v39 = vld [vmem:[#allocation14 + $0xd0] sm:$0xff]  ;;  %5731 = vmatprep.subr.bf16.mxu1 %v5730_v37  ;;  %v3469_v15 = vld [vmem:[#allocation11 + $0x200] sm:$0xff] }
 0x3fb   :  { %v5732_v43 = vpack.c.bf16 %v3715_v39, %v3713_v38  ;;  %v3471_v37 = vld [vmem:[#allocation11 + $0x210] sm:$0xff] }
 0x3fd   :  { %5633 = vmatpush1.bf16.msra.mxu0 %v5632_v45  ;;  %v3717_v45 = vld [vmem:[#allocation14 + $0xe0] sm:$0xff]  ;;  %5733 = vmatpush1.bf16.msra.mxu1 %v5732_v43 }
 0x3fe   :  { %5635 = vmatprep.subr.bf16.mxu0 %v5634_v46  ;;  %v3719_v46 = vld [vmem:[#allocation14 + $0xf0] sm:$0xff]  ;;  %5735 = vmatprep.subr.bf16.mxu1 %v5734_v44  ;;  %v5644_v44 = vpack.c.bf16 %v3471_v37, %v3469_v15  ;;  %v3505_v37 = vld [vmem:[#allocation11 + $0x320] sm:$0xff] }
 0x401   :  { %5637 = vmatpush1.bf16.msra.mxu0 %v5636_v49  ;;  %v5736_v49 = vpack.c.bf16 %v3719_v46, %v3717_v45  ;;  %v5646_v46 = vpack.c.bf16 %v3476_v41, %v3474_v40  ;;  %v3512_v40 = vld [vmem:[#allocation11 + $0x358] sm:$0xff] }
 0x402   :  { %5639 = vmatprep.subr.bf16.mxu0 %v5638_v52  ;;  %v3723_v52 = vld [vmem:[#allocation14 + $0x110] sm:$0xff] }
 0x403   :  { %5737 = vmatpush1.bf16.msra.mxu1 %v5736_v49  ;;  %v3478_v49 = vld [vmem:[#allocation11 + $0x248] sm:$0xff] }
 0x404   :  { %5739 = vmatprep.subr.bf16.mxu1 %v5738_v50  ;;  %v3480_v50 = vld [vmem:[#allocation11 + $0x258] sm:$0xff] }
 0x405   :  { %5641 = vmatpush1.bf16.msra.mxu0 %v5640_v57  ;;  %v5740_v57 = vpack.c.bf16 %v3723_v52, %v3721_v51  ;;  %v5648_v51 = vpack.c.bf16 %v3475_v42, %v3473_v47  ;;  %v5650_v52 = vpack.c.bf16 %v3480_v50, %v3478_v49  ;;  %v3516_v47 = vld [vmem:[#allocation11 + $0x378] sm:$0xff]  ;;  %v3513_v49 = vld [vmem:[#allocation11 + $0x360] sm:$0xff]  ;;  %v3515_v50 = vld [vmem:[#allocation11 + $0x370] sm:$0xff] }
 0x406   :  { %5643 = vmatprep.subr.bf16.mxu0 %v5642_v60  ;;  %v3727_v60 = vld [vmem:[#allocation14 + $0x130] sm:$0xff] }
 0x407   :  { %5741 = vmatpush1.bf16.msra.mxu1 %v5740_v57  ;;  %v5744_v63 = vpack.c.bf16 %v3727_v60, %v3725_v59  ;;  %v3482_v57 = vld [vmem:[#allocation11 + $0x268] sm:$0xff]  ;;  %v5652_v59 = vpack.c.bf16 %v3479_v54, %v3477_v53  ;;  %v5688_v53 = vpack.c.bf16 %v3515_v50, %v3513_v49 }
 0x408   :  { %5743 = vmatprep.subr.bf16.mxu1 %v5742_v58  ;;  %v3484_v58 = vld [vmem:[#allocation11 + $0x278] sm:$0xff]  ;;  %v3846_v50 = vld [vmem:[#allocation17 + $0x40] sm:$0xff] }
 0x409   :  { %v5654_v60 = vpack.c.bf16 %v3484_v58, %v3482_v57  ;;  %v3517_v57 = vld [vmem:[#allocation11 + $0x380] sm:$0xff]  ;;  %v3519_v58 = vld [vmem:[#allocation11 + $0x390] sm:$0xff] }
 0x40a   :  { %v5692_v61 = vpack.c.bf16 %v3519_v58, %v3517_v57  ;;  %v3850_v58 = vld [vmem:[#allocation17 + $0x60] sm:$0xff] }
 0x40b   :  { %5745 = vmatpush1.bf16.msra.mxu1 %v5744_v63  ;;  %v3486_v63 = vld [vmem:[#allocation11 + $0x288] sm:$0xff] }
 0x40c   :  { %5747 = vmatprep.subr.bf16.mxu1 %v5746_v0  ;;  %v3488_v0 = vld [vmem:[#allocation11 + $0x298] sm:$0xff] }
 0x40d   :  { %v5658_v3 = vpack.c.bf16 %v3488_v0, %v3486_v63  ;;  %v3521_v63 = vld [vmem:[#allocation11 + $0x3a0] sm:$0xff]  ;;  %v3523_v0 = vld [vmem:[#allocation11 + $0x3b0] sm:$0xff] }
 0x40e   :  { %v5696_v4 = vpack.c.bf16 %v3523_v0, %v3521_v63  ;;  %v3854_v0 = vld [vmem:[#allocation17 + $0x80] sm:$0xff] }
 0x40f   :  { %5749 = vmatpush1.bf16.msra.mxu1 %v5748_v7  ;;  %v3490_v7 = vld [vmem:[#allocation11 + $0x2a8] sm:$0xff] }
 0x410   :  { %5751 = vmatprep.subr.bf16.mxu1 %v5750_v20  ;;  %v3492_v20 = vld [vmem:[#allocation11 + $0x2b8] sm:$0xff] }
 0x411   :  { %v5662_v8 = vpack.c.bf16 %v3492_v20, %v3490_v7  ;;  %v3525_v7 = vld [vmem:[#allocation11 + $0x3c0] sm:$0xff]  ;;  %v3527_v20 = vld [vmem:[#allocation11 + $0x3d0] sm:$0xff] }
 0x412   :  { %v5700_v9 = vpack.c.bf16 %v3527_v20, %v3525_v7  ;;  %v3858_v20 = vld [vmem:[#allocation17 + $0xa0] sm:$0xff] }
 0x413   :  { %5753 = vmatpush1.bf16.msra.mxu1 %v5752_v12  ;;  %v3494_v12 = vld [vmem:[#allocation11 + $0x2c8] sm:$0xff] }
 0x414   :  { %5755 = vmatprep.subr.bf16.mxu1 %v5754_v10  ;;  %v3496_v10 = vld [vmem:[#allocation11 + $0x2d8] sm:$0xff] }
 0x415   :  { %v5666_v14 = vpack.c.bf16 %v3496_v10, %v3494_v12  ;;  %v3529_v10 = vld [vmem:[#allocation11 + $0x3e0] sm:$0xff] }
 0x417   :  { %5757 = vmatpush1.bf16.msra.mxu1 %v5756_v19  ;;  %v3498_v19 = vld [vmem:[#allocation11 + $0x2e8] sm:$0xff] }
 0x418   :  { %5759 = vmatprep.subr.bf16.mxu1 %v5758_v22  ;;  %v3500_v22 = vld [vmem:[#allocation11 + $0x2f8] sm:$0xff] }
 0x419   :  { %v5670_v24 = vpack.c.bf16 %v3500_v22, %v3498_v19  ;;  %v3745_v19 = vld [vmem:[#allocation14 + $0x1c0] sm:$0xff]  ;;  %v3747_v22 = vld [vmem:[#allocation14 + $0x1d0] sm:$0xff] }
 0x41b   :  { %5761 = vmatpush1.bf16.msra.mxu1 %v5760_v27  ;;  %v3502_v27 = vld [vmem:[#allocation11 + $0x308] sm:$0xff] }
 0x41c   :  { %5763 = vmatprep.subr.bf16.mxu1 %v5762_v28  ;;  %v3504_v28 = vld [vmem:[#allocation11 + $0x318] sm:$0xff] }
 0x49b   :  { %v3112_v55 = vpop.f32.mrb[4].mxu0  ;;  %v6619_v32 = vpop.f32.mrb[4].mxu1 }
 0x49c   :  { %v5874_v34 = vadd.f32 %v3112_v55, %v2816_v29  ;;  %v3114_v35 = vpop.f32.mrb[5].mxu0  ;;  %v3398_v36 = vpop.f32.mrb[5].mxu1  ;;  %v5672_v29 = vpack.c.bf16 %v3499_v25, %v3497_v21  ;;  %v3503_v55 = vld [vmem:[#allocation11 + $0x310] sm:$0xff]  ;;  %v5876_v17 = vadd.f32 %v6619_v32, %v2824_v11  ;;  %v5768_v25 = vpack.c.bf16 %v3751_v26, %v3749_v56  ;;  %v3533_v32 = vld [vmem:[#allocation13] sm:$0x3]  ;;  %v3870_v26 = vld [vmem:[#allocation17 + $0x100] sm:$0xff] }
 0x49d   :  { %v5875_v38 = vadd.f32 %v3114_v35, %v2820_v30  ;;  %v5877_v39 = vadd.f32 %v3398_v36, %v2828_v31  ;;  %v5674_v30 = vpack.c.bf16 %v3504_v28, %v3502_v27  ;;  %v3501_v31 = vld [vmem:[#allocation11 + $0x300] sm:$0xff]  ;;  %v3508_v35 = vld [vmem:[#allocation11 + $0x338] sm:$0xff]  ;;  %v3839_v27 = vld [vmem:[#allocation17 + $0x8] sm:$0xff] }
 0x49e   :  { %v3401_v45 = vmax.f32 %v5874_v34, 0.0  ;;  %v3506_v34 = vld [vmem:[#allocation11 + $0x328] sm:$0xff]  ;;  %v5676_v36 = vpack.c.bf16 %v3503_v55, %v3501_v31  ;;  %v3403_v18 = vmax.f32 %v5876_v17, 0.0  ;;  %v3841_v28 = vld [vmem:[#allocation17 + $0x18] sm:$0xff]  ;;  %v3542_v31 = vrot.slane %v3533_v32, %v6574_v16 }
 0x49f   :  { %v3402_v43 = vmax.f32 %v5875_v38, 0.0  ;;  %v3404_v48 = vmax.f32 %v5877_v39, 0.0  ;;  %v5678_v15 = vpack.c.bf16 %v3508_v35, %v3506_v34  ;;  %v3507_v38 = vld [vmem:[#allocation11 + $0x330] sm:$0xff]  ;;  %v3510_v39 = vld [vmem:[#allocation11 + $0x348] sm:$0xff]  ;;  %v3869_v17 = vld [vmem:[#allocation17 + $0xf8] sm:$0xff] }
 0x4a0   :  { %v5680_v41 = vpack.c.bf16 %v3507_v38, %v3505_v37  ;;  %v3843_v38 = vld [vmem:[#allocation17 + $0x28] sm:$0xff] }
 0x4a1   :  { %3609 = vmatprep.mubr.f32.mxu0 %v3402_v43  ;;  %v5682_v43 = vpack.c.bf16 %v3512_v40, %v3510_v39  ;;  %v3845_v39 = vld [vmem:[#allocation17 + $0x38] sm:$0xff] }
 0x4a2   :  { %3610 = vmatmul.mubr.f32.vlgmr.msra.gmra.mrb[6].mxu0 %v3401_v45  ;;  %v3511_v45 = vld [vmem:[#allocation11 + $0x350] sm:$0xff] }
 0x4a3   :  { %5645 = vmatpush1.bf16.msra.mxu0 %v5644_v44  ;;  %3680 = vmatprep.mubr.f32.mxu0 %v3404_v48  ;;  %v3509_v44 = vld [vmem:[#allocation11 + $0x340] sm:$0xff] }
 0x4a4   :  { %5647 = vmatprep.subr.bf16.mxu0 %v5646_v46  ;;  %v3514_v46 = vld [vmem:[#allocation11 + $0x368] sm:$0xff]  ;;  %v5684_v42 = vpack.c.bf16 %v3511_v45, %v3509_v44  ;;  %v5774_v44 = vpack.c.bf16 %v3845_v39, %v3843_v38  ;;  %v3885_v39 = vld [vmem:[#allocation17 + $0x178] sm:$0xff] }
 0x4a5   :  { %v5686_v48 = vpack.c.bf16 %v3516_v47, %v3514_v46  ;;  %v3842_v45 = vld [vmem:[#allocation17 + $0x20] sm:$0xff]  ;;  %v3844_v46 = vld [vmem:[#allocation17 + $0x30] sm:$0xff]  ;;  %v3847_v47 = vld [vmem:[#allocation17 + $0x48] sm:$0xff] }
 0x4a6   :  { %v3883_v38 = vld [vmem:[#allocation17 + $0x168] sm:$0xff] }
 0x4a7   :  { %5649 = vmatpush1.bf16.msra.mxu0 %v5648_v51  ;;  %v3518_v51 = vld [vmem:[#allocation11 + $0x388] sm:$0xff] }
 0x4a8   :  { %5651 = vmatprep.subr.bf16.mxu0 %v5650_v52  ;;  %v3520_v52 = vld [vmem:[#allocation11 + $0x398] sm:$0xff] }
 0x4a9   :  { %v5690_v54 = vpack.c.bf16 %v3520_v52, %v3518_v51  ;;  %v3848_v51 = vld [vmem:[#allocation17 + $0x50] sm:$0xff]  ;;  %v3851_v52 = vld [vmem:[#allocation17 + $0x68] sm:$0xff] }
 0x4ab   :  { %5653 = vmatpush1.bf16.msra.mxu0 %v5652_v59  ;;  %v3522_v59 = vld [vmem:[#allocation11 + $0x3a8] sm:$0xff] }
 0x4ac   :  { %5655 = vmatprep.subr.bf16.mxu0 %v5654_v60  ;;  %v3524_v60 = vld [vmem:[#allocation11 + $0x3b8] sm:$0xff] }
 0x4ad   :  { %v5694_v62 = vpack.c.bf16 %v3524_v60, %v3522_v59  ;;  %v3852_v59 = vld [vmem:[#allocation17 + $0x70] sm:$0xff]  ;;  %v3855_v60 = vld [vmem:[#allocation17 + $0x88] sm:$0xff] }
 0x4af   :  { %5657 = vmatpush1.bf16.msra.mxu0 %v5656_v2  ;;  %v3526_v2 = vld [vmem:[#allocation11 + $0x3c8] sm:$0xff] }
 0x4b0   :  { %5659 = vmatprep.subr.bf16.mxu0 %v5658_v3  ;;  %v3528_v3 = vld [vmem:[#allocation11 + $0x3d8] sm:$0xff] }
 0x4b1   :  { %v5698_v5 = vpack.c.bf16 %v3528_v3, %v3526_v2  ;;  %v3856_v2 = vld [vmem:[#allocation17 + $0x90] sm:$0xff]  ;;  %v3859_v3 = vld [vmem:[#allocation17 + $0xa8] sm:$0xff] }
 0x4b3   :  { %5661 = vmatpush1.bf16.msra.mxu0 %v5660_v6  ;;  %v3530_v6 = vld [vmem:[#allocation11 + $0x3e8] sm:$0xff] }
 0x4b4   :  { %5663 = vmatprep.subr.bf16.mxu0 %v5662_v8  ;;  %v3532_v8 = vld [vmem:[#allocation11 + $0x3f8] sm:$0xff] }
 0x4b5   :  { %v5702_v12 = vpack.c.bf16 %v3532_v8, %v3530_v6  ;;  %v3860_v6 = vld [vmem:[#allocation17 + $0xb0] sm:$0xff]  ;;  %v3863_v8 = vld [vmem:[#allocation17 + $0xc8] sm:$0xff] }
 0x4b6   :  { %v5792_v11 = vpack.c.bf16 %v3860_v6, %v3858_v20  ;;  %v4005_v6 = vld [vmem:[#allocation20 + $0x80] sm:$0xff] }
 0x4b7   :  { %5665 = vmatpush1.bf16.msra.mxu0 %v5664_v13  ;;  %v3531_v13 = vld [vmem:[#allocation11 + $0x3f0] sm:$0xff] }
 0x4b8   :  { %5667 = vmatprep.subr.bf16.mxu0 %v5666_v14  ;;  %v5704_v14 = vpack.c.bf16 %v3531_v13, %v3529_v10  ;;  %v3862_v10 = vld [vmem:[#allocation17 + $0xc0] sm:$0xff]  ;;  %v3864_v13 = vld [vmem:[#allocation17 + $0xd0] sm:$0xff] }
 0x4bb   :  { %5669 = vmatpush1.bf16.msra.mxu0 %v5668_v23  ;;  %v5764_v23 = vpack.c.bf16 %v3747_v22, %v3745_v19  ;;  %v3866_v22 = vld [vmem:[#allocation17 + $0xe0] sm:$0xff] }
 0x4bc   :  { %5671 = vmatprep.subr.bf16.mxu0 %v5670_v24  ;;  %v3750_v24 = vld [vmem:[#allocation14 + $0x1e8] sm:$0xff] }
 0x4bd   :  { %5765 = vmatpush1.bf16.msra.mxu1 %v5764_v23  ;;  %v5766_v21 = vpack.c.bf16 %v3752_v1, %v3750_v24  ;;  %v3868_v23 = vld [vmem:[#allocation17 + $0xf0] sm:$0xff]  ;;  %v3871_v24 = vld [vmem:[#allocation17 + $0x108] sm:$0xff]  ;;  %v3873_v1 = vld [vmem:[#allocation17 + $0x118] sm:$0xff] }
 0x4be   :  { %v5802_v56 = vpack.c.bf16 %v3873_v1, %v3871_v24 }
 0x4bf   :  { %5673 = vmatpush1.bf16.msra.mxu0 %v5672_v29  ;;  %5767 = vmatprep.subr.bf16.mxu1 %v5766_v21  ;;  %v5770_v29 = vpack.c.bf16 %v3841_v28, %v3839_v27  ;;  %v5800_v21 = vpack.c.bf16 %v3868_v23, %v3866_v22  ;;  %v3875_v27 = vld [vmem:[#allocation17 + $0x128] sm:$0xff]  ;;  %v3877_v28 = vld [vmem:[#allocation17 + $0x138] sm:$0xff] }
 0x4c0   :  { %5675 = vmatprep.subr.bf16.mxu0 %v5674_v30  ;;  %v3538_v30 = vrot.slane %v3533_v32, %v6583_v33  ;;  %v5806_v32 = vpack.c.bf16 %v3877_v28, %v3875_v27  ;;  %v4009_v22 = vld [vmem:[#allocation20 + $0xa0] sm:$0xff]  ;;  %v4010_v23 = vld [vmem:[#allocation20 + $0xa8] sm:$0xff] }
 0x4c1   :  { %5769 = vmatpush1.bf16.msra.mxu1 %v5768_v25  ;;  %v3872_v25 = vld [vmem:[#allocation17 + $0x110] sm:$0xff]  ;;  %v5842_v1 = vpack.c.bf16 %v4010_v23, %v4009_v22 }
 0x4c2   :  { %5771 = vmatprep.subr.bf16.mxu1 %v5770_v29  ;;  %v5804_v29 = vpack.c.bf16 %v3872_v25, %v3870_v26  ;;  %v4011_v26 = vld [vmem:[#allocation20 + $0xb0] sm:$0xff]  ;;  %v4012_v25 = vld [vmem:[#allocation20 + $0xb8] sm:$0xff] }
 0x4c3   :  { %5677 = vmatpush1.bf16.msra.mxu0 %v5676_v36  ;;  %v3838_v36 = vld [vmem:[#allocation17] sm:$0xff]  ;;  %v5846_v28 = vpack.c.bf16 %v4012_v25, %v4011_v26 }
 0x4c4   :  { %5679 = vmatprep.subr.bf16.mxu0 %v5678_v15  ;;  %v3840_v15 = vld [vmem:[#allocation17 + $0x10] sm:$0xff] }
 0x4c7   :  { %5681 = vmatpush1.bf16.msra.mxu0 %v5680_v41  ;;  %v5772_v41 = vpack.c.bf16 %v3840_v15, %v3838_v36  ;;  %v3878_v15 = vld [vmem:[#allocation17 + $0x140] sm:$0xff] }
 0x4c8   :  { %5683 = vmatprep.subr.bf16.mxu0 %v5682_v43 }
 0x4cb   :  { %5685 = vmatpush1.bf16.msra.mxu0 %v5684_v42  ;;  %v3849_v42 = vld [vmem:[#allocation17 + $0x58] sm:$0xff] }
 0x4cc   :  { %5687 = vmatprep.subr.bf16.mxu0 %v5686_v48  ;;  %v5776_v48 = vpack.c.bf16 %v3844_v46, %v3842_v45  ;;  %v5778_v49 = vpack.c.bf16 %v3849_v42, %v3847_v47  ;;  %v3887_v45 = vld [vmem:[#allocation17 + $0x188] sm:$0xff]  ;;  %v3889_v46 = vld [vmem:[#allocation17 + $0x198] sm:$0xff] }
 0x4cd   :  { %v5818_v42 = vpack.c.bf16 %v3889_v46, %v3887_v45 }
 0x4cf   :  { %5689 = vmatpush1.bf16.msra.mxu0 %v5688_v53  ;;  %v3853_v53 = vld [vmem:[#allocation17 + $0x78] sm:$0xff] }
 0x4d0   :  { %5691 = vmatprep.subr.bf16.mxu0 %v5690_v54  ;;  %v5780_v54 = vpack.c.bf16 %v3848_v51, %v3846_v50  ;;  %v5782_v57 = vpack.c.bf16 %v3853_v53, %v3851_v52  ;;  %v3891_v50 = vld [vmem:[#allocation17 + $0x1a8] sm:$0xff]  ;;  %v3893_v51 = vld [vmem:[#allocation17 + $0x1b8] sm:$0xff] }
 0x4d1   :  { %v5822_v53 = vpack.c.bf16 %v3893_v51, %v3891_v50 }
 0x4d3   :  { %5693 = vmatpush1.bf16.msra.mxu0 %v5692_v61  ;;  %v3857_v61 = vld [vmem:[#allocation17 + $0x98] sm:$0xff] }
 0x4d4   :  { %5695 = vmatprep.subr.bf16.mxu0 %v5694_v62  ;;  %v5784_v62 = vpack.c.bf16 %v3852_v59, %v3850_v58  ;;  %v5786_v63 = vpack.c.bf16 %v3857_v61, %v3855_v60  ;;  %v3895_v58 = vld [vmem:[#allocation17 + $0x1c8] sm:$0xff]  ;;  %v3897_v59 = vld [vmem:[#allocation17 + $0x1d8] sm:$0xff] }
 0x4d5   :  { %v5826_v61 = vpack.c.bf16 %v3897_v59, %v3895_v58  ;;  %v4002_v58 = vld [vmem:[#allocation20 + $0x68] sm:$0xff] }
 0x4d7   :  { %5697 = vmatpush1.bf16.msra.mxu0 %v5696_v4  ;;  %v3861_v4 = vld [vmem:[#allocation17 + $0xb8] sm:$0xff] }
 0x4d8   :  { %5699 = vmatprep.subr.bf16.mxu0 %v5698_v5  ;;  %v5788_v5 = vpack.c.bf16 %v3856_v2, %v3854_v0  ;;  %v5790_v7 = vpack.c.bf16 %v3861_v4, %v3859_v3  ;;  %v3899_v2 = vld [vmem:[#allocation17 + $0x1e8] sm:$0xff]  ;;  %v3901_v3 = vld [vmem:[#allocation17 + $0x1f8] sm:$0xff] }
 0x4d9   :  { %v5830_v4 = vpack.c.bf16 %v3901_v3, %v3899_v2  ;;  %v3902_v3 = vld [vmem:[#allocation19] sm:$0x3] }
 0x4db   :  { %5701 = vmatpush1.bf16.msra.mxu0 %v5700_v9  ;;  %v3865_v9 = vld [vmem:[#allocation17 + $0xd8] sm:$0xff] }
 0x4dc   :  { %5703 = vmatprep.subr.bf16.mxu0 %v5702_v12  ;;  %v5794_v12 = vpack.c.bf16 %v3865_v9, %v3863_v8  ;;  %v4006_v8 = vld [vmem:[#allocation20 + $0x88] sm:$0xff]  ;;  %v3989_v9 = vld [vmem:[#allocation20] sm:$0xff] }
 0x4df   :  { %5705 = vmatpush1.bf16.msra.mxu0 %v5704_v14  ;;  %v3867_v14 = vld [vmem:[#allocation17 + $0xe8] sm:$0xff] }
 0x4e0   :  { %v5798_v19 = vpack.c.bf16 %v3869_v17, %v3867_v14 }
 0x4e2   :  { %3681 = vmatmul.mubr.f32.vlgmr.msra.gmra.mrb[6].mxu0 %v3403_v18  ;;  %v5796_v18 = vpack.c.bf16 %v3864_v13, %v3862_v10  ;;  %v4007_v10 = vld [vmem:[#allocation20 + $0x90] sm:$0xff]  ;;  %v4008_v13 = vld [vmem:[#allocation20 + $0x98] sm:$0xff] }
 0x4e3   :  { %v5838_v17 = vpack.c.bf16 %v4008_v13, %v4007_v10 }
 0x5b5   :  { %v3682_v55 = vpop.f32.mrb[6].mxu0 }
 0x5b6   :  { %v5878_v34 = vadd.f32 %v3682_v55, %v3538_v30  ;;  %v3684_v35 = vpop.f32.mrb[7].mxu0  ;;  %v3874_v30 = vld [vmem:[#allocation17 + $0x120] sm:$0xff]  ;;  %v3879_v55 = vld [vmem:[#allocation17 + $0x148] sm:$0xff] }
 0x5b7   :  { %v5879_v37 = vadd.f32 %v3684_v35, %v3542_v31  ;;  %v3876_v31 = vld [vmem:[#allocation17 + $0x130] sm:$0xff] }
 0x5b8   :  { %v3687_v43 = vmax.f32 %v5878_v34, 0.0  ;;  %v3881_v34 = vld [vmem:[#allocation17 + $0x158] sm:$0xff]  ;;  %v5808_v35 = vpack.c.bf16 %v3876_v31, %v3874_v30  ;;  %v4013_v30 = vld [vmem:[#allocation20 + $0xc0] sm:$0xff]  ;;  %v4014_v31 = vld [vmem:[#allocation20 + $0xc8] sm:$0xff] }
 0x5b9   :  { %v3688_v40 = vmax.f32 %v5879_v37, 0.0  ;;  %v5810_v36 = vpack.c.bf16 %v3881_v34, %v3879_v55  ;;  %v3880_v37 = vld [vmem:[#allocation17 + $0x150] sm:$0xff]  ;;  %v5850_v34 = vpack.c.bf16 %v4014_v31, %v4013_v30 }
 0x5bb   :  { %3829 = vmatprep.mubr.f32.mxu1 %v3688_v40  ;;  %v5812_v40 = vpack.c.bf16 %v3880_v37, %v3878_v15  ;;  %v4015_v15 = vld [vmem:[#allocation20 + $0xd0] sm:$0xff]  ;;  %v4016_v37 = vld [vmem:[#allocation20 + $0xd8] sm:$0xff] }
 0x5bc   :  { %3830 = vmatmul.mubr.f32.vlgmr.msra.gmra.mrb[6].mxu1 %v3687_v43  ;;  %v3882_v43 = vld [vmem:[#allocation17 + $0x160] sm:$0xff] }
 0x5bd   :  { %5773 = vmatpush1.bf16.msra.mxu1 %v5772_v41  ;;  %v5814_v41 = vpack.c.bf16 %v3885_v39, %v3883_v38  ;;  %v5854_v39 = vpack.c.bf16 %v4016_v37, %v4015_v15 }
 0x5be   :  { %5775 = vmatprep.subr.bf16.mxu1 %v5774_v44  ;;  %v3884_v44 = vld [vmem:[#allocation17 + $0x170] sm:$0xff] }
 0x5bf   :  { %v5816_v47 = vpack.c.bf16 %v3884_v44, %v3882_v43  ;;  %v4017_v43 = vld [vmem:[#allocation20 + $0xe0] sm:$0xff]  ;;  %v4018_v44 = vld [vmem:[#allocation20 + $0xe8] sm:$0xff] }
 0x5c0   :  { %v5858_v46 = vpack.c.bf16 %v4018_v44, %v4017_v43 }
 0x5c1   :  { %5777 = vmatpush1.bf16.msra.mxu1 %v5776_v48  ;;  %v3886_v48 = vld [vmem:[#allocation17 + $0x180] sm:$0xff] }
 0x5c2   :  { %5779 = vmatprep.subr.bf16.mxu1 %v5778_v49  ;;  %v3888_v49 = vld [vmem:[#allocation17 + $0x190] sm:$0xff] }
 0x5c3   :  { %v5820_v52 = vpack.c.bf16 %v3888_v49, %v3886_v48 }
 0x5c5   :  { %5781 = vmatpush1.bf16.msra.mxu1 %v5780_v54  ;;  %v3890_v54 = vld [vmem:[#allocation17 + $0x1a0] sm:$0xff] }
 0x5c6   :  { %5783 = vmatprep.subr.bf16.mxu1 %v5782_v57  ;;  %v3892_v57 = vld [vmem:[#allocation17 + $0x1b0] sm:$0xff] }
 0x5c7   :  { %v5824_v60 = vpack.c.bf16 %v3892_v57, %v3890_v54  ;;  %v4001_v57 = vld [vmem:[#allocation20 + $0x60] sm:$0xff] }
 0x5c8   :  { %v5860_v59 = vpack.c.bf16 %v4002_v58, %v4001_v57 }
 0x5c9   :  { %5785 = vmatpush1.bf16.msra.mxu1 %v5784_v62  ;;  %v3894_v62 = vld [vmem:[#allocation17 + $0x1c0] sm:$0xff] }
 0x5ca   :  { %5787 = vmatprep.subr.bf16.mxu1 %v5786_v63  ;;  %v3896_v63 = vld [vmem:[#allocation17 + $0x1d0] sm:$0xff] }
 0x5cb   :  { %v5828_v0 = vpack.c.bf16 %v3896_v63, %v3894_v62  ;;  %v4003_v63 = vld [vmem:[#allocation20 + $0x70] sm:$0xff] }
 0x5cd   :  { %5789 = vmatpush1.bf16.msra.mxu1 %v5788_v5  ;;  %v3898_v5 = vld [vmem:[#allocation17 + $0x1e0] sm:$0xff] }
 0x5ce   :  { %5791 = vmatprep.subr.bf16.mxu1 %v5790_v7  ;;  %v3900_v7 = vld [vmem:[#allocation17 + $0x1f0] sm:$0xff] }
 0x5cf   :  { %v5832_v20 = vpack.c.bf16 %v3900_v7, %v3898_v5  ;;  %v3911_v5 = vrot.slane %v3902_v3, %v6574_v16 }
 0x5d1   :  { %5793 = vmatpush1.bf16.msra.mxu1 %v5792_v11  ;;  %v5834_v11 = vpack.c.bf16 %v4006_v8, %v4005_v6 }
 0x5d2   :  { %5795 = vmatprep.subr.bf16.mxu1 %v5794_v12  ;;  %v3990_v12 = vld [vmem:[#allocation20 + $0x8] sm:$0xff] }
 0x5d3   :  { %v5836_v14 = vpack.c.bf16 %v3990_v12, %v3989_v9  ;;  %5835 = vmatprep.subr.bf16.mxu0 %v5834_v11 }
 0x5d5   :  { %5797 = vmatpush1.bf16.msra.mxu1 %v5796_v18  ;;  %v3991_v18 = vld [vmem:[#allocation20 + $0x10] sm:$0xff]  ;;  %5837 = vmatpush3.bf16.msra.mxu0 %v5836_v14 }
 0x5d6   :  { %5799 = vmatprep.subr.bf16.mxu1 %v5798_v19  ;;  %v3992_v19 = vld [vmem:[#allocation20 + $0x18] sm:$0xff]  ;;  %5839 = vmatprep.subr.bf16.mxu0 %v5838_v17 }
 0x5d7   :  { %v5840_v24 = vpack.c.bf16 %v3992_v19, %v3991_v18 }
 0x5d9   :  { %5801 = vmatpush1.bf16.msra.mxu1 %v5800_v21  ;;  %v3993_v21 = vld [vmem:[#allocation20 + $0x20] sm:$0xff]  ;;  %5841 = vmatpush3.bf16.msra.mxu0 %v5840_v24 }
 0x5da   :  { %5803 = vmatprep.subr.bf16.mxu1 %v5802_v56  ;;  %v3994_v56 = vld [vmem:[#allocation20 + $0x28] sm:$0xff]  ;;  %5843 = vmatprep.subr.bf16.mxu0 %v5842_v1 }
 0x5db   :  { %v5844_v27 = vpack.c.bf16 %v3994_v56, %v3993_v21 }
 0x5dd   :  { %5805 = vmatpush1.bf16.msra.mxu1 %v5804_v29  ;;  %v3995_v29 = vld [vmem:[#allocation20 + $0x30] sm:$0xff]  ;;  %5845 = vmatpush3.bf16.msra.mxu0 %v5844_v27 }
 0x5de   :  { %5807 = vmatprep.subr.bf16.mxu1 %v5806_v32  ;;  %v3996_v32 = vld [vmem:[#allocation20 + $0x38] sm:$0xff]  ;;  %5847 = vmatprep.subr.bf16.mxu0 %v5846_v28 }
 0x5df   :  { %v5848_v55 = vpack.c.bf16 %v3996_v32, %v3995_v29 }
 0x5e1   :  { %5809 = vmatpush1.bf16.msra.mxu1 %v5808_v35  ;;  %v3997_v35 = vld [vmem:[#allocation20 + $0x40] sm:$0xff]  ;;  %5849 = vmatpush3.bf16.msra.mxu0 %v5848_v55 }
 0x5e2   :  { %5811 = vmatprep.subr.bf16.mxu1 %v5810_v36  ;;  %v3998_v36 = vld [vmem:[#allocation20 + $0x48] sm:$0xff]  ;;  %5851 = vmatprep.subr.bf16.mxu0 %v5850_v34 }
 0x5e3   :  { %v5852_v38 = vpack.c.bf16 %v3998_v36, %v3997_v35 }
 0x5e5   :  { %5813 = vmatpush1.bf16.msra.mxu1 %v5812_v40  ;;  %v3999_v40 = vld [vmem:[#allocation20 + $0x50] sm:$0xff]  ;;  %5853 = vmatpush3.bf16.msra.mxu0 %v5852_v38 }
 0x5e6   :  { %5815 = vmatprep.subr.bf16.mxu1 %v5814_v41  ;;  %v4000_v41 = vld [vmem:[#allocation20 + $0x58] sm:$0xff]  ;;  %5855 = vmatprep.subr.bf16.mxu0 %v5854_v39 }
 0x5e7   :  { %v5856_v45 = vpack.c.bf16 %v4000_v41, %v3999_v40 }
 0x5e9   :  { %5817 = vmatpush1.bf16.msra.mxu1 %v5816_v47  ;;  %5857 = vmatpush3.bf16.msra.mxu0 %v5856_v45  ;;  %v3753_v47 = vld [vmem:[#allocation16] sm:$0x3] }
 0x5ea   :  { %5819 = vmatprep.subr.bf16.mxu1 %v5818_v42  ;;  %5859 = vmatprep.subr.bf16.mxu0 %v5858_v46  ;;  %v3758_v42 = vrot.slane %v3753_v47, %v6583_v33  ;;  %v3762_v48 = vrot.slane %v3753_v47, %v6574_v16 }
 0x5ed   :  { %5821 = vmatpush1.bf16.msra.mxu1 %v5820_v52  ;;  %5861 = vmatpush3.bf16.msra.mxu0 %v5860_v59 }
 0x5ee   :  { %5823 = vmatprep.subr.bf16.mxu1 %v5822_v53 }
 0x5f1   :  { %5825 = vmatpush1.bf16.msra.mxu1 %v5824_v60  ;;  %v4019_v60 = vld [vmem:[#allocation20 + $0xf0] sm:$0xff] }
 0x5f2   :  { %5827 = vmatprep.subr.bf16.mxu1 %v5826_v61  ;;  %v4020_v61 = vld [vmem:[#allocation20 + $0xf8] sm:$0xff] }
 0x5f3   :  { %v5862_v62 = vpack.c.bf16 %v4020_v61, %v4019_v60 }
 0x5f5   :  { %5829 = vmatpush1.bf16.msra.mxu1 %v5828_v0  ;;  %v4004_v0 = vld [vmem:[#allocation20 + $0x78] sm:$0xff]  ;;  %5863 = vmatprep.subr.bf16.mxu0 %v5862_v62 }
 0x5f6   :  { %5831 = vmatprep.subr.bf16.mxu1 %v5830_v4  ;;  %v5864_v2 = vpack.c.bf16 %v4004_v0, %v4003_v63  ;;  %v3907_v4 = vrot.slane %v3902_v3, %v6583_v33 }
 0x5f8   :  { %5865 = vmatpush3.bf16.msra.mxu0 %v5864_v2 }
 0x5f9   :  { %5833 = vmatpush1.bf16.msra.mxu1 %v5832_v20 }
 0x68f   :  { %v3831_v49 = vpop.f32.mrb[6].mxu1 }
 0x690   :  { %v3832_v50 = vadd.f32 %v3831_v49, %v3758_v42  ;;  %v3833_v51 = vpop.f32.mrb[7].mxu1 }
 0x691   :  { %v3834_v52 = vadd.f32 %v3833_v51, %v3762_v48 }
 0x692   :  { %v3836_v54 = vmax.f32 %v3832_v50, 0.0 }
 0x693   :  { %v3837_v53 = vmax.f32 %v3834_v52, 0.0 }
 0x695   :  { %3978 = vmatprep.mubr.f32.mxu1 %v3837_v53 }
 0x696   :  { %3979 = vmatmul.mubr.f32.vlgmr.msra.gmra.mrb[8].mxu1 %v3836_v54 }
 0x769   :  { %v3980_v7 = vpop.f32.mrb[8].mxu1 }
 0x76a   :  { %v3981_v20 = vadd.f32 %v3980_v7, %v3907_v4  ;;  %v3982_v6 = vpop.f32.mrb[9].mxu1 }
 0x76b   :  { %v3983_v8 = vadd.f32 %v3982_v6, %v3911_v5 }
 0x76c   :  { %v3985_v9 = vmax.f32 %v3981_v20, 0.0 }
 0x76d   :  { %v3986_v11 = vmax.f32 %v3983_v8, 0.0 }
 0x76e   :  { %3987 = vst [vmem:[#allocation23] sm:$0xff] %v3985_v9 }
 0x76f   :  { %3988 = vst [vmem:[#allocation23 + $0x8] sm:$0xff] %v3986_v11  ;;  %4092 = vmatprep.mubr.f32.mxu0 %v3986_v11 }
 0x770   :  { %4093 = vmatmul.mubr.f32.vlgmr.msra.gmra.mrb[8].mxu0 %v3985_v9 }
 0x771   :  { %6248 = shalt.err (!%p6245_p10)
}
 0x772   :  { %s6249_s2 = scalar_lea.hbm %s6668_s13, 256 }
 0x773   :  { %p6250_p11 = scmp.ne.s32.totalorder %s6668_s13, %s6249_s2  ;;  %p6253_p12 = scmp.lt.u32.totalorder %s6249_s2, %s6668_s13 }
 0x775   :  { %p6255_p13 = pnand %p6253_p12, %p6250_p11 }
 0x777   :  { %6258 = shalt.err (!%p6255_p13)
}
 0x778   :  { %4108 = dma.vmem_to_hbm [thread:$0]  %s4106_s11, 256, %s6668_s13, [#allocation4]   ;;  %v4134_v33 = vld [vmem:[#allocation22] ss:$0 sm:$0xff] }
 0x779   :  { %s6322_s9 = smov [#allocation24]  }
 0x77a   :  { %s4115_s3 = sshll.u32 %s6322_s9, 4  ;;  %s4116_s3 = int_to_ptr.vmem [resolvable:$true] %s4115_s3 }
 0x77b   :  { %s6259_s8 = scalar_lea.vmem %s4116_s3, 128  ;;  %p6264_p1 = scmp.lt.s32.totalorder %s4116_s3, %s4116_s3 }
 0x77c   :  { %p6260_p0 = scmp.ne.s32.totalorder %s4116_s3, %s6259_s8  ;;  %p6265_p2 = scmp.lt.s32.totalorder %s6259_s8, %s6259_s8 }
 0x77e   :  { %p6266_p3 = por %p6265_p2, %p6264_p1 }
 0x780   :  { %p6267_p4 = pnand %p6266_p3, %p6260_p0 }
 0x843   :  { %v4167_v16 = vpop.f32.mrb[8].mxu0 }
 0x844   :  { %v4168_v12 = vpop.f32.mrb[9].mxu0 }
 0x845   :  { %v4169_v10 = vadd.f32 %v4168_v12, %v4167_v16 }
 0x847   :  { %v4095_v13 = vadd.f32 %v4169_v10, %v4134_v33 }
 0x849   :  { %4098 = vst [vmem:[#allocation24] sm:$0xff] %v4095_v13 }
 0x84a   :  { %6270 = shalt.err (!%p6267_p4)
}
 0x84b   :  { %s6271_s13 = scalar_lea.hbm %s6669_s14, 128 }
 0x84c   :  { %p6272_p5 = scmp.ne.s32.totalorder %s6669_s14, %s6271_s13  ;;  %p6275_p6 = scmp.lt.u32.totalorder %s6271_s13, %s6669_s14 }
 0x84e   :  { %p6277_p7 = pnand %p6275_p6, %p6272_p5 }
 0x850   :  { %6280 = shalt.err (!%p6277_p7)
}
 0x851   :  { %4118 = dma.vmem_to_hbm [thread:$0]  %s4116_s3, 128, %s6669_s14, [#allocation25]  }
 0x852   :  { %6295 = dma.done.wait [#allocation4], 256  }
 0x853   :  { %6296 = vsyncadd [#allocation4], 4294967040 }
 0x854   :  { %6297 = dma.done.wait [#allocation25], 128  }
 0x855   :  { %6298 = vsyncadd [#allocation25], 4294967168 }
 0x856   :  { %4125 = vsyncpa [#allocation3], 1 }
 0x857   :  { %4126 = vsyncpa [#allocation6], 1 }
 0x858   :  { %4127 = vsyncpa [#allocation9], 1 }
 0x859   :  { %4128 = vsyncpa [#allocation12], 1 }
 0x85a   :  { %4129 = vsyncpa [#allocation15], 1 }
 0x85b   :  { %4130 = vsyncpa [#allocation18], 1 }
 0x85c   :  { %4131 = vsyncpa [#allocation21], 1 }
 0x85d   :  { %4132 = vsyncpa [#allocation4], 1 }
 0x85e   :  { %4133 = vsyncpa [#allocation25], 1 }

</bundles_post_ra>
